<compile_context>
chip_gen: v5e
topology: v5e:2x2
jax: 0.10.0
libtpu: 0.0.40
codegen_flags: <defaults>
</compile_context>

<pallas_src>
import jax
import jax.numpy as jnp
from jax.experimental import pallas as pl
from jax.experimental.pallas import tpu as pltpu


# ------------------------------ constants ---------------------------------- #

IN_C = 3
C1, C2, C3, C4, NOUT = 10, 20, 30, 20, 2
K1, K2, K3 = 5, 4, 4
H_IN = W_IN = 80            # implied by the flatten size (C3 * 1 * 1)
OH1 = H_IN // K1            # 16 : conv1 output spatial
OH2 = OH1 // K2             # 4  : conv2 output spatial
NG2 = K2 * K2               # 16 : conv2 kernel positions (kh2, kw2)
NG3 = K3 * K3               # 16 : conv3 kernel positions (== OH2*OH2)
PAD = 128                   # lane-dense channel / K padding


# ----------------------------- Pallas kernel ------------------------------- #

def _net_kernel(p1_ref, w1_ref, w2_ref, w3_ref, w45_ref, sh_ref,
                o_ref, h1_ref, h2t_ref):
    """Fused conv1+bn1+relu -> conv2+bn2+relu -> conv3+bn3+relu -> fc1 -> fc2.

    p1_ref  : (NG2 * NG3 * B_pad, 128) bf16  conv1 patches, rows ordered
              (kh2, kw2, y2, x2, b); columns (c, kh1, kw1) zero-padded to 128.
    w1_ref  : (128, 128) bf16               conv1 weights (BN1 scale folded).
    w2_ref  : (NG2, 128, 128) bf16          per conv2-kernel-position blocks.
    w3_ref  : (NG3*128, 128) bf16           conv3 K-stacked weight (BN3 folded).
    w45_ref : (2, 128, 128) bf16            fc1 / fc2 weights (padded).
    sh_ref  : (8, 128) f32                  rows 0..4 = folded shifts/biases.
    o_ref   : (B_pad, 128) f32              first NOUT columns are the logits.
    h1_ref  : (NG2*NG3*B_pad, 128) bf16     VMEM scratch: conv1 activations.
    h2t_ref : (B_pad, NG3*128) f32          VMEM scratch: conv2 acts, relaid
                                            out as (b, g3*128 + c).
    """
    n_g2 = w2_ref.shape[0]                 # conv2 kernel positions
    rows2 = p1_ref.shape[0] // n_g2        # = NG3 * B_pad
    bpad = o_ref.shape[0]                  # padded batch
    n_g3 = rows2 // bpad                   # conv3 kernel positions

    s1 = sh_ref[0:1, :]
    s2 = sh_ref[1:2, :]
    s3 = sh_ref[2:3, :]
    s4 = sh_ref[3:4, :]
    s5 = sh_ref[4:5, :]

    # ---- conv1 (+bn1+relu): one big bf16 MXU dot, one f32 epilogue ----------
    h1 = jnp.dot(p1_ref[...], w1_ref[...], preferred_element_type=jnp.float32)
    h1_ref[...] = jnp.maximum(h1 + s1, 0.0).astype(h1_ref.dtype)

    # ---- conv2: vreg-accumulated sum over the 16 kernel positions -----------
    acc2 = jnp.dot(h1_ref[0:rows2, :], w2_ref[0],
                   preferred_element_type=jnp.float32)
    for g in range(1, n_g2):               # static unrolled loop
        acc2 = acc2 + jnp.dot(h1_ref[g * rows2:(g + 1) * rows2, :], w2_ref[g],
                              preferred_element_type=jnp.float32)

    # ---- bn2 + relu, and (g3, b)-rows -> (b, g3*128)-lanes relayout ---------
    # acc2 rows are ordered (g3, b); 16 tile-aligned stores into h2t scratch.
    for g in range(n_g3):                  # static unrolled loop
        h2t_ref[:, g * PAD:(g + 1) * PAD] = jnp.maximum(
            acc2[g * bpad:(g + 1) * bpad, :] + s2, 0.0)

    # ---- conv3 (+bn3+relu): single K-stacked bf16 dot -----------------------
    h3 = jnp.dot(h2t_ref[...].astype(jnp.bfloat16), w3_ref[...],
                 preferred_element_type=jnp.float32)
    h3 = jnp.maximum(h3 + s3, 0.0)         # (bpad, 128) f32 == flattened acts

    # ---- fc1 + relu, fc2 -----------------------------------------------------
    h4 = jnp.dot(h3.astype(jnp.bfloat16), w45_ref[0],
                 preferred_element_type=jnp.float32)
    h4 = jnp.maximum(h4 + s4, 0.0)
    o_ref[...] = jnp.dot(h4.astype(jnp.bfloat16), w45_ref[1],
                         preferred_element_type=jnp.float32) + s5


def _fused_forward(p1, prep):
    n_g2 = prep["w2"].shape[0]
    rows_all = p1.shape[0]
    rows2 = rows_all // n_g2
    n_g3 = prep["w3"].shape[0] // PAD
    bpad = rows2 // n_g3
    vmem = pl.BlockSpec(memory_space=pltpu.MemorySpace.VMEM)
    args = (p1, prep["w1"], prep["w2"], prep["w3"], prep["w45"], prep["sh"])
    return pl.pallas_call(
        _net_kernel,
        out_shape=jax.ShapeDtypeStruct((bpad, PAD), jnp.float32),
        in_specs=[vmem] * len(args),
        out_specs=vmem,
        scratch_shapes=[pltpu.VMEM((rows_all, PAD), jnp.bfloat16),
                        pltpu.VMEM((bpad, n_g3 * PAD), jnp.float32)],
    )(*args)


# --------------------------- parameter prep -------------------------------- #

def _fold_bn(conv_bias, gamma, beta, mean, var, eps=1e-5):
    """Eval-mode BN folded into per-channel (scale, shift) applied after the
    bias-free conv:  y = conv_nobias * scale + shift."""
    inv_std = 1.0 / jnp.sqrt(var + eps)
    scale = gamma * inv_std
    shift = beta + scale * (conv_bias - mean)
    return scale, shift


def prepare_params(p):
    """One-time re-layout of weights for the fused kernel (outside hot path).

    BN scale folded into weight columns; all K/N dims padded to 128; all
    matmul weights cast to bf16; shifts packed into one (8,128) f32 array."""
    def pad2(m, r, c):
        return jnp.pad(m, ((0, r - m.shape[0]), (0, c - m.shape[1])))

    def padrow(v):
        return jnp.pad(v, (0, PAD - v.shape[0])).astype(jnp.float32)

    # conv1 (+bn1): patch columns are (c, kh1, kw1)
    sc1, sh1 = _fold_bn(p["b1"], *p["bn1"])
    w1m = p["w1"].transpose(1, 2, 3, 0).reshape(IN_C * K1 * K1, C1) * sc1[None, :]
    w1m = pad2(w1m, PAD, PAD).astype(jnp.bfloat16)

    # conv2 (+bn2): one (ic, oc) block per kernel position g2 = (kh2, kw2)
    sc2, sh2 = _fold_bn(p["b2"], *p["bn2"])
    w2m = p["w2"].transpose(2, 3, 1, 0).reshape(NG2, C1, C2) * sc2[None, None, :]
    w2m = jnp.pad(w2m, ((0, 0), (0, PAD - C1), (0, PAD - C2))).astype(jnp.bfloat16)

    # conv3 (+bn3): K-stacked (g3*128 + ic, oc) matrix for a single dot
    sc3, sh3 = _fold_bn(p["b3"], *p["bn3"])
    w3m = p["w3"].transpose(2, 3, 1, 0).reshape(NG3, C2, C3) * sc3[None, None, :]
    w3m = jnp.pad(w3m, ((0, 0), (0, PAD - C2), (0, PAD - C3)))
    w3m = w3m.reshape(NG3 * PAD, PAD).astype(jnp.bfloat16)

    # fc layers, stacked into one array
    w4m = pad2(p["w4"].T, PAD, PAD)
    w5m = pad2(p["w5"].T, PAD, PAD)
    w45 = jnp.stack([w4m, w5m], axis=0).astype(jnp.bfloat16)

    # packed shifts / biases: rows 0..4 used, rows 5..7 zero
    zero = jnp.zeros((PAD,), jnp.float32)
    sh = jnp.stack([padrow(sh1), padrow(sh2), padrow(sh3),
                    padrow(p["b4"]), padrow(p["b5"]), zero, zero, zero], axis=0)

    return dict(w1=w1m, w2=w2m, w3=w3m, w45=w45, sh=sh)


# ------------------------------- forward ------------------------------------ #

@jax.jit
def net_forward(x_nchw, prep):
    B, C, H, W = x_nchw.shape
    assert (C, H, W) == (IN_C, H_IN, W_IN), (C, H, W)
    b_pad = max(8, -(-B // 8) * 8)                       # batch -> multiple of 8
    x = jnp.pad(x_nchw, ((0, b_pad - B), (0, 0), (0, 0), (0, 0)))

    # Non-overlapping conv1 patches with row ordering (kh2, kw2, y2, x2, b) so
    # that conv2/conv3 regrouping inside the kernel is plain static slicing.
    #   H index = (y2*K2 + kh2)*K1 + kh1,   W index = (x2*K2 + kw2)*K1 + kw1
    x6 = x.reshape(b_pad, C, OH2, K2, K1, OH2, K2, K1)
    #            dims: (b, c, y2, kh2, kh1, x2, kw2, kw1)
    xt = jnp.transpose(x6, (3, 6, 2, 5, 0, 1, 4, 7))
    #            dims: (kh2, kw2, y2, x2, b, c, kh1, kw1)
    p1 = xt.reshape(NG2 * OH2 * OH2 * b_pad, C * K1 * K1)
    p1 = jnp.pad(p1, ((0, 0), (0, PAD - C * K1 * K1))).astype(jnp.bfloat16)

    out = _fused_forward(p1, prep)                       # (b_pad, 128)
    return out[:B, :NOUT]


# ----------------------- pure-JAX reference (check) ------------------------- #

def _reference_forward(x, p):
    def conv(x, w, b, k):
        y = jax.lax.conv_general_dilated(
            x, w, (k, k), "VALID", dimension_numbers=("NCHW", "OIHW", "NCHW"))
        return y + b[None, :, None, None]

    def bn(x, gamma, beta, mean, var, eps=1e-5):
        g = gamma[None, :, None, None]
        return g * (x - mean[None, :, None, None]) / jnp.sqrt(
            var[None, :, None, None] + eps) + beta[None, :, None, None]

    x = jax.nn.relu(bn(conv(x, p["w1"], p["b1"], K1), *p["bn1"]))
    x = jax.nn.relu(bn(conv(x, p["w2"], p["b2"], K2), *p["bn2"]))
    x = jax.nn.relu(bn(conv(x, p["w3"], p["b3"], K3), *p["bn3"]))
    x = x.reshape(x.shape[0], -1)
    x = jax.nn.relu(x @ p["w4"].T + p["b4"])
    return x @ p["w5"].T + p["b5"]


# ------------------------------ parameters ---------------------------------- #

def init_params(key):
    ks = jax.random.split(key, 16)
    p = {}
    p["w1"] = 0.1 * jax.random.normal(ks[0], (C1, IN_C, K1, K1), jnp.float32)
    p["b1"] = 0.1 * jax.random.normal(ks[1], (C1,), jnp.float32)
    p["bn1"] = (1.0 + 0.1 * jax.random.normal(ks[2], (C1,), jnp.float32),
                0.1 * jax.random.normal(ks[3], (C1,), jnp.float32),
                0.05 * jax.random.normal(ks[4], (C1,), jnp.float32),
                0.5 + jnp.abs(0.2 * jax.random.normal(ks[5], (C1,), jnp.float32)))
    p["w2"] = 0.1 * jax.random.normal(ks[6], (C2, C1, K2, K2), jnp.float32)
    p["b2"] = 0.1 * jax.random.normal(ks[7], (C2,), jnp.float32)
    p["bn2"] = (1.0 + 0.1 * jax.random.normal(ks[8], (C2,), jnp.float32),
                0.1 * jax.random.normal(ks[9], (C2,), jnp.float32),
                0.05 * jax.random.normal(ks[10], (C2,), jnp.float32),
                0.5 + jnp.abs(0.2 * jax.random.normal(ks[11], (C2,), jnp.float32)))
    p["w3"] = 0.1 * jax.random.normal(ks[12], (C3, C2, K3, K3), jnp.float32)
    p["b3"] = 0.1 * jax.random.normal(ks[13], (C3,), jnp.float32)
    k2 = jax.random.split(ks[14], 6)
    p["bn3"] = (1.0 + 0.1 * jax.random.normal(k2[0], (C3,), jnp.float32),
                0.1 * jax.random.normal(k2[1], (C3,), jnp.float32),
                0.05 * jax.random.normal(k2[2], (C3,), jnp.float32),
                0.5 + jnp.abs(0.2 * jax.random.normal(k2[3], (C3,), jnp.float32)))
    p["w4"] = 0.1 * jax.random.normal(k2[4], (C4, C3), jnp.float32)
    p["b4"] = 0.1 * jax.random.normal(k2[5], (C4,), jnp.float32)
    k3 = jax.random.split(ks[15], 2)
    p["w5"] = 0.1 * jax.random.normal(k3[0], (NOUT, C4), jnp.float32)
    p["b5"] = 0.1 * jax.random.normal(k3[1], (NOUT,), jnp.float32)
    return p


if __name__ == "__main__":
    key = jax.random.PRNGKey(0)
    k_in, k_par = jax.random.split(key)
    # Spatial size must be 80: 80/5 -> 16, /4 -> 4, /4 -> 1 (matches 30*1*1 flatten).
    x = jax.random.normal(k_in, (2, IN_C, H_IN, W_IN), jnp.float32)
    params = init_params(k_par)
    prep = prepare_params(params)            # one-time BN fold + weight re-layout

    out = net_forward(x, prep)
    out = jax.block_until_ready(out)
    assert out.shape == (2, NOUT), out.shape

    ref = _reference_forward(x, params)
    assert jnp.allclose(out, ref, rtol=5e-2, atol=5e-2), (out, ref)

    print("KERNEL_OK")
</pallas_src>

<mosaic_0001>
module attributes {stable_mosaic.version = 11 : i64} {
  func.func @_net_kernel(%arg0: memref<2048x128xbf16, #tpu.memory_space<vmem>>, %arg1: memref<128x128xbf16, #tpu.memory_space<vmem>>, %arg2: memref<16x128x128xbf16, #tpu.memory_space<vmem>>, %arg3: memref<2048x128xbf16, #tpu.memory_space<vmem>>, %arg4: memref<2x128x128xbf16, #tpu.memory_space<vmem>>, %arg5: memref<8x128xf32, #tpu.memory_space<vmem>>, %arg6: memref<8x128xf32, #tpu.memory_space<vmem>>, %arg7: memref<2048x128xbf16, #tpu.memory_space<vmem>>, %arg8: memref<8x2048xf32, #tpu.memory_space<vmem>>) attributes {dimension_semantics = [], scalar_prefetch = 0 : i64, scratch_operands = 2 : i64, tpu.core_type = #tpu.core_type<tc>} {
    %c0 = arith.constant 0 : index
    %c0_0 = arith.constant 0 : index
    %0 = vector.load %arg5[%c0, %c0_0] : memref<8x128xf32, #tpu.memory_space<vmem>>, vector<1x128xf32>
    %c1 = arith.constant 1 : index
    %c0_1 = arith.constant 0 : index
    %1 = vector.load %arg5[%c1, %c0_1] : memref<8x128xf32, #tpu.memory_space<vmem>>, vector<1x128xf32>
    %c2 = arith.constant 2 : index
    %c0_2 = arith.constant 0 : index
    %2 = vector.load %arg5[%c2, %c0_2] : memref<8x128xf32, #tpu.memory_space<vmem>>, vector<1x128xf32>
    %c3 = arith.constant 3 : index
    %c0_3 = arith.constant 0 : index
    %3 = vector.load %arg5[%c3, %c0_3] : memref<8x128xf32, #tpu.memory_space<vmem>>, vector<1x128xf32>
    %c4 = arith.constant 4 : index
    %c0_4 = arith.constant 0 : index
    %4 = vector.load %arg5[%c4, %c0_4] : memref<8x128xf32, #tpu.memory_space<vmem>>, vector<1x128xf32>
    %c0_5 = arith.constant 0 : index
    %c0_6 = arith.constant 0 : index
    %5 = vector.load %arg0[%c0_5, %c0_6] : memref<2048x128xbf16, #tpu.memory_space<vmem>>, vector<2048x128xbf16>
    %c0_7 = arith.constant 0 : index
    %c0_8 = arith.constant 0 : index
    %6 = vector.load %arg1[%c0_7, %c0_8] : memref<128x128xbf16, #tpu.memory_space<vmem>>, vector<128x128xbf16>
    %cst = arith.constant dense<0.000000e+00> : vector<2048x128xf32>
    %7 = tpu.matmul %5, %6, %cst {dimension_numbers = #tpu.dot_dimension_numbers<[1], [0], [0], [1], [0, 0, 1, 1], [], []>} : vector<2048x128xbf16>, vector<128x128xbf16>, vector<2048x128xf32> -> vector<2048x128xf32>
    %8 = vector.broadcast %0 : vector<1x128xf32> to vector<2048x128xf32>
    %9 = arith.addf %7, %8 : vector<2048x128xf32>
    %cst_9 = arith.constant 0.000000e+00 : f32
    %10 = vector.broadcast %cst_9 : f32 to vector<2048x128xf32>
    %11 = arith.maximumf %9, %10 : vector<2048x128xf32>
    %12 = arith.truncf %11 : vector<2048x128xf32> to vector<2048x128xbf16>
    %c0_10 = arith.constant 0 : index
    %c0_11 = arith.constant 0 : index
    %13 = vector.load %arg7[%c0_10, %c0_11] : memref<2048x128xbf16, #tpu.memory_space<vmem>>, vector<2048x128xbf16>
    tpu.vector_store %arg7[%c0_10, %c0_11], %12 {strides = array<i32>} : memref<2048x128xbf16, #tpu.memory_space<vmem>>, vector<2048x128xbf16>,
    %c0_12 = arith.constant 0 : index
    %c0_13 = arith.constant 0 : index
    %14 = vector.load %arg7[%c0_12, %c0_13] : memref<2048x128xbf16, #tpu.memory_space<vmem>>, vector<128x128xbf16>
    %c0_14 = arith.constant 0 : index
    %c0_15 = arith.constant 0 : index
    %c0_16 = arith.constant 0 : index
    %15 = vector.load %arg2[%c0_14, %c0_15, %c0_16] : memref<16x128x128xbf16, #tpu.memory_space<vmem>>, vector<1x128x128xbf16>
    %16 = vector.shape_cast %15 : vector<1x128x128xbf16> to vector<128x128xbf16>
    %cst_17 = arith.constant dense<0.000000e+00> : vector<128x128xf32>
    %17 = tpu.matmul %14, %16, %cst_17 {dimension_numbers = #tpu.dot_dimension_numbers<[1], [0], [0], [1], [0, 0, 1, 1], [], []>} : vector<128x128xbf16>, vector<128x128xbf16>, vector<128x128xf32> -> vector<128x128xf32>
    %c128 = arith.constant 128 : index
    %c0_18 = arith.constant 0 : index
    %18 = vector.load %arg7[%c128, %c0_18] : memref<2048x128xbf16, #tpu.memory_space<vmem>>, vector<128x128xbf16>
    %c1_19 = arith.constant 1 : index
    %c0_20 = arith.constant 0 : index
    %c0_21 = arith.constant 0 : index
    %19 = vector.load %arg2[%c1_19, %c0_20, %c0_21] : memref<16x128x128xbf16, #tpu.memory_space<vmem>>, vector<1x128x128xbf16>
    %20 = vector.shape_cast %19 : vector<1x128x128xbf16> to vector<128x128xbf16>
    %cst_22 = arith.constant dense<0.000000e+00> : vector<128x128xf32>
    %21 = tpu.matmul %18, %20, %cst_22 {dimension_numbers = #tpu.dot_dimension_numbers<[1], [0], [0], [1], [0, 0, 1, 1], [], []>} : vector<128x128xbf16>, vector<128x128xbf16>, vector<128x128xf32> -> vector<128x128xf32>
    %22 = arith.addf %17, %21 : vector<128x128xf32>
    %c256 = arith.constant 256 : index
    %c0_23 = arith.constant 0 : index
    %23 = vector.load %arg7[%c256, %c0_23] : memref<2048x128xbf16, #tpu.memory_space<vmem>>, vector<128x128xbf16>
    %c2_24 = arith.constant 2 : index
    %c0_25 = arith.constant 0 : index
    %c0_26 = arith.constant 0 : index
    %24 = vector.load %arg2[%c2_24, %c0_25, %c0_26] : memref<16x128x128xbf16, #tpu.memory_space<vmem>>, vector<1x128x128xbf16>
    %25 = vector.shape_cast %24 : vector<1x128x128xbf16> to vector<128x128xbf16>
    %cst_27 = arith.constant dense<0.000000e+00> : vector<128x128xf32>
    %26 = tpu.matmul %23, %25, %cst_27 {dimension_numbers = #tpu.dot_dimension_numbers<[1], [0], [0], [1], [0, 0, 1, 1], [], []>} : vector<128x128xbf16>, vector<128x128xbf16>, vector<128x128xf32> -> vector<128x128xf32>
    %27 = arith.addf %22, %26 : vector<128x128xf32>
    %c384 = arith.constant 384 : index
    %c0_28 = arith.constant 0 : index
    %28 = vector.load %arg7[%c384, %c0_28] : memref<2048x128xbf16, #tpu.memory_space<vmem>>, vector<128x128xbf16>
    %c3_29 = arith.constant 3 : index
    %c0_30 = arith.constant 0 : index
    %c0_31 = arith.constant 0 : index
    %29 = vector.load %arg2[%c3_29, %c0_30, %c0_31] : memref<16x128x128xbf16, #tpu.memory_space<vmem>>, vector<1x128x128xbf16>
    %30 = vector.shape_cast %29 : vector<1x128x128xbf16> to vector<128x128xbf16>
    %cst_32 = arith.constant dense<0.000000e+00> : vector<128x128xf32>
    %31 = tpu.matmul %28, %30, %cst_32 {dimension_numbers = #tpu.dot_dimension_numbers<[1], [0], [0], [1], [0, 0, 1, 1], [], []>} : vector<128x128xbf16>, vector<128x128xbf16>, vector<128x128xf32> -> vector<128x128xf32>
    %32 = arith.addf %27, %31 : vector<128x128xf32>
    %c512 = arith.constant 512 : index
    %c0_33 = arith.constant 0 : index
    %33 = vector.load %arg7[%c512, %c0_33] : memref<2048x128xbf16, #tpu.memory_space<vmem>>, vector<128x128xbf16>
    %c4_34 = arith.constant 4 : index
    %c0_35 = arith.constant 0 : index
    %c0_36 = arith.constant 0 : index
    %34 = vector.load %arg2[%c4_34, %c0_35, %c0_36] : memref<16x128x128xbf16, #tpu.memory_space<vmem>>, vector<1x128x128xbf16>
    %35 = vector.shape_cast %34 : vector<1x128x128xbf16> to vector<128x128xbf16>
    %cst_37 = arith.constant dense<0.000000e+00> : vector<128x128xf32>
    %36 = tpu.matmul %33, %35, %cst_37 {dimension_numbers = #tpu.dot_dimension_numbers<[1], [0], [0], [1], [0, 0, 1, 1], [], []>} : vector<128x128xbf16>, vector<128x128xbf16>, vector<128x128xf32> -> vector<128x128xf32>
    %37 = arith.addf %32, %36 : vector<128x128xf32>
    %c640 = arith.constant 640 : index
    %c0_38 = arith.constant 0 : index
    %38 = vector.load %arg7[%c640, %c0_38] : memref<2048x128xbf16, #tpu.memory_space<vmem>>, vector<128x128xbf16>
    %c5 = arith.constant 5 : index
    %c0_39 = arith.constant 0 : index
    %c0_40 = arith.constant 0 : index
    %39 = vector.load %arg2[%c5, %c0_39, %c0_40] : memref<16x128x128xbf16, #tpu.memory_space<vmem>>, vector<1x128x128xbf16>
    %40 = vector.shape_cast %39 : vector<1x128x128xbf16> to vector<128x128xbf16>
    %cst_41 = arith.constant dense<0.000000e+00> : vector<128x128xf32>
    %41 = tpu.matmul %38, %40, %cst_41 {dimension_numbers = #tpu.dot_dimension_numbers<[1], [0], [0], [1], [0, 0, 1, 1], [], []>} : vector<128x128xbf16>, vector<128x128xbf16>, vector<128x128xf32> -> vector<128x128xf32>
    %42 = arith.addf %37, %41 : vector<128x128xf32>
    %c768 = arith.constant 768 : index
    %c0_42 = arith.constant 0 : index
    %43 = vector.load %arg7[%c768, %c0_42] : memref<2048x128xbf16, #tpu.memory_space<vmem>>, vector<128x128xbf16>
    %c6 = arith.constant 6 : index
    %c0_43 = arith.constant 0 : index
    %c0_44 = arith.constant 0 : index
    %44 = vector.load %arg2[%c6, %c0_43, %c0_44] : memref<16x128x128xbf16, #tpu.memory_space<vmem>>, vector<1x128x128xbf16>
    %45 = vector.shape_cast %44 : vector<1x128x128xbf16> to vector<128x128xbf16>
    %cst_45 = arith.constant dense<0.000000e+00> : vector<128x128xf32>
    %46 = tpu.matmul %43, %45, %cst_45 {dimension_numbers = #tpu.dot_dimension_numbers<[1], [0], [0], [1], [0, 0, 1, 1], [], []>} : vector<128x128xbf16>, vector<128x128xbf16>, vector<128x128xf32> -> vector<128x128xf32>
    %47 = arith.addf %42, %46 : vector<128x128xf32>
    %c896 = arith.constant 896 : index
    %c0_46 = arith.constant 0 : index
    %48 = vector.load %arg7[%c896, %c0_46] : memref<2048x128xbf16, #tpu.memory_space<vmem>>, vector<128x128xbf16>
    %c7 = arith.constant 7 : index
    %c0_47 = arith.constant 0 : index
    %c0_48 = arith.constant 0 : index
    %49 = vector.load %arg2[%c7, %c0_47, %c0_48] : memref<16x128x128xbf16, #tpu.memory_space<vmem>>, vector<1x128x128xbf16>
    %50 = vector.shape_cast %49 : vector<1x128x128xbf16> to vector<128x128xbf16>
    %cst_49 = arith.constant dense<0.000000e+00> : vector<128x128xf32>
    %51 = tpu.matmul %48, %50, %cst_49 {dimension_numbers = #tpu.dot_dimension_numbers<[1], [0], [0], [1], [0, 0, 1, 1], [], []>} : vector<128x128xbf16>, vector<128x128xbf16>, vector<128x128xf32> -> vector<128x128xf32>
    %52 = arith.addf %47, %51 : vector<128x128xf32>
    %c1024 = arith.constant 1024 : index
    %c0_50 = arith.constant 0 : index
    %53 = vector.load %arg7[%c1024, %c0_50] : memref<2048x128xbf16, #tpu.memory_space<vmem>>, vector<128x128xbf16>
    %c8 = arith.constant 8 : index
    %c0_51 = arith.constant 0 : index
    %c0_52 = arith.constant 0 : index
    %54 = vector.load %arg2[%c8, %c0_51, %c0_52] : memref<16x128x128xbf16, #tpu.memory_space<vmem>>, vector<1x128x128xbf16>
    %55 = vector.shape_cast %54 : vector<1x128x128xbf16> to vector<128x128xbf16>
    %cst_53 = arith.constant dense<0.000000e+00> : vector<128x128xf32>
    %56 = tpu.matmul %53, %55, %cst_53 {dimension_numbers = #tpu.dot_dimension_numbers<[1], [0], [0], [1], [0, 0, 1, 1], [], []>} : vector<128x128xbf16>, vector<128x128xbf16>, vector<128x128xf32> -> vector<128x128xf32>
    %57 = arith.addf %52, %56 : vector<128x128xf32>
    %c1152 = arith.constant 1152 : index
    %c0_54 = arith.constant 0 : index
    %58 = vector.load %arg7[%c1152, %c0_54] : memref<2048x128xbf16, #tpu.memory_space<vmem>>, vector<128x128xbf16>
    %c9 = arith.constant 9 : index
    %c0_55 = arith.constant 0 : index
    %c0_56 = arith.constant 0 : index
    %59 = vector.load %arg2[%c9, %c0_55, %c0_56] : memref<16x128x128xbf16, #tpu.memory_space<vmem>>, vector<1x128x128xbf16>
    %60 = vector.shape_cast %59 : vector<1x128x128xbf16> to vector<128x128xbf16>
    %cst_57 = arith.constant dense<0.000000e+00> : vector<128x128xf32>
    %61 = tpu.matmul %58, %60, %cst_57 {dimension_numbers = #tpu.dot_dimension_numbers<[1], [0], [0], [1], [0, 0, 1, 1], [], []>} : vector<128x128xbf16>, vector<128x128xbf16>, vector<128x128xf32> -> vector<128x128xf32>
    %62 = arith.addf %57, %61 : vector<128x128xf32>
    %c1280 = arith.constant 1280 : index
    %c0_58 = arith.constant 0 : index
    %63 = vector.load %arg7[%c1280, %c0_58] : memref<2048x128xbf16, #tpu.memory_space<vmem>>, vector<128x128xbf16>
    %c10 = arith.constant 10 : index
    %c0_59 = arith.constant 0 : index
    %c0_60 = arith.constant 0 : index
    %64 = vector.load %arg2[%c10, %c0_59, %c0_60] : memref<16x128x128xbf16, #tpu.memory_space<vmem>>, vector<1x128x128xbf16>
    %65 = vector.shape_cast %64 : vector<1x128x128xbf16> to vector<128x128xbf16>
    %cst_61 = arith.constant dense<0.000000e+00> : vector<128x128xf32>
    %66 = tpu.matmul %63, %65, %cst_61 {dimension_numbers = #tpu.dot_dimension_numbers<[1], [0], [0], [1], [0, 0, 1, 1], [], []>} : vector<128x128xbf16>, vector<128x128xbf16>, vector<128x128xf32> -> vector<128x128xf32>
    %67 = arith.addf %62, %66 : vector<128x128xf32>
    %c1408 = arith.constant 1408 : index
    %c0_62 = arith.constant 0 : index
    %68 = vector.load %arg7[%c1408, %c0_62] : memref<2048x128xbf16, #tpu.memory_space<vmem>>, vector<128x128xbf16>
    %c11 = arith.constant 11 : index
    %c0_63 = arith.constant 0 : index
    %c0_64 = arith.constant 0 : index
    %69 = vector.load %arg2[%c11, %c0_63, %c0_64] : memref<16x128x128xbf16, #tpu.memory_space<vmem>>, vector<1x128x128xbf16>
    %70 = vector.shape_cast %69 : vector<1x128x128xbf16> to vector<128x128xbf16>
    %cst_65 = arith.constant dense<0.000000e+00> : vector<128x128xf32>
    %71 = tpu.matmul %68, %70, %cst_65 {dimension_numbers = #tpu.dot_dimension_numbers<[1], [0], [0], [1], [0, 0, 1, 1], [], []>} : vector<128x128xbf16>, vector<128x128xbf16>, vector<128x128xf32> -> vector<128x128xf32>
    %72 = arith.addf %67, %71 : vector<128x128xf32>
    %c1536 = arith.constant 1536 : index
    %c0_66 = arith.constant 0 : index
    %73 = vector.load %arg7[%c1536, %c0_66] : memref<2048x128xbf16, #tpu.memory_space<vmem>>, vector<128x128xbf16>
    %c12 = arith.constant 12 : index
    %c0_67 = arith.constant 0 : index
    %c0_68 = arith.constant 0 : index
    %74 = vector.load %arg2[%c12, %c0_67, %c0_68] : memref<16x128x128xbf16, #tpu.memory_space<vmem>>, vector<1x128x128xbf16>
    %75 = vector.shape_cast %74 : vector<1x128x128xbf16> to vector<128x128xbf16>
    %cst_69 = arith.constant dense<0.000000e+00> : vector<128x128xf32>
    %76 = tpu.matmul %73, %75, %cst_69 {dimension_numbers = #tpu.dot_dimension_numbers<[1], [0], [0], [1], [0, 0, 1, 1], [], []>} : vector<128x128xbf16>, vector<128x128xbf16>, vector<128x128xf32> -> vector<128x128xf32>
    %77 = arith.addf %72, %76 : vector<128x128xf32>
    %c1664 = arith.constant 1664 : index
    %c0_70 = arith.constant 0 : index
    %78 = vector.load %arg7[%c1664, %c0_70] : memref<2048x128xbf16, #tpu.memory_space<vmem>>, vector<128x128xbf16>
    %c13 = arith.constant 13 : index
    %c0_71 = arith.constant 0 : index
    %c0_72 = arith.constant 0 : index
    %79 = vector.load %arg2[%c13, %c0_71, %c0_72] : memref<16x128x128xbf16, #tpu.memory_space<vmem>>, vector<1x128x128xbf16>
    %80 = vector.shape_cast %79 : vector<1x128x128xbf16> to vector<128x128xbf16>
    %cst_73 = arith.constant dense<0.000000e+00> : vector<128x128xf32>
    %81 = tpu.matmul %78, %80, %cst_73 {dimension_numbers = #tpu.dot_dimension_numbers<[1], [0], [0], [1], [0, 0, 1, 1], [], []>} : vector<128x128xbf16>, vector<128x128xbf16>, vector<128x128xf32> -> vector<128x128xf32>
    %82 = arith.addf %77, %81 : vector<128x128xf32>
    %c1792 = arith.constant 1792 : index
    %c0_74 = arith.constant 0 : index
    %83 = vector.load %arg7[%c1792, %c0_74] : memref<2048x128xbf16, #tpu.memory_space<vmem>>, vector<128x128xbf16>
    %c14 = arith.constant 14 : index
    %c0_75 = arith.constant 0 : index
    %c0_76 = arith.constant 0 : index
    %84 = vector.load %arg2[%c14, %c0_75, %c0_76] : memref<16x128x128xbf16, #tpu.memory_space<vmem>>, vector<1x128x128xbf16>
    %85 = vector.shape_cast %84 : vector<1x128x128xbf16> to vector<128x128xbf16>
    %cst_77 = arith.constant dense<0.000000e+00> : vector<128x128xf32>
    %86 = tpu.matmul %83, %85, %cst_77 {dimension_numbers = #tpu.dot_dimension_numbers<[1], [0], [0], [1], [0, 0, 1, 1], [], []>} : vector<128x128xbf16>, vector<128x128xbf16>, vector<128x128xf32> -> vector<128x128xf32>
    %87 = arith.addf %82, %86 : vector<128x128xf32>
    %c1920 = arith.constant 1920 : index
    %c0_78 = arith.constant 0 : index
    %88 = vector.load %arg7[%c1920, %c0_78] : memref<2048x128xbf16, #tpu.memory_space<vmem>>, vector<128x128xbf16>
    %c15 = arith.constant 15 : index
    %c0_79 = arith.constant 0 : index
    %c0_80 = arith.constant 0 : index
    %89 = vector.load %arg2[%c15, %c0_79, %c0_80] : memref<16x128x128xbf16, #tpu.memory_space<vmem>>, vector<1x128x128xbf16>
    %90 = vector.shape_cast %89 : vector<1x128x128xbf16> to vector<128x128xbf16>
    %cst_81 = arith.constant dense<0.000000e+00> : vector<128x128xf32>
    %91 = tpu.matmul %88, %90, %cst_81 {dimension_numbers = #tpu.dot_dimension_numbers<[1], [0], [0], [1], [0, 0, 1, 1], [], []>} : vector<128x128xbf16>, vector<128x128xbf16>, vector<128x128xf32> -> vector<128x128xf32>
    %92 = arith.addf %87, %91 : vector<128x128xf32>
    %93 = vector.extract_strided_slice %92 {offsets = [0, 0], sizes = [8, 128], strides = [1, 1]} : vector<128x128xf32> to vector<8x128xf32>
    %94 = vector.broadcast %1 : vector<1x128xf32> to vector<8x128xf32>
    %95 = arith.addf %93, %94 : vector<8x128xf32>
    %cst_82 = arith.constant 0.000000e+00 : f32
    %96 = vector.broadcast %cst_82 : f32 to vector<8x128xf32>
    %97 = arith.maximumf %95, %96 : vector<8x128xf32>
    %c0_83 = arith.constant 0 : index
    %c0_84 = arith.constant 0 : index
    %98 = vector.load %arg8[%c0_83, %c0_84] : memref<8x2048xf32, #tpu.memory_space<vmem>>, vector<8x128xf32>
    tpu.vector_store %arg8[%c0_83, %c0_84], %97 {strides = array<i32>} : memref<8x2048xf32, #tpu.memory_space<vmem>>, vector<8x128xf32>,
    %99 = vector.extract_strided_slice %92 {offsets = [8, 0], sizes = [8, 128], strides = [1, 1]} : vector<128x128xf32> to vector<8x128xf32>
    %100 = vector.broadcast %1 : vector<1x128xf32> to vector<8x128xf32>
    %101 = arith.addf %99, %100 : vector<8x128xf32>
    %cst_85 = arith.constant 0.000000e+00 : f32
    %102 = vector.broadcast %cst_85 : f32 to vector<8x128xf32>
    %103 = arith.maximumf %101, %102 : vector<8x128xf32>
    %c0_86 = arith.constant 0 : index
    %c128_87 = arith.constant 128 : index
    %104 = vector.load %arg8[%c0_86, %c128_87] : memref<8x2048xf32, #tpu.memory_space<vmem>>, vector<8x128xf32>
    tpu.vector_store %arg8[%c0_86, %c128_87], %103 {strides = array<i32>} : memref<8x2048xf32, #tpu.memory_space<vmem>>, vector<8x128xf32>,
    %105 = vector.extract_strided_slice %92 {offsets = [16, 0], sizes = [8, 128], strides = [1, 1]} : vector<128x128xf32> to vector<8x128xf32>
    %106 = vector.broadcast %1 : vector<1x128xf32> to vector<8x128xf32>
    %107 = arith.addf %105, %106 : vector<8x128xf32>
    %cst_88 = arith.constant 0.000000e+00 : f32
    %108 = vector.broadcast %cst_88 : f32 to vector<8x128xf32>
    %109 = arith.maximumf %107, %108 : vector<8x128xf32>
    %c0_89 = arith.constant 0 : index
    %c256_90 = arith.constant 256 : index
    %110 = vector.load %arg8[%c0_89, %c256_90] : memref<8x2048xf32, #tpu.memory_space<vmem>>, vector<8x128xf32>
    tpu.vector_store %arg8[%c0_89, %c256_90], %109 {strides = array<i32>} : memref<8x2048xf32, #tpu.memory_space<vmem>>, vector<8x128xf32>,
    %111 = vector.extract_strided_slice %92 {offsets = [24, 0], sizes = [8, 128], strides = [1, 1]} : vector<128x128xf32> to vector<8x128xf32>
    %112 = vector.broadcast %1 : vector<1x128xf32> to vector<8x128xf32>
    %113 = arith.addf %111, %112 : vector<8x128xf32>
    %cst_91 = arith.constant 0.000000e+00 : f32
    %114 = vector.broadcast %cst_91 : f32 to vector<8x128xf32>
    %115 = arith.maximumf %113, %114 : vector<8x128xf32>
    %c0_92 = arith.constant 0 : index
    %c384_93 = arith.constant 384 : index
    %116 = vector.load %arg8[%c0_92, %c384_93] : memref<8x2048xf32, #tpu.memory_space<vmem>>, vector<8x128xf32>
    tpu.vector_store %arg8[%c0_92, %c384_93], %115 {strides = array<i32>} : memref<8x2048xf32, #tpu.memory_space<vmem>>, vector<8x128xf32>,
    %117 = vector.extract_strided_slice %92 {offsets = [32, 0], sizes = [8, 128], strides = [1, 1]} : vector<128x128xf32> to vector<8x128xf32>
    %118 = vector.broadcast %1 : vector<1x128xf32> to vector<8x128xf32>
    %119 = arith.addf %117, %118 : vector<8x128xf32>
    %cst_94 = arith.constant 0.000000e+00 : f32
    %120 = vector.broadcast %cst_94 : f32 to vector<8x128xf32>
    %121 = arith.maximumf %119, %120 : vector<8x128xf32>
    %c0_95 = arith.constant 0 : index
    %c512_96 = arith.constant 512 : index
    %122 = vector.load %arg8[%c0_95, %c512_96] : memref<8x2048xf32, #tpu.memory_space<vmem>>, vector<8x128xf32>
    tpu.vector_store %arg8[%c0_95, %c512_96], %121 {strides = array<i32>} : memref<8x2048xf32, #tpu.memory_space<vmem>>, vector<8x128xf32>,
    %123 = vector.extract_strided_slice %92 {offsets = [40, 0], sizes = [8, 128], strides = [1, 1]} : vector<128x128xf32> to vector<8x128xf32>
    %124 = vector.broadcast %1 : vector<1x128xf32> to vector<8x128xf32>
    %125 = arith.addf %123, %124 : vector<8x128xf32>
    %cst_97 = arith.constant 0.000000e+00 : f32
    %126 = vector.broadcast %cst_97 : f32 to vector<8x128xf32>
    %127 = arith.maximumf %125, %126 : vector<8x128xf32>
    %c0_98 = arith.constant 0 : index
    %c640_99 = arith.constant 640 : index
    %128 = vector.load %arg8[%c0_98, %c640_99] : memref<8x2048xf32, #tpu.memory_space<vmem>>, vector<8x128xf32>
    tpu.vector_store %arg8[%c0_98, %c640_99], %127 {strides = array<i32>} : memref<8x2048xf32, #tpu.memory_space<vmem>>, vector<8x128xf32>,
    %129 = vector.extract_strided_slice %92 {offsets = [48, 0], sizes = [8, 128], strides = [1, 1]} : vector<128x128xf32> to vector<8x128xf32>
    %130 = vector.broadcast %1 : vector<1x128xf32> to vector<8x128xf32>
    %131 = arith.addf %129, %130 : vector<8x128xf32>
    %cst_100 = arith.constant 0.000000e+00 : f32
    %132 = vector.broadcast %cst_100 : f32 to vector<8x128xf32>
    %133 = arith.maximumf %131, %132 : vector<8x128xf32>
    %c0_101 = arith.constant 0 : index
    %c768_102 = arith.constant 768 : index
    %134 = vector.load %arg8[%c0_101, %c768_102] : memref<8x2048xf32, #tpu.memory_space<vmem>>, vector<8x128xf32>
    tpu.vector_store %arg8[%c0_101, %c768_102], %133 {strides = array<i32>} : memref<8x2048xf32, #tpu.memory_space<vmem>>, vector<8x128xf32>,
    %135 = vector.extract_strided_slice %92 {offsets = [56, 0], sizes = [8, 128], strides = [1, 1]} : vector<128x128xf32> to vector<8x128xf32>
    %136 = vector.broadcast %1 : vector<1x128xf32> to vector<8x128xf32>
    %137 = arith.addf %135, %136 : vector<8x128xf32>
    %cst_103 = arith.constant 0.000000e+00 : f32
    %138 = vector.broadcast %cst_103 : f32 to vector<8x128xf32>
    %139 = arith.maximumf %137, %138 : vector<8x128xf32>
    %c0_104 = arith.constant 0 : index
    %c896_105 = arith.constant 896 : index
    %140 = vector.load %arg8[%c0_104, %c896_105] : memref<8x2048xf32, #tpu.memory_space<vmem>>, vector<8x128xf32>
    tpu.vector_store %arg8[%c0_104, %c896_105], %139 {strides = array<i32>} : memref<8x2048xf32, #tpu.memory_space<vmem>>, vector<8x128xf32>,
    %141 = vector.extract_strided_slice %92 {offsets = [64, 0], sizes = [8, 128], strides = [1, 1]} : vector<128x128xf32> to vector<8x128xf32>
    %142 = vector.broadcast %1 : vector<1x128xf32> to vector<8x128xf32>
    %143 = arith.addf %141, %142 : vector<8x128xf32>
    %cst_106 = arith.constant 0.000000e+00 : f32
    %144 = vector.broadcast %cst_106 : f32 to vector<8x128xf32>
    %145 = arith.maximumf %143, %144 : vector<8x128xf32>
    %c0_107 = arith.constant 0 : index
    %c1024_108 = arith.constant 1024 : index
    %146 = vector.load %arg8[%c0_107, %c1024_108] : memref<8x2048xf32, #tpu.memory_space<vmem>>, vector<8x128xf32>
    tpu.vector_store %arg8[%c0_107, %c1024_108], %145 {strides = array<i32>} : memref<8x2048xf32, #tpu.memory_space<vmem>>, vector<8x128xf32>,
    %147 = vector.extract_strided_slice %92 {offsets = [72, 0], sizes = [8, 128], strides = [1, 1]} : vector<128x128xf32> to vector<8x128xf32>
    %148 = vector.broadcast %1 : vector<1x128xf32> to vector<8x128xf32>
    %149 = arith.addf %147, %148 : vector<8x128xf32>
    %cst_109 = arith.constant 0.000000e+00 : f32
    %150 = vector.broadcast %cst_109 : f32 to vector<8x128xf32>
    %151 = arith.maximumf %149, %150 : vector<8x128xf32>
    %c0_110 = arith.constant 0 : index
    %c1152_111 = arith.constant 1152 : index
    %152 = vector.load %arg8[%c0_110, %c1152_111] : memref<8x2048xf32, #tpu.memory_space<vmem>>, vector<8x128xf32>
    tpu.vector_store %arg8[%c0_110, %c1152_111], %151 {strides = array<i32>} : memref<8x2048xf32, #tpu.memory_space<vmem>>, vector<8x128xf32>,
    %153 = vector.extract_strided_slice %92 {offsets = [80, 0], sizes = [8, 128], strides = [1, 1]} : vector<128x128xf32> to vector<8x128xf32>
    %154 = vector.broadcast %1 : vector<1x128xf32> to vector<8x128xf32>
    %155 = arith.addf %153, %154 : vector<8x128xf32>
    %cst_112 = arith.constant 0.000000e+00 : f32
    %156 = vector.broadcast %cst_112 : f32 to vector<8x128xf32>
    %157 = arith.maximumf %155, %156 : vector<8x128xf32>
    %c0_113 = arith.constant 0 : index
    %c1280_114 = arith.constant 1280 : index
    %158 = vector.load %arg8[%c0_113, %c1280_114] : memref<8x2048xf32, #tpu.memory_space<vmem>>, vector<8x128xf32>
    tpu.vector_store %arg8[%c0_113, %c1280_114], %157 {strides = array<i32>} : memref<8x2048xf32, #tpu.memory_space<vmem>>, vector<8x128xf32>,
    %159 = vector.extract_strided_slice %92 {offsets = [88, 0], sizes = [8, 128], strides = [1, 1]} : vector<128x128xf32> to vector<8x128xf32>
    %160 = vector.broadcast %1 : vector<1x128xf32> to vector<8x128xf32>
    %161 = arith.addf %159, %160 : vector<8x128xf32>
    %cst_115 = arith.constant 0.000000e+00 : f32
    %162 = vector.broadcast %cst_115 : f32 to vector<8x128xf32>
    %163 = arith.maximumf %161, %162 : vector<8x128xf32>
    %c0_116 = arith.constant 0 : index
    %c1408_117 = arith.constant 1408 : index
    %164 = vector.load %arg8[%c0_116, %c1408_117] : memref<8x2048xf32, #tpu.memory_space<vmem>>, vector<8x128xf32>
    tpu.vector_store %arg8[%c0_116, %c1408_117], %163 {strides = array<i32>} : memref<8x2048xf32, #tpu.memory_space<vmem>>, vector<8x128xf32>,
    %165 = vector.extract_strided_slice %92 {offsets = [96, 0], sizes = [8, 128], strides = [1, 1]} : vector<128x128xf32> to vector<8x128xf32>
    %166 = vector.broadcast %1 : vector<1x128xf32> to vector<8x128xf32>
    %167 = arith.addf %165, %166 : vector<8x128xf32>
    %cst_118 = arith.constant 0.000000e+00 : f32
    %168 = vector.broadcast %cst_118 : f32 to vector<8x128xf32>
    %169 = arith.maximumf %167, %168 : vector<8x128xf32>
    %c0_119 = arith.constant 0 : index
    %c1536_120 = arith.constant 1536 : index
    %170 = vector.load %arg8[%c0_119, %c1536_120] : memref<8x2048xf32, #tpu.memory_space<vmem>>, vector<8x128xf32>
    tpu.vector_store %arg8[%c0_119, %c1536_120], %169 {strides = array<i32>} : memref<8x2048xf32, #tpu.memory_space<vmem>>, vector<8x128xf32>,
    %171 = vector.extract_strided_slice %92 {offsets = [104, 0], sizes = [8, 128], strides = [1, 1]} : vector<128x128xf32> to vector<8x128xf32>
    %172 = vector.broadcast %1 : vector<1x128xf32> to vector<8x128xf32>
    %173 = arith.addf %171, %172 : vector<8x128xf32>
    %cst_121 = arith.constant 0.000000e+00 : f32
    %174 = vector.broadcast %cst_121 : f32 to vector<8x128xf32>
    %175 = arith.maximumf %173, %174 : vector<8x128xf32>
    %c0_122 = arith.constant 0 : index
    %c1664_123 = arith.constant 1664 : index
    %176 = vector.load %arg8[%c0_122, %c1664_123] : memref<8x2048xf32, #tpu.memory_space<vmem>>, vector<8x128xf32>
    tpu.vector_store %arg8[%c0_122, %c1664_123], %175 {strides = array<i32>} : memref<8x2048xf32, #tpu.memory_space<vmem>>, vector<8x128xf32>,
    %177 = vector.extract_strided_slice %92 {offsets = [112, 0], sizes = [8, 128], strides = [1, 1]} : vector<128x128xf32> to vector<8x128xf32>
    %178 = vector.broadcast %1 : vector<1x128xf32> to vector<8x128xf32>
    %179 = arith.addf %177, %178 : vector<8x128xf32>
    %cst_124 = arith.constant 0.000000e+00 : f32
    %180 = vector.broadcast %cst_124 : f32 to vector<8x128xf32>
    %181 = arith.maximumf %179, %180 : vector<8x128xf32>
    %c0_125 = arith.constant 0 : index
    %c1792_126 = arith.constant 1792 : index
    %182 = vector.load %arg8[%c0_125, %c1792_126] : memref<8x2048xf32, #tpu.memory_space<vmem>>, vector<8x128xf32>
    tpu.vector_store %arg8[%c0_125, %c1792_126], %181 {strides = array<i32>} : memref<8x2048xf32, #tpu.memory_space<vmem>>, vector<8x128xf32>,
    %183 = vector.extract_strided_slice %92 {offsets = [120, 0], sizes = [8, 128], strides = [1, 1]} : vector<128x128xf32> to vector<8x128xf32>
    %184 = vector.broadcast %1 : vector<1x128xf32> to vector<8x128xf32>
    %185 = arith.addf %183, %184 : vector<8x128xf32>
    %cst_127 = arith.constant 0.000000e+00 : f32
    %186 = vector.broadcast %cst_127 : f32 to vector<8x128xf32>
    %187 = arith.maximumf %185, %186 : vector<8x128xf32>
    %c0_128 = arith.constant 0 : index
    %c1920_129 = arith.constant 1920 : index
    %188 = vector.load %arg8[%c0_128, %c1920_129] : memref<8x2048xf32, #tpu.memory_space<vmem>>, vector<8x128xf32>
    tpu.vector_store %arg8[%c0_128, %c1920_129], %187 {strides = array<i32>} : memref<8x2048xf32, #tpu.memory_space<vmem>>, vector<8x128xf32>,
    %c0_130 = arith.constant 0 : index
    %c0_131 = arith.constant 0 : index
    %189 = vector.load %arg8[%c0_130, %c0_131] : memref<8x2048xf32, #tpu.memory_space<vmem>>, vector<8x2048xf32>
    %190 = arith.truncf %189 : vector<8x2048xf32> to vector<8x2048xbf16>
    %c0_132 = arith.constant 0 : index
    %c0_133 = arith.constant 0 : index
    %191 = vector.load %arg3[%c0_132, %c0_133] : memref<2048x128xbf16, #tpu.memory_space<vmem>>, vector<2048x128xbf16>
    %cst_134 = arith.constant dense<0.000000e+00> : vector<8x128xf32>
    %192 = tpu.matmul %190, %191, %cst_134 {dimension_numbers = #tpu.dot_dimension_numbers<[1], [0], [0], [1], [0, 0, 1, 1], [], []>} : vector<8x2048xbf16>, vector<2048x128xbf16>, vector<8x128xf32> -> vector<8x128xf32>
    %193 = vector.broadcast %2 : vector<1x128xf32> to vector<8x128xf32>
    %194 = arith.addf %192, %193 : vector<8x128xf32>
    %cst_135 = arith.constant 0.000000e+00 : f32
    %195 = vector.broadcast %cst_135 : f32 to vector<8x128xf32>
    %196 = arith.maximumf %194, %195 : vector<8x128xf32>
    %197 = arith.truncf %196 : vector<8x128xf32> to vector<8x128xbf16>
    %c0_136 = arith.constant 0 : index
    %c0_137 = arith.constant 0 : index
    %c0_138 = arith.constant 0 : index
    %198 = vector.load %arg4[%c0_136, %c0_137, %c0_138] : memref<2x128x128xbf16, #tpu.memory_space<vmem>>, vector<1x128x128xbf16>
    %199 = vector.shape_cast %198 : vector<1x128x128xbf16> to vector<128x128xbf16>
    %cst_139 = arith.constant dense<0.000000e+00> : vector<8x128xf32>
    %200 = tpu.matmul %197, %199, %cst_139 {dimension_numbers = #tpu.dot_dimension_numbers<[1], [0], [0], [1], [0, 0, 1, 1], [], []>} : vector<8x128xbf16>, vector<128x128xbf16>, vector<8x128xf32> -> vector<8x128xf32>
    %201 = vector.broadcast %3 : vector<1x128xf32> to vector<8x128xf32>
    %202 = arith.addf %200, %201 : vector<8x128xf32>
    %cst_140 = arith.constant 0.000000e+00 : f32
    %203 = vector.broadcast %cst_140 : f32 to vector<8x128xf32>
    %204 = arith.maximumf %202, %203 : vector<8x128xf32>
    %205 = arith.truncf %204 : vector<8x128xf32> to vector<8x128xbf16>
    %c1_141 = arith.constant 1 : index
    %c0_142 = arith.constant 0 : index
    %c0_143 = arith.constant 0 : index
    %206 = vector.load %arg4[%c1_141, %c0_142, %c0_143] : memref<2x128x128xbf16, #tpu.memory_space<vmem>>, vector<1x128x128xbf16>
    %207 = vector.shape_cast %206 : vector<1x128x128xbf16> to vector<128x128xbf16>
    %cst_144 = arith.constant dense<0.000000e+00> : vector<8x128xf32>
    %208 = tpu.matmul %205, %207, %cst_144 {dimension_numbers = #tpu.dot_dimension_numbers<[1], [0], [0], [1], [0, 0, 1, 1], [], []>} : vector<8x128xbf16>, vector<128x128xbf16>, vector<8x128xf32> -> vector<8x128xf32>
    %209 = vector.broadcast %4 : vector<1x128xf32> to vector<8x128xf32>
    %210 = arith.addf %208, %209 : vector<8x128xf32>
    %c0_145 = arith.constant 0 : index
    %c0_146 = arith.constant 0 : index
    %211 = vector.load %arg6[%c0_145, %c0_146] : memref<8x128xf32, #tpu.memory_space<vmem>>, vector<8x128xf32>
    tpu.vector_store %arg6[%c0_145, %c0_146], %210 {strides = array<i32>} : memref<8x128xf32, #tpu.memory_space<vmem>>, vector<8x128xf32>,
    return
  }
}

</mosaic_0001>

<bundles_post_ra>
// kernel: net_forward.1
= control target key start
LH: loop header
LB: loop body
LE: loop exit
PB: predicated region body
PF: predicated region fallthrough
CT: control target
= control target key end

     0   :  { %s12961_s1 = inlined_call_operand.vmem [shape: bf16[128,128], index: 1, kind: input, shape index: {}]   ;;  %s12962_s5 = inlined_call_operand.vmem [shape: f32[8,128], index: 5, kind: input, shape index: {}]   ;;  %s12963_s0 = inlined_call_operand.vmem [shape: bf16[2048,128], index: 0, kind: input, shape index: {}]   ;;  %s12964_s2 = inlined_call_operand.vmem [shape: bf16[16,128,128], index: 2, kind: input, shape index: {}]   ;;  %s12965_s3 = inlined_call_operand.vmem [shape: bf16[2048,128], index: 3, kind: input, shape index: {}]   ;;  %s12966_s4 = inlined_call_operand.vmem [shape: bf16[2,128,128], index: 4, kind: input, shape index: {}]   ;;  %s12967_s6 = inlined_call_operand.vmem [shape: f32[8,128], index: 6, kind: output, shape index: {}]  }
   0x1   :  { %v9620_v0 = vld [vmem:[%s12961_s1 + $0x38] sm:$0xff]  ;;  %v9619_v1 = vld [vmem:[%s12961_s1 + $0x30] sm:$0xff]  ;;  %v9618_v2 = vld [vmem:[%s12961_s1 + $0x28] sm:$0xff] }
   0x2   :  { %1117 = vmatpush.bf16.msra.mxu0 %v9620_v0  ;;  %10789 = vmatpush.bf16.msra.mxu2 %v9620_v0  ;;  %v9617_v3 = vld [vmem:[%s12961_s1 + $0x20] sm:$0xff]  ;;  %v9616_v4 = vld [vmem:[%s12961_s1 + $0x18] sm:$0xff]  ;;  %v9615_v5 = vld [vmem:[%s12961_s1 + $0x10] sm:$0xff] }
   0x3   :  { %10788 = vmatpush.bf16.msra.mxu1 %v9620_v0  ;;  %10790 = vmatpush.bf16.msra.mxu3 %v9620_v0  ;;  %v9614_v6 = vld [vmem:[%s12961_s1 + $0x8] sm:$0xff]  ;;  %v9613_v7 = vld [vmem:[%s12961_s1] sm:$0xff]  ;;  %v9559_v13 = vld [vmem:[%s12963_s0 + $0x250] sm:$0xff] }
   0x4   :  { %v9485_v8 = vld [vmem:[%s12963_s0] sm:$0xff]  ;;  %v9558_v10 = vld [vmem:[%s12963_s0 + $0x248] sm:$0xff]  ;;  %v9487_v14 = vld [vmem:[%s12963_s0 + $0x10] sm:$0xff] }
   0x5   :  { %v9573_v9 = vld [vmem:[%s12963_s0 + $0x2c0] sm:$0xff]  ;;  %v9486_v11 = vld [vmem:[%s12963_s0 + $0x8] sm:$0xff]  ;;  %v9575_v15 = vld [vmem:[%s12963_s0 + $0x2d0] sm:$0xff] }
   0x6   :  { %1118 = vmatpush.bf16.msra.mxu0 %v9619_v1  ;;  %10792 = vmatpush.bf16.msra.mxu2 %v9619_v1  ;;  %v9574_v12 = vld [vmem:[%s12963_s0 + $0x2c8] sm:$0xff]  ;;  %v9560_v16 = vld [vmem:[%s12963_s0 + $0x258] sm:$0xff]  ;;  %v9561_v19 = vld [vmem:[%s12963_s0 + $0x260] sm:$0xff] }
   0x7   :  { %10791 = vmatpush.bf16.msra.mxu1 %v9619_v1  ;;  %10793 = vmatpush.bf16.msra.mxu3 %v9619_v1  ;;  %v9488_v17 = vld [vmem:[%s12963_s0 + $0x18] sm:$0xff]  ;;  %v9593_v20 = vld [vmem:[%s12963_s0 + $0x360] sm:$0xff]  ;;  %v9562_v23 = vld [vmem:[%s12963_s0 + $0x268] sm:$0xff] }
   0x8   :  { %v9576_v18 = vld [vmem:[%s12963_s0 + $0x2d8] sm:$0xff]  ;;  %v9489_v21 = vld [vmem:[%s12963_s0 + $0x20] sm:$0xff]  ;;  %v9594_v24 = vld [vmem:[%s12963_s0 + $0x368] sm:$0xff] }
   0x9   :  { %v9577_v22 = vld [vmem:[%s12963_s0 + $0x2e0] sm:$0xff]  ;;  %v9490_v25 = vld [vmem:[%s12963_s0 + $0x28] sm:$0xff]  ;;  %v9563_v27 = vld [vmem:[%s12963_s0 + $0x270] sm:$0xff] }
   0xa   :  { %1119 = vmatpush.bf16.msra.mxu0 %v9618_v2  ;;  %10795 = vmatpush.bf16.msra.mxu2 %v9618_v2  ;;  %v9578_v26 = vld [vmem:[%s12963_s0 + $0x2e8] sm:$0xff]  ;;  %v9595_v28 = vld [vmem:[%s12963_s0 + $0x370] sm:$0xff]  ;;  %v9564_v31 = vld [vmem:[%s12963_s0 + $0x278] sm:$0xff] }
   0xb   :  { %10794 = vmatpush.bf16.msra.mxu1 %v9618_v2  ;;  %10796 = vmatpush.bf16.msra.mxu3 %v9618_v2  ;;  %v9491_v29 = vld [vmem:[%s12963_s0 + $0x30] sm:$0xff]  ;;  %v9596_v32 = vld [vmem:[%s12963_s0 + $0x378] sm:$0xff]  ;;  %v9565_v35 = vld [vmem:[%s12963_s0 + $0x280] sm:$0xff] }
   0xc   :  { %v9579_v30 = vld [vmem:[%s12963_s0 + $0x2f0] sm:$0xff]  ;;  %v9492_v33 = vld [vmem:[%s12963_s0 + $0x38] sm:$0xff]  ;;  %v9597_v36 = vld [vmem:[%s12963_s0 + $0x380] sm:$0xff] }
   0xd   :  { %v9580_v34 = vld [vmem:[%s12963_s0 + $0x2f8] sm:$0xff]  ;;  %v9493_v37 = vld [vmem:[%s12963_s0 + $0x40] sm:$0xff]  ;;  %v9566_v43 = vld [vmem:[%s12963_s0 + $0x288] sm:$0xff] }
   0xe   :  { %1120 = vmatpush.bf16.msra.mxu0 %v9617_v3  ;;  %10798 = vmatpush.bf16.msra.mxu2 %v9617_v3  ;;  %v9581_v38 = vld [vmem:[%s12963_s0 + $0x300] sm:$0xff]  ;;  %v9598_v44 = vld [vmem:[%s12963_s0 + $0x388] sm:$0xff] }
   0xf   :  { %10797 = vmatpush.bf16.msra.mxu1 %v9617_v3  ;;  %10799 = vmatpush.bf16.msra.mxu3 %v9617_v3  ;;  %v10975_v40 = vld [vmem:[%s12962_s5] ss:$0 sm:$0xff]  ;;  %v9494_v57 = vld [vmem:[%s12963_s0 + $0x48] sm:$0xff] }
  0x10   :  { %v9582_v58 = vld [vmem:[%s12963_s0 + $0x308] sm:$0xff] }
  0x12   :  { %1121 = vmatpush.bf16.msra.mxu0 %v9616_v4  ;;  %10801 = vmatpush.bf16.msra.mxu2 %v9616_v4 }
  0x13   :  { %10800 = vmatpush.bf16.msra.mxu1 %v9616_v4  ;;  %10802 = vmatpush.bf16.msra.mxu3 %v9616_v4  ;;  %v9567_v4 = vld [vmem:[%s12963_s0 + $0x290] sm:$0xff] }
  0x16   :  { %1122 = vmatpush.bf16.msra.mxu0 %v9615_v5  ;;  %10804 = vmatpush.bf16.msra.mxu2 %v9615_v5 }
  0x17   :  { %10803 = vmatpush.bf16.msra.mxu1 %v9615_v5  ;;  %10805 = vmatpush.bf16.msra.mxu3 %v9615_v5  ;;  %v9599_v5 = vld [vmem:[%s12963_s0 + $0x390] sm:$0xff] }
  0x1a   :  { %1123 = vmatpush.bf16.msra.mxu0 %v9614_v6  ;;  %10807 = vmatpush.bf16.msra.mxu2 %v9614_v6 }
  0x1b   :  { %10806 = vmatpush.bf16.msra.mxu1 %v9614_v6  ;;  %10808 = vmatpush.bf16.msra.mxu3 %v9614_v6 }
  0x1e   :  { %1124 = vmatpush.bf16.msra.mxu0 %v9613_v7  ;;  %10810 = vmatpush.bf16.msra.mxu2 %v9613_v7 }
  0x1f   :  { %10809 = vmatpush.bf16.msra.mxu1 %v9613_v7  ;;  %10811 = vmatpush.bf16.msra.mxu3 %v9613_v7 }
  0x21   :  { %1125 = vmatmul.bf16.vlgmr.msra.gmra.mxu0 %v9485_v8  ;;  %1565 = vmatmul.bf16.vlgmr.msra.gmra.mxu2 %v9573_v9 }
  0x22   :  { %1490 = vmatmul.bf16.vlgmr.msra.gmra.mxu1 %v9558_v10  ;;  %1665 = vmatmul.bf16.vlgmr.msra.gmra.mxu3 %v9593_v20 }
  0x31   :  { %1130 = vmatmul.bf16.gmra.mxu0 %v9486_v11  ;;  %1570 = vmatmul.bf16.gmra.mxu2 %v9574_v12 }
  0x32   :  { %1495 = vmatmul.bf16.gmra.mxu1 %v9559_v13  ;;  %1670 = vmatmul.bf16.gmra.mxu3 %v9594_v24 }
  0x41   :  { %1135 = vmatmul.bf16.gmra.mxu0 %v9487_v14  ;;  %1575 = vmatmul.bf16.gmra.mxu2 %v9575_v15 }
  0x42   :  { %1500 = vmatmul.bf16.gmra.mxu1 %v9560_v16  ;;  %1675 = vmatmul.bf16.gmra.mxu3 %v9595_v28 }
  0x51   :  { %1140 = vmatmul.bf16.gmra.mxu0 %v9488_v17  ;;  %1580 = vmatmul.bf16.gmra.mxu2 %v9576_v18  ;;  %v9495_v18 = vld [vmem:[%s12963_s0 + $0x50] sm:$0xff] }
  0x52   :  { %1505 = vmatmul.bf16.gmra.mxu1 %v9561_v19  ;;  %1680 = vmatmul.bf16.gmra.mxu3 %v9596_v32  ;;  %v9583_v19 = vld [vmem:[%s12963_s0 + $0x310] sm:$0xff] }
  0x61   :  { %1145 = vmatmul.bf16.gmra.mxu0 %v9489_v21  ;;  %1585 = vmatmul.bf16.gmra.mxu2 %v9577_v22 }
  0x62   :  { %1510 = vmatmul.bf16.gmra.mxu1 %v9562_v23  ;;  %1685 = vmatmul.bf16.gmra.mxu3 %v9597_v36 }
  0x71   :  { %1150 = vmatmul.bf16.gmra.mxu0 %v9490_v25  ;;  %1590 = vmatmul.bf16.gmra.mxu2 %v9578_v26 }
  0x72   :  { %1515 = vmatmul.bf16.gmra.mxu1 %v9563_v27  ;;  %1690 = vmatmul.bf16.gmra.mxu3 %v9598_v44  ;;  %v9496_v44 = vld [vmem:[%s12963_s0 + $0x58] sm:$0xff] }
  0x81   :  { %1155 = vmatmul.bf16.gmra.mxu0 %v9491_v29  ;;  %1595 = vmatmul.bf16.gmra.mxu2 %v9579_v30  ;;  %v9568_v29 = vld [vmem:[%s12963_s0 + $0x298] sm:$0xff] }
  0x82   :  { %1520 = vmatmul.bf16.gmra.mxu1 %v9564_v31  ;;  %1695 = vmatmul.bf16.gmra.mxu3 %v9599_v5  ;;  %v9600_v30 = vld [vmem:[%s12963_s0 + $0x398] sm:$0xff] }
  0x91   :  { %1160 = vmatmul.bf16.gmra.mxu0 %v9492_v33  ;;  %1600 = vmatmul.bf16.gmra.mxu2 %v9580_v34 }
  0x92   :  { %1525 = vmatmul.bf16.gmra.mxu1 %v9565_v35  ;;  %1700 = vmatmul.bf16.gmra.mxu3 %v9600_v30 }
  0x9e   :  { %v1126_v39 = vpop.f32.mrf.mxu0 }
  0x9f   :  { %v1491_v41 = vpop.f32.mrf.mxu1  ;;  %v1127_v45 = vadd.f32 %v10975_v40, %v1126_v39 }
  0xa0   :  { %v1492_v51 = vadd.f32 %v10975_v40, %v1491_v41 }
  0xa1   :  { %1165 = vmatmul.bf16.gmra.mxu0 %v9493_v37  ;;  %1605 = vmatmul.bf16.gmra.mxu2 %v9581_v38  ;;  %v1766_v48 = vmax.f32 %v1127_v45, 0.0  ;;  %v9584_v45 = vld [vmem:[%s12963_s0 + $0x318] sm:$0xff] }
  0xa2   :  { %1530 = vmatmul.bf16.gmra.mxu1 %v9566_v43  ;;  %v1912_v59 = vmax.f32 %v1492_v51, 0.0 }
  0xa4   :  { %v1566_v42 = vpop.f32.mrf.mxu2 }
  0xa5   :  { %v1567_v49 = vadd.f32 %v10975_v40, %v1566_v42 }
  0xa6   :  { %v1128_v46 = vpop.f32.mrf.mxu0 }
  0xa7   :  { %v1129_v47 = vadd.f32 %v10975_v40, %v1128_v46  ;;  %v1493_v53 = vpop.f32.mrf.mxu1  ;;  %v1942_v55 = vmax.f32 %v1567_v49, 0.0 }
  0xa8   :  { %v1494_v60 = vadd.f32 %v10975_v40, %v1493_v53 }
  0xa9   :  { %v1767_v50 = vmax.f32 %v1129_v47, 0.0 }
  0xaa   :  { %v1913_v63 = vmax.f32 %v1494_v60, 0.0 }
  0xab   :  { %v10024_v52 = vpack.c.bf16 %v1767_v50, %v1766_v48 }
  0xac   :  { %v1568_v54 = vpop.f32.mrf.mxu2  ;;  %v10389_v1 = vpack.c.bf16 %v1913_v63, %v1912_v59 }
  0xad   :  { %10025 = vst [vmem:[#allocation2 + $0x2b0] sm:$0xff] %v10024_v52   ;;  %v1569_v56 = vadd.f32 %v10975_v40, %v1568_v54 }
  0xae   :  { %v1131_v61 = vpop.f32.mrf.mxu0  ;;  %10733 = vst [vmem:[#allocation2 + $0x260] sm:$0xff] %v10389_v1  }
  0xaf   :  { %v1943_v62 = vmax.f32 %v1569_v56, 0.0  ;;  %v1496_v2 = vpop.f32.mrf.mxu1  ;;  %v1132_v6 = vadd.f32 %v10975_v40, %v1131_v61  ;;  %v9601_v56 = vld [vmem:[%s12963_s0 + $0x3a0] sm:$0xff] }
  0xb0   :  { %v1497_v12 = vadd.f32 %v10975_v40, %v1496_v2  ;;  %1705 = vmatmul.bf16.gmra.mxu3 %v9601_v56 }
  0xb1   :  { %v10464_v0 = vpack.c.bf16 %v1943_v62, %v1942_v55  ;;  %1170 = vmatmul.bf16.gmra.mxu0 %v9494_v57  ;;  %1610 = vmatmul.bf16.gmra.mxu2 %v9582_v58  ;;  %v1768_v9 = vmax.f32 %v1132_v6, 0.0  ;;  %v9569_v55 = vld [vmem:[%s12963_s0 + $0x2a0] sm:$0xff] }
  0xb2   :  { %1535 = vmatmul.bf16.gmra.mxu1 %v9567_v4  ;;  %v1914_v20 = vmax.f32 %v1497_v12, 0.0  ;;  %v9497_v6 = vld [vmem:[%s12963_s0 + $0x60] sm:$0xff] }
  0xb3   :  { %10748 = vst [vmem:[#allocation2 + $0x1b0] sm:$0xff] %v10464_v0   ;;  %v1666_v0 = vpop.f32.mrf.mxu3 }
  0xb4   :  { %v1571_v3 = vpop.f32.mrf.mxu2  ;;  %v1667_v12 = vadd.f32 %v10975_v40, %v1666_v0 }
  0xb5   :  { %v1572_v10 = vadd.f32 %v10975_v40, %v1571_v3 }
  0xb6   :  { %v1133_v7 = vpop.f32.mrf.mxu0 }
  0xb7   :  { %v1134_v8 = vadd.f32 %v10975_v40, %v1133_v7  ;;  %v1498_v14 = vpop.f32.mrf.mxu1  ;;  %v1944_v16 = vmax.f32 %v1572_v10, 0.0  ;;  %v9585_v7 = vld [vmem:[%s12963_s0 + $0x320] sm:$0xff] }
  0xb8   :  { %v1499_v21 = vadd.f32 %v10975_v40, %v1498_v14 }
  0xb9   :  { %v1769_v11 = vmax.f32 %v1134_v8, 0.0 }
  0xba   :  { %v1915_v24 = vmax.f32 %v1499_v21, 0.0  ;;  %v9570_v21 = vld [vmem:[%s12963_s0 + $0x2a8] sm:$0xff] }
  0xbb   :  { %v10029_v13 = vpack.c.bf16 %v1769_v11, %v1768_v9 }
  0xbc   :  { %v1573_v15 = vpop.f32.mrf.mxu2  ;;  %v10394_v26 = vpack.c.bf16 %v1915_v24, %v1914_v20 }
  0xbd   :  { %10661 = vst [vmem:[#allocation2 + $0x3b0] sm:$0xff] %v10029_v13   ;;  %v1574_v17 = vadd.f32 %v10975_v40, %v1573_v15 }
  0xbe   :  { %v1136_v22 = vpop.f32.mrf.mxu0  ;;  %10734 = vst [vmem:[#allocation2 + $0x3b8] sm:$0xff] %v10394_v26  }
  0xbf   :  { %v1945_v23 = vmax.f32 %v1574_v17, 0.0  ;;  %v1501_v27 = vpop.f32.mrf.mxu1  ;;  %v1137_v31 = vadd.f32 %v10975_v40, %v1136_v22  ;;  %v1982_v17 = vmax.f32 %v1667_v12, 0.0  ;;  %v9602_v22 = vld [vmem:[%s12963_s0 + $0x3a8] sm:$0xff] }
  0xc0   :  { %v1502_v37 = vadd.f32 %v10975_v40, %v1501_v27  ;;  %1710 = vmatmul.bf16.gmra.mxu3 %v9602_v22 }
  0xc1   :  { %v10469_v25 = vpack.c.bf16 %v1945_v23, %v1944_v16  ;;  %1175 = vmatmul.bf16.gmra.mxu0 %v9495_v18  ;;  %1615 = vmatmul.bf16.gmra.mxu2 %v9583_v19  ;;  %v1770_v34 = vmax.f32 %v1137_v31, 0.0  ;;  %v1668_v16 = vpop.f32.mrf.mxu3 }
  0xc2   :  { %1540 = vmatmul.bf16.gmra.mxu1 %v9568_v29  ;;  %v1916_v46 = vmax.f32 %v1502_v37, 0.0  ;;  %v1669_v18 = vadd.f32 %v10975_v40, %v1668_v16 }
  0xc3   :  { %10749 = vst [vmem:[#allocation2 + $0x1c8] sm:$0xff] %v10469_v25  }
  0xc4   :  { %v1576_v28 = vpop.f32.mrf.mxu2  ;;  %v1983_v24 = vmax.f32 %v1669_v18, 0.0 }
  0xc5   :  { %v1577_v35 = vadd.f32 %v10975_v40, %v1576_v28 }
  0xc6   :  { %v1138_v32 = vpop.f32.mrf.mxu0  ;;  %v10564_v27 = vpack.c.bf16 %v1983_v24, %v1982_v17 }
  0xc7   :  { %v1139_v33 = vadd.f32 %v10975_v40, %v1138_v32  ;;  %v1503_v39 = vpop.f32.mrf.mxu1  ;;  %v1946_v42 = vmax.f32 %v1577_v35, 0.0 }
  0xc8   :  { %v1504_v47 = vadd.f32 %v10975_v40, %v1503_v39  ;;  %10768 = vst [vmem:[#allocation2 + $0x250] sm:$0xff] %v10564_v27   ;;  %v9586_v39 = vld [vmem:[%s12963_s0 + $0x328] sm:$0xff]  ;;  %v9604_v27 = vld [vmem:[%s12963_s0 + $0x3b8] sm:$0xff] }
  0xc9   :  { %v1771_v36 = vmax.f32 %v1139_v33, 0.0  ;;  %v1671_v32 = vpop.f32.mrf.mxu3 }
  0xca   :  { %v1917_v50 = vmax.f32 %v1504_v47, 0.0 }
  0xcb   :  { %v10034_v38 = vpack.c.bf16 %v1771_v36, %v1770_v34 }
  0xcc   :  { %v1578_v41 = vpop.f32.mrf.mxu2  ;;  %v10399_v52 = vpack.c.bf16 %v1917_v50, %v1916_v46 }
  0xcd   :  { %10662 = vst [vmem:[#allocation2 + $0xd8] sm:$0xff] %v10034_v38   ;;  %v1579_v43 = vadd.f32 %v10975_v40, %v1578_v41  ;;  %v9498_v38 = vld [vmem:[%s12963_s0 + $0x68] sm:$0xff] }
  0xce   :  { %v1141_v48 = vpop.f32.mrf.mxu0  ;;  %10735 = vst [vmem:[#allocation2 + $0x2b8] sm:$0xff] %v10399_v52  }
  0xcf   :  { %v1947_v49 = vmax.f32 %v1579_v43, 0.0  ;;  %v1506_v53 = vpop.f32.mrf.mxu1  ;;  %v1142_v57 = vadd.f32 %v10975_v40, %v1141_v48 }
  0xd0   :  { %v1507_v63 = vadd.f32 %v10975_v40, %v1506_v53 }
  0xd1   :  { %v10474_v51 = vpack.c.bf16 %v1947_v49, %v1946_v42  ;;  %1180 = vmatmul.bf16.gmra.mxu0 %v9496_v44  ;;  %1620 = vmatmul.bf16.gmra.mxu2 %v9584_v45  ;;  %v1772_v60 = vmax.f32 %v1142_v57, 0.0  ;;  %v1672_v45 = vadd.f32 %v10975_v40, %v1671_v32  ;;  %v1673_v49 = vpop.f32.mrf.mxu3 }
  0xd2   :  { %1545 = vmatmul.bf16.gmra.mxu1 %v9569_v55  ;;  %v1918_v8 = vmax.f32 %v1507_v63, 0.0  ;;  %v9603_v55 = vld [vmem:[%s12963_s0 + $0x3b0] sm:$0xff] }
  0xd3   :  { %10750 = vst [vmem:[#allocation2 + $0x2d0] sm:$0xff] %v10474_v51   ;;  %v1984_v50 = vmax.f32 %v1672_v45, 0.0  ;;  %v1674_v51 = vadd.f32 %v10975_v40, %v1673_v49  ;;  %1715 = vmatmul.bf16.gmra.mxu3 %v9603_v55 }
  0xd4   :  { %v1581_v54 = vpop.f32.mrf.mxu2 }
  0xd5   :  { %v1582_v61 = vadd.f32 %v10975_v40, %v1581_v54  ;;  %v9571_v54 = vld [vmem:[%s12963_s0 + $0x2b0] sm:$0xff]  ;;  %v1985_v57 = vmax.f32 %v1674_v51, 0.0 }
  0xd6   :  { %v1143_v58 = vpop.f32.mrf.mxu0 }
  0xd7   :  { %v1144_v59 = vadd.f32 %v10975_v40, %v1143_v58  ;;  %v1508_v2 = vpop.f32.mrf.mxu1  ;;  %v1948_v4 = vmax.f32 %v1582_v61, 0.0  ;;  %v9652_v58 = vld [vmem:[%s12964_s2 + $0x78] sm:$0xff]  ;;  %v10569_v61 = vpack.c.bf16 %v1985_v57, %v1984_v50  ;;  %v9646_v50 = vld [vmem:[%s12964_s2 + $0x48] sm:$0xff] }
  0xd8   :  { %v1509_v9 = vadd.f32 %v10975_v40, %v1508_v2  ;;  %2695 = vmatpush.bf16.msrb.mxu1 %v9652_v58  ;;  %v9645_v58 = vld [vmem:[%s12964_s2 + $0x40] sm:$0xff] }
  0xd9   :  { %v1773_v62 = vmax.f32 %v1144_v59, 0.0  ;;  %10769 = vst [vmem:[#allocation2 + $0x378] sm:$0xff] %v10569_v61   ;;  %v1676_v2 = vpop.f32.mrf.mxu3 }
  0xda   :  { %v1919_v13 = vmax.f32 %v1509_v9, 0.0  ;;  %v9499_v9 = vld [vmem:[%s12963_s0 + $0x70] sm:$0xff]  ;;  %v1677_v16 = vadd.f32 %v10975_v40, %v1676_v2 }
  0xdb   :  { %v10039_v1 = vpack.c.bf16 %v1773_v62, %v1772_v60 }
  0xdc   :  { %v1583_v3 = vpop.f32.mrf.mxu2  ;;  %v10404_v15 = vpack.c.bf16 %v1919_v13, %v1918_v8  ;;  %v9650_v13 = vld [vmem:[%s12964_s2 + $0x68] sm:$0xff]  ;;  %v1986_v22 = vmax.f32 %v1677_v16, 0.0  ;;  %v9589_v16 = vld [vmem:[%s12963_s0 + $0x340] sm:$0xff] }
  0xdd   :  { %10663 = vst [vmem:[#allocation2 + $0x18] sm:$0xff] %v10039_v1   ;;  %v1584_v5 = vadd.f32 %v10975_v40, %v1583_v3  ;;  %v9651_v3 = vld [vmem:[%s12964_s2 + $0x70] sm:$0xff] }
  0xde   :  { %v1146_v10 = vpop.f32.mrf.mxu0  ;;  %10736 = vst [vmem:[#allocation2 + $0x248] sm:$0xff] %v10404_v15   ;;  %2696 = vmatpush.bf16.msrb.mxu1 %v9651_v3 }
  0xdf   :  { %v1949_v11 = vmax.f32 %v1584_v5, 0.0  ;;  %v1511_v19 = vpop.f32.mrf.mxu1  ;;  %v1147_v23 = vadd.f32 %v10975_v40, %v1146_v10  ;;  %v9587_v10 = vld [vmem:[%s12963_s0 + $0x330] sm:$0xff] }
  0xe0   :  { %v1512_v31 = vadd.f32 %v10975_v40, %v1511_v19 }
  0xe1   :  { %v10479_v14 = vpack.c.bf16 %v1949_v11, %v1948_v4  ;;  %1185 = vmatmul.bf16.gmra.mxu0 %v9497_v6  ;;  %1625 = vmatmul.bf16.gmra.mxu2 %v9585_v7  ;;  %v1774_v28 = vmax.f32 %v1147_v23, 0.0 }
  0xe2   :  { %1550 = vmatmul.bf16.gmra.mxu1 %v9570_v21  ;;  %v1920_v41 = vmax.f32 %v1512_v31, 0.0  ;;  %v9649_v21 = vld [vmem:[%s12964_s2 + $0x60] sm:$0xff] }
  0xe3   :  { %10751 = vst [vmem:[#allocation2 + $0x1d0] sm:$0xff] %v10479_v14   ;;  %2697 = vmatpush.bf16.msrb.mxu1 %v9650_v13  ;;  %1720 = vmatmul.bf16.gmra.mxu3 %v9604_v27 }
  0xe4   :  { %v1586_v20 = vpop.f32.mrf.mxu2 }
  0xe5   :  { %v1587_v29 = vadd.f32 %v10975_v40, %v1586_v20  ;;  %v1678_v20 = vpop.f32.mrf.mxu3 }
  0xe6   :  { %v1148_v25 = vpop.f32.mrf.mxu0  ;;  %v1679_v23 = vadd.f32 %v10975_v40, %v1678_v20 }
  0xe7   :  { %v1149_v26 = vadd.f32 %v10975_v40, %v1148_v25  ;;  %v1513_v34 = vpop.f32.mrf.mxu1  ;;  %v1950_v36 = vmax.f32 %v1587_v29, 0.0  ;;  %2698 = vmatpush.bf16.msrb.mxu1 %v9649_v21 }
  0xe8   :  { %v1514_v42 = vadd.f32 %v10975_v40, %v1513_v34  ;;  %v1987_v29 = vmax.f32 %v1679_v23, 0.0  ;;  %v9636_v23 = vld [vmem:[%s12964_s2 + $0x38] sm:$0xff] }
  0xe9   :  { %v1775_v30 = vmax.f32 %v1149_v26, 0.0  ;;  %v9572_v26 = vld [vmem:[%s12963_s0 + $0x2b8] sm:$0xff]  ;;  %2840 = vmatpush.bf16.msrb.mxu2 %v9636_v23  ;;  %v9503_v23 = vld [vmem:[%s12963_s0 + $0x90] sm:$0xff] }
  0xea   :  { %v1921_v46 = vmax.f32 %v1514_v42, 0.0 }
  0xeb   :  { %v10044_v33 = vpack.c.bf16 %v1775_v30, %v1774_v28  ;;  %v9648_v30 = vld [vmem:[%s12964_s2 + $0x58] sm:$0xff] }
  0xec   :  { %v1588_v35 = vpop.f32.mrf.mxu2  ;;  %v10409_v48 = vpack.c.bf16 %v1921_v46, %v1920_v41  ;;  %2699 = vmatpush.bf16.msrb.mxu1 %v9648_v30  ;;  %v9500_v46 = vld [vmem:[%s12963_s0 + $0x78] sm:$0xff] }
  0xed   :  { %10664 = vst [vmem:[#allocation2 + $0x50] sm:$0xff] %v10044_v33   ;;  %v1589_v37 = vadd.f32 %v10975_v40, %v1588_v35  ;;  %v10574_v33 = vpack.c.bf16 %v1987_v29, %v1986_v22 }
  0xee   :  { %v1151_v43 = vpop.f32.mrf.mxu0  ;;  %10737 = vst [vmem:[#allocation2 + $0x40] sm:$0xff] %v10409_v48  }
  0xef   :  { %v1951_v44 = vmax.f32 %v1589_v37, 0.0  ;;  %v1516_v52 = vpop.f32.mrf.mxu1  ;;  %v1152_v56 = vadd.f32 %v10975_v40, %v1151_v43  ;;  %10770 = vst [vmem:[#allocation2 + $0xb8] sm:$0xff] %v10574_v33  }
  0xf0   :  { %v1517_v1 = vadd.f32 %v10975_v40, %v1516_v52 }
  0xf1   :  { %v10484_v47 = vpack.c.bf16 %v1951_v44, %v1950_v36  ;;  %1190 = vmatmul.bf16.gmra.mxu0 %v9498_v38  ;;  %1630 = vmatmul.bf16.gmra.mxu2 %v9586_v39  ;;  %v1776_v62 = vmax.f32 %v1152_v56, 0.0  ;;  %v1681_v38 = vpop.f32.mrf.mxu3  ;;  %v9647_v39 = vld [vmem:[%s12964_s2 + $0x50] sm:$0xff] }
  0xf2   :  { %1555 = vmatmul.bf16.gmra.mxu1 %v9571_v54  ;;  %v1922_v11 = vmax.f32 %v1517_v1, 0.0 }
  0xf3   :  { %10752 = vst [vmem:[#allocation2 + $0x58] sm:$0xff] %v10484_v47   ;;  %2700 = vmatpush.bf16.msrb.mxu1 %v9647_v39  ;;  %v9588_v47 = vld [vmem:[%s12963_s0 + $0x338] sm:$0xff] }
  0xf4   :  { %v1591_v53 = vpop.f32.mrf.mxu2 }
  0xf5   :  { %v1592_v63 = vadd.f32 %v10975_v40, %v1591_v53  ;;  %v1682_v53 = vadd.f32 %v10975_v40, %v1681_v38  ;;  %v9634_v38 = vld [vmem:[%s12964_s2 + $0x28] sm:$0xff] }
  0xf6   :  { %v1153_v59 = vpop.f32.mrf.mxu0 }
  0xf7   :  { %v1154_v60 = vadd.f32 %v10975_v40, %v1153_v59  ;;  %v1518_v5 = vpop.f32.mrf.mxu1  ;;  %v1952_v7 = vmax.f32 %v1592_v63, 0.0  ;;  %2701 = vmatpush.bf16.msrb.mxu1 %v9646_v50  ;;  %v1988_v59 = vmax.f32 %v1682_v53, 0.0  ;;  %v9605_v63 = vld [vmem:[%s12963_s0 + $0x3c0] sm:$0xff] }
  0xf8   :  { %v1519_v12 = vadd.f32 %v10975_v40, %v1518_v5  ;;  %1725 = vmatmul.bf16.gmra.mxu3 %v9605_v63 }
  0xf9   :  { %v1777_v0 = vmax.f32 %v1154_v60, 0.0  ;;  %v1683_v57 = vpop.f32.mrf.mxu3 }
  0xfa   :  { %v1923_v17 = vmax.f32 %v1519_v12, 0.0  ;;  %v1684_v60 = vadd.f32 %v10975_v40, %v1683_v57 }
  0xfb   :  { %v10049_v4 = vpack.c.bf16 %v1777_v0, %v1776_v62  ;;  %2702 = vmatpush.bf16.msrb.mxu1 %v9645_v58 }
  0xfc   :  { %v1593_v6 = vpop.f32.mrf.mxu2  ;;  %v10414_v19 = vpack.c.bf16 %v1923_v17, %v1922_v11  ;;  %v1989_v1 = vmax.f32 %v1684_v60, 0.0 }
  0xfd   :  { %10665 = vst [vmem:[#allocation2 + $0x368] sm:$0xff] %v10049_v4   ;;  %v1594_v8 = vadd.f32 %v10975_v40, %v1593_v6 }
  0xfe   :  { %v1156_v14 = vpop.f32.mrf.mxu0  ;;  %10738 = vst [vmem:[#allocation2 + $0x20] sm:$0xff] %v10414_v19   ;;  %v10579_v4 = vpack.c.bf16 %v1989_v1, %v1988_v59  ;;  %v9632_v59 = vld [vmem:[%s12964_s2 + $0x18] sm:$0xff] }
  0xff   :  { %v1953_v15 = vmax.f32 %v1594_v8, 0.0  ;;  %v1521_v24 = vpop.f32.mrf.mxu1  ;;  %v1157_v28 = vadd.f32 %v10975_v40, %v1156_v14 }
 0x100   :  { %v1522_v37 = vadd.f32 %v10975_v40, %v1521_v24  ;;  %10771 = vst [vmem:[#allocation2 + $0x38] sm:$0xff] %v10579_v4   ;;  %v9631_v4 = vld [vmem:[%s12964_s2 + $0x10] sm:$0xff] }
 0x101   :  { %v10489_v18 = vpack.c.bf16 %v1953_v15, %v1952_v7  ;;  %1195 = vmatmul.bf16.gmra.mxu0 %v9499_v9  ;;  %1635 = vmatmul.bf16.gmra.mxu2 %v9587_v10  ;;  %v1778_v34 = vmax.f32 %v1157_v28, 0.0  ;;  %v1686_v9 = vpop.f32.mrf.mxu3  ;;  %v9501_v15 = vld [vmem:[%s12963_s0 + $0x80] sm:$0xff] }
 0x102   :  { %1560 = vmatmul.bf16.gmra.mxu1 %v9572_v26  ;;  %v1924_v48 = vmax.f32 %v1522_v37, 0.0  ;;  %v1687_v21 = vadd.f32 %v10975_v40, %v1686_v9 }
 0x103   :  { %10753 = vst [vmem:[#allocation2 + $0x120] sm:$0xff] %v10489_v18  }
 0x104   :  { %v1596_v25 = vpop.f32.mrf.mxu2  ;;  %v1990_v27 = vmax.f32 %v1687_v21, 0.0 }
 0x105   :  { %v1597_v35 = vadd.f32 %v10975_v40, %v1596_v25 }
 0x106   :  { %v1158_v31 = vpop.f32.mrf.mxu0 }
 0x107   :  { %v1159_v32 = vadd.f32 %v10975_v40, %v1158_v31  ;;  %v1523_v42 = vpop.f32.mrf.mxu1  ;;  %v1954_v44 = vmax.f32 %v1597_v35, 0.0  ;;  %v9635_v31 = vld [vmem:[%s12964_s2 + $0x30] sm:$0xff] }
 0x108   :  { %v1524_v49 = vadd.f32 %v10975_v40, %v1523_v42  ;;  %2841 = vmatpush.bf16.msrb.mxu2 %v9635_v31 }
 0x109   :  { %v1779_v36 = vmax.f32 %v1159_v32, 0.0  ;;  %v1688_v26 = vpop.f32.mrf.mxu3  ;;  %v9606_v32 = vld [vmem:[%s12963_s0 + $0x3c8] sm:$0xff] }
 0x10a   :  { %v1925_v54 = vmax.f32 %v1524_v49, 0.0  ;;  %v1689_v28 = vadd.f32 %v10975_v40, %v1688_v26  ;;  %1730 = vmatmul.bf16.gmra.mxu3 %v9606_v32 }
 0x10b   :  { %v10054_v41 = vpack.c.bf16 %v1779_v36, %v1778_v34 }
 0x10c   :  { %v1598_v43 = vpop.f32.mrf.mxu2  ;;  %v10419_v56 = vpack.c.bf16 %v1925_v54, %v1924_v48  ;;  %v1991_v34 = vmax.f32 %v1689_v28, 0.0  ;;  %2842 = vmatpush.bf16.msrb.mxu2 %v9634_v38  ;;  %v9633_v48 = vld [vmem:[%s12964_s2 + $0x20] sm:$0xff] }
 0x10d   :  { %10666 = vst [vmem:[#allocation2 + $0x330] sm:$0xff] %v10054_v41   ;;  %v1599_v45 = vadd.f32 %v10975_v40, %v1598_v43 }
 0x10e   :  { %v1161_v51 = vpop.f32.mrf.mxu0  ;;  %10739 = vst [vmem:[#allocation2 + $0xe8] sm:$0xff] %v10419_v56   ;;  %v10584_v37 = vpack.c.bf16 %v1991_v34, %v1990_v27 }
 0x10f   :  { %v1955_v52 = vmax.f32 %v1599_v45, 0.0  ;;  %v1526_v61 = vpop.f32.mrf.mxu1  ;;  %v1162_v0 = vadd.f32 %v10975_v40, %v1161_v51  ;;  %v9502_v51 = vld [vmem:[%s12963_s0 + $0x88] sm:$0xff] }
 0x110   :  { %v1527_v8 = vadd.f32 %v10975_v40, %v1526_v61  ;;  %10772 = vst [vmem:[#allocation2 + $0x78] sm:$0xff] %v10584_v37   ;;  %2843 = vmatpush.bf16.msrb.mxu2 %v9633_v48 }
 0x111   :  { %v10494_v55 = vpack.c.bf16 %v1955_v52, %v1954_v44  ;;  %1200 = vmatmul.bf16.gmra.mxu0 %v9500_v46  ;;  %1640 = vmatmul.bf16.gmra.mxu2 %v9588_v47  ;;  %v1780_v5 = vmax.f32 %v1162_v0, 0.0  ;;  %v1691_v44 = vpop.f32.mrf.mxu3  ;;  %v9590_v52 = vld [vmem:[%s12963_s0 + $0x348] sm:$0xff] }
 0x112   :  { %v1926_v17 = vmax.f32 %v1527_v8, 0.0  ;;  %v1692_v57 = vadd.f32 %v10975_v40, %v1691_v44 }
 0x113   :  { %10754 = vst [vmem:[#allocation2 + $0x198] sm:$0xff] %v10494_v55  }
 0x114   :  { %v1601_v62 = vpop.f32.mrf.mxu2  ;;  %2844 = vmatpush.bf16.msrb.mxu2 %v9632_v59  ;;  %v1992_v63 = vmax.f32 %v1692_v57, 0.0  ;;  %v9592_v57 = vld [vmem:[%s12963_s0 + $0x358] sm:$0xff] }
 0x115   :  { %v1602_v6 = vadd.f32 %v10975_v40, %v1601_v62 }
 0x116   :  { %v1163_v2 = vpop.f32.mrf.mxu0 }
 0x117   :  { %v1164_v3 = vadd.f32 %v10975_v40, %v1163_v2  ;;  %v1528_v11 = vpop.f32.mrf.mxu1  ;;  %v1956_v13 = vmax.f32 %v1602_v6, 0.0 }
 0x118   :  { %v1529_v18 = vadd.f32 %v10975_v40, %v1528_v11  ;;  %2845 = vmatpush.bf16.msrb.mxu2 %v9631_v4  ;;  %v9630_v11 = vld [vmem:[%s12964_s2 + $0x8] sm:$0xff] }
 0x119   :  { %v1781_v7 = vmax.f32 %v1164_v3, 0.0  ;;  %v1693_v62 = vpop.f32.mrf.mxu3 }
 0x11a   :  { %v1927_v22 = vmax.f32 %v1529_v18, 0.0  ;;  %v1694_v0 = vadd.f32 %v10975_v40, %v1693_v62 }
 0x11b   :  { %v10059_v10 = vpack.c.bf16 %v1781_v7, %v1780_v5  ;;  %v9607_v5 = vld [vmem:[%s12963_s0 + $0x3d0] sm:$0xff] }
 0x11c   :  { %v1603_v12 = vpop.f32.mrf.mxu2  ;;  %v10424_v25 = vpack.c.bf16 %v1927_v22, %v1926_v17  ;;  %v1993_v7 = vmax.f32 %v1694_v0, 0.0  ;;  %1735 = vmatmul.bf16.gmra.mxu3 %v9607_v5  ;;  %2846 = vmatpush.bf16.msrb.mxu2 %v9630_v11 }
 0x11d   :  { %10667 = vst [vmem:[#allocation2 + $0x48] sm:$0xff] %v10059_v10   ;;  %v1604_v14 = vadd.f32 %v10975_v40, %v1603_v12 }
 0x11e   :  { %v1166_v19 = vpop.f32.mrf.mxu0  ;;  %10740 = vst [vmem:[#allocation2 + $0x288] sm:$0xff] %v10424_v25   ;;  %v10589_v10 = vpack.c.bf16 %v1993_v7, %v1992_v63 }
 0x11f   :  { %v1957_v20 = vmax.f32 %v1604_v14, 0.0  ;;  %v1531_v29 = vpop.f32.mrf.mxu1  ;;  %v1167_v33 = vadd.f32 %v10975_v40, %v1166_v19 }
 0x120   :  { %v1532_v43 = vadd.f32 %v10975_v40, %v1531_v29  ;;  %10773 = vst [vmem:[#allocation2 + $0x308] sm:$0xff] %v10589_v10  }
 0x121   :  { %v10499_v24 = vpack.c.bf16 %v1957_v20, %v1956_v13  ;;  %1205 = vmatmul.bf16.gmra.mxu0 %v9501_v15  ;;  %1645 = vmatmul.bf16.gmra.mxu2 %v9589_v16  ;;  %v1782_v39 = vmax.f32 %v1167_v33, 0.0  ;;  %v1696_v16 = vpop.f32.mrf.mxu3  ;;  %v9629_v20 = vld [vmem:[%s12964_s2] sm:$0xff] }
 0x122   :  { %v1928_v53 = vmax.f32 %v1532_v43, 0.0  ;;  %2847 = vmatpush.bf16.msrb.mxu2 %v9629_v20  ;;  %v1697_v29 = vadd.f32 %v10975_v40, %v1696_v16 }
 0x123   :  { %10755 = vst [vmem:[#allocation2 + $0x2e8] sm:$0xff] %v10499_v24   ;;  %v9591_v24 = vld [vmem:[%s12963_s0 + $0x350] sm:$0xff] }
 0x124   :  { %v1606_v30 = vpop.f32.mrf.mxu2  ;;  %v1994_v34 = vmax.f32 %v1697_v29, 0.0  ;;  %v9621_v29 = vld [vmem:[#allocation2 + $0x2b0] sm:$0xff] }
 0x125   :  { %v1607_v41 = vadd.f32 %v10975_v40, %v1606_v30 }
 0x126   :  { %v1168_v35 = vpop.f32.mrf.mxu0 }
 0x127   :  { %v1169_v36 = vadd.f32 %v10975_v40, %v1168_v35  ;;  %v1533_v46 = vpop.f32.mrf.mxu1  ;;  %v1958_v49 = vmax.f32 %v1607_v41, 0.0 }
 0x128   :  { %v1534_v54 = vadd.f32 %v10975_v40, %v1533_v46 }
 0x129   :  { %v1783_v42 = vmax.f32 %v1169_v36, 0.0  ;;  %v1698_v33 = vpop.f32.mrf.mxu3 }
 0x12a   :  { %v1929_v58 = vmax.f32 %v1534_v54, 0.0  ;;  %v1699_v35 = vadd.f32 %v10975_v40, %v1698_v33 }
 0x12b   :  { %v10064_v45 = vpack.c.bf16 %v1783_v42, %v1782_v39  ;;  %v9608_v39 = vld [vmem:[%s12963_s0 + $0x3d8] sm:$0xff] }
 0x12c   :  { %v1608_v47 = vpop.f32.mrf.mxu2  ;;  %v10429_v61 = vpack.c.bf16 %v1929_v58, %v1928_v53  ;;  %v1995_v42 = vmax.f32 %v1699_v35, 0.0  ;;  %1740 = vmatmul.bf16.gmra.mxu3 %v9608_v39 }
 0x12d   :  { %10668 = vst [vmem:[#allocation2 + $0x380] sm:$0xff] %v10064_v45   ;;  %v1609_v50 = vadd.f32 %v10975_v40, %v1608_v47 }
 0x12e   :  { %v1171_v55 = vpop.f32.mrf.mxu0  ;;  %10741 = vst [vmem:[#allocation2 + $0x3a8] sm:$0xff] %v10429_v61   ;;  %v10594_v45 = vpack.c.bf16 %v1995_v42, %v1994_v34 }
 0x12f   :  { %v1959_v56 = vmax.f32 %v1609_v50, 0.0  ;;  %v1536_v1 = vpop.f32.mrf.mxu1  ;;  %v1172_v6 = vadd.f32 %v10975_v40, %v1171_v55 }
 0x130   :  { %v1537_v15 = vadd.f32 %v10975_v40, %v1536_v1  ;;  %10774 = vst [vmem:[#allocation2 + $0x370] sm:$0xff] %v10594_v45  }
 0x131   :  { %v10504_v60 = vpack.c.bf16 %v1959_v56, %v1958_v49  ;;  %1210 = vmatmul.bf16.gmra.mxu0 %v9502_v51  ;;  %1650 = vmatmul.bf16.gmra.mxu2 %v9590_v52  ;;  %v1784_v12 = vmax.f32 %v1172_v6, 0.0  ;;  %v1701_v50 = vpop.f32.mrf.mxu3  ;;  %v9504_v56 = vld [vmem:[%s12963_s0 + $0x98] sm:$0xff] }
 0x132   :  { %v1930_v25 = vmax.f32 %v1537_v15, 0.0  ;;  %v1702_v62 = vadd.f32 %v10975_v40, %v1701_v50 }
 0x133   :  { %10756 = vst [vmem:[#allocation2 + $0x1f8] sm:$0xff] %v10504_v60  }
 0x134   :  { %v1611_v2 = vpop.f32.mrf.mxu2  ;;  %v9637_v3 = vld [vmem:[#allocation2 + $0x380] sm:$0xff] }
 0x135   :  { %2703 = vmatmul.bf16.vlgmr.msrb.gmra.mxu1 %v9637_v3  ;;  %v1612_v13 = vadd.f32 %v10975_v40, %v1611_v2  ;;  %v1996_v3 = vmax.f32 %v1702_v62, 0.0  ;;  %v9622_v62 = vld [vmem:[#allocation2 + $0x3b0] sm:$0xff] }
 0x136   :  { %v1173_v8 = vpop.f32.mrf.mxu0 }
 0x137   :  { %v1174_v9 = vadd.f32 %v10975_v40, %v1173_v8  ;;  %v1538_v18 = vpop.f32.mrf.mxu1  ;;  %v1960_v21 = vmax.f32 %v1612_v13, 0.0  ;;  %v9609_v8 = vld [vmem:[%s12963_s0 + $0x3e0] sm:$0xff] }
 0x138   :  { %v1539_v26 = vadd.f32 %v10975_v40, %v1538_v18 }
 0x139   :  { %v1785_v14 = vmax.f32 %v1174_v9, 0.0  ;;  %v1703_v2 = vpop.f32.mrf.mxu3 }
 0x13a   :  { %v1931_v30 = vmax.f32 %v1539_v26, 0.0  ;;  %v1704_v4 = vadd.f32 %v10975_v40, %v1703_v2 }
 0x13b   :  { %v10069_v17 = vpack.c.bf16 %v1785_v14, %v1784_v12 }
 0x13c   :  { %v1613_v19 = vpop.f32.mrf.mxu2  ;;  %v10434_v32 = vpack.c.bf16 %v1931_v30, %v1930_v25  ;;  %v1997_v10 = vmax.f32 %v1704_v4, 0.0  ;;  %1745 = vmatmul.bf16.gmra.mxu3 %v9609_v8 }
 0x13d   :  { %10669 = vst [vmem:[#allocation2 + $0x110] sm:$0xff] %v10069_v17   ;;  %v1614_v22 = vadd.f32 %v10975_v40, %v1613_v19 }
 0x13e   :  { %v1176_v27 = vpop.f32.mrf.mxu0  ;;  %10742 = vst [vmem:[#allocation2 + $0x3c8] sm:$0xff] %v10434_v32   ;;  %v10599_v13 = vpack.c.bf16 %v1997_v10, %v1996_v3 }
 0x13f   :  { %v1961_v28 = vmax.f32 %v1614_v22, 0.0  ;;  %v1541_v36 = vpop.f32.mrf.mxu1  ;;  %v1177_v41 = vadd.f32 %v10975_v40, %v1176_v27 }
 0x140   :  { %v1542_v49 = vadd.f32 %v10975_v40, %v1541_v36  ;;  %10775 = vst [vmem:[#allocation2 + $0xc8] sm:$0xff] %v10599_v13  }
 0x141   :  { %v10509_v31 = vpack.c.bf16 %v1961_v28, %v1960_v21  ;;  %1215 = vmatmul.bf16.gmra.mxu0 %v9503_v23  ;;  %1655 = vmatmul.bf16.gmra.mxu2 %v9591_v24  ;;  %v1786_v46 = vmax.f32 %v1177_v41, 0.0  ;;  %v1706_v18 = vpop.f32.mrf.mxu3  ;;  %v9505_v24 = vld [vmem:[%s12963_s0 + $0xa0] sm:$0xff]  ;;  %v9610_v41 = vld [vmem:[%s12963_s0 + $0x3e8] sm:$0xff] }
 0x142   :  { %v1932_v58 = vmax.f32 %v1542_v49, 0.0  ;;  %v1707_v30 = vadd.f32 %v10975_v40, %v1706_v18 }
 0x143   :  { %10757 = vst [vmem:[#allocation2 + $0x238] sm:$0xff] %v10509_v31  }
 0x144   :  { %v1616_v37 = vpop.f32.mrf.mxu2  ;;  %v9638_v38 = vld [vmem:[#allocation2 + $0x110] sm:$0xff]  ;;  %v1998_v35 = vmax.f32 %v1707_v30, 0.0  ;;  %v9666_v30 = vld [vmem:[%s12964_s2 + $0xa8] sm:$0xff] }
 0x145   :  { %2708 = vmatmul.bf16.gmra.mxu1 %v9638_v38  ;;  %v1617_v47 = vadd.f32 %v10975_v40, %v1616_v37 }
 0x146   :  { %v1178_v43 = vpop.f32.mrf.mxu0 }
 0x147   :  { %v1179_v44 = vadd.f32 %v10975_v40, %v1178_v43  ;;  %v1543_v52 = vpop.f32.mrf.mxu1  ;;  %v1962_v54 = vmax.f32 %v1617_v47, 0.0 }
 0x148   :  { %v1544_v59 = vadd.f32 %v10975_v40, %v1543_v52 }
 0x149   :  { %v1787_v48 = vmax.f32 %v1179_v44, 0.0  ;;  %v1708_v34 = vpop.f32.mrf.mxu3 }
 0x14a   :  { %v1933_v63 = vmax.f32 %v1544_v59, 0.0  ;;  %v1709_v36 = vadd.f32 %v10975_v40, %v1708_v34 }
 0x14b   :  { %v10074_v51 = vpack.c.bf16 %v1787_v48, %v1786_v46 }
 0x14c   :  { %v1618_v53 = vpop.f32.mrf.mxu2  ;;  %v10439_v1 = vpack.c.bf16 %v1933_v63, %v1932_v58  ;;  %v1999_v43 = vmax.f32 %v1709_v36, 0.0  ;;  %1750 = vmatmul.bf16.gmra.mxu3 %v9610_v41  ;;  %v11256_v63 = vld [vmem:[%s12962_s5] ss:$0 sm:$0xff] }
 0x14d   :  { %10670 = vst [vmem:[#allocation2 + $0x118] sm:$0xff] %v10074_v51   ;;  %v1619_v55 = vadd.f32 %v10975_v40, %v1618_v53 }
 0x14e   :  { %v1181_v60 = vpop.f32.mrf.mxu0  ;;  %10743 = vst [vmem:[#allocation2 + $0x160] sm:$0xff] %v10439_v1   ;;  %v10604_v46 = vpack.c.bf16 %v1999_v43, %v1998_v35 }
 0x14f   :  { %v1963_v61 = vmax.f32 %v1619_v55, 0.0  ;;  %v1546_v5 = vpop.f32.mrf.mxu1  ;;  %v1182_v9 = vadd.f32 %v10975_v40, %v1181_v60 }
 0x150   :  { %v1547_v17 = vadd.f32 %v10975_v40, %v1546_v5  ;;  %10776 = vst [vmem:[#allocation2 + $0x278] sm:$0xff] %v10604_v46   ;;  %v9612_v46 = vld [vmem:[%s12963_s0 + $0x3f8] sm:$0xff] }
 0x151   :  { %v10514_v0 = vpack.c.bf16 %v1963_v61, %v1962_v54  ;;  %1220 = vmatmul.bf16.gmra.mxu0 %v9504_v56  ;;  %1660 = vmatmul.bf16.gmra.mxu2 %v9592_v57  ;;  %v1788_v14 = vmax.f32 %v1182_v9, 0.0  ;;  %v1711_v51 = vpop.f32.mrf.mxu3  ;;  %v9506_v57 = vld [vmem:[%s12963_s0 + $0xa8] sm:$0xff]  ;;  %v9611_v9 = vld [vmem:[%s12963_s0 + $0x3f0] sm:$0xff] }
 0x152   :  { %v1934_v25 = vmax.f32 %v1547_v17, 0.0 }
 0x153   :  { %10758 = vst [vmem:[#allocation2 + $0x398] sm:$0xff] %v10514_v0   ;;  %v1712_v0 = vadd.f32 %v11256_v63, %v1711_v51 }
 0x154   :  { %v1621_v6 = vpop.f32.mrf.mxu2  ;;  %v9639_v7 = vld [vmem:[#allocation2 + $0x118] sm:$0xff] }
 0x155   :  { %2713 = vmatmul.bf16.gmra.mxu1 %v9639_v7  ;;  %v1622_v15 = vadd.f32 %v10975_v40, %v1621_v6  ;;  %v2000_v5 = vmax.f32 %v1712_v0, 0.0 }
 0x156   :  { %v1183_v11 = vpop.f32.mrf.mxu0 }
 0x157   :  { %v1184_v12 = vadd.f32 %v10975_v40, %v1183_v11  ;;  %v1548_v20 = vpop.f32.mrf.mxu1  ;;  %v1964_v22 = vmax.f32 %v1622_v15, 0.0 }
 0x158   :  { %v1549_v26 = vadd.f32 %v10975_v40, %v1548_v20 }
 0x159   :  { %v1789_v16 = vmax.f32 %v1184_v12, 0.0  ;;  %v1713_v4 = vpop.f32.mrf.mxu3  ;;  %v9668_v12 = vld [vmem:[%s12964_s2 + $0xb8] sm:$0xff] }
 0x15a   :  { %v1935_v31 = vmax.f32 %v1549_v26, 0.0  ;;  %3018 = vmatpush.bf16.msrb.mxu3 %v9668_v12  ;;  %v9661_v12 = vld [vmem:[%s12964_s2 + $0x80] sm:$0xff] }
 0x15b   :  { %v10079_v19 = vpack.c.bf16 %v1789_v16, %v1788_v14 }
 0x15c   :  { %v1623_v21 = vpop.f32.mrf.mxu2  ;;  %v10444_v33 = vpack.c.bf16 %v1935_v31, %v1934_v25  ;;  %1755 = vmatmul.bf16.gmra.mxu3 %v9611_v9 }
 0x15d   :  { %10671 = vst [vmem:[#allocation2 + $0x98] sm:$0xff] %v10079_v19   ;;  %v1624_v23 = vadd.f32 %v10975_v40, %v1623_v21  ;;  %v9667_v21 = vld [vmem:[%s12964_s2 + $0xb0] sm:$0xff] }
 0x15e   :  { %v1186_v27 = vpop.f32.mrf.mxu0  ;;  %10744 = vst [vmem:[#allocation2 + $0x2c8] sm:$0xff] %v10444_v33   ;;  %3019 = vmatpush.bf16.msrb.mxu3 %v9667_v21  ;;  %v9623_v33 = vld [vmem:[#allocation2 + $0xd8] sm:$0xff] }
 0x15f   :  { %v1965_v28 = vmax.f32 %v1624_v23, 0.0  ;;  %v1551_v37 = vpop.f32.mrf.mxu1  ;;  %v1187_v42 = vadd.f32 %v10975_v40, %v1186_v27  ;;  %v9507_v27 = vld [vmem:[%s12963_s0 + $0xb0] sm:$0xff] }
 0x160   :  { %v1552_v50 = vadd.f32 %v10975_v40, %v1551_v37 }
 0x161   :  { %v10519_v32 = vpack.c.bf16 %v1965_v28, %v1964_v22  ;;  %1225 = vmatmul.bf16.gmra.mxu0 %v9505_v24  ;;  %2848 = vmatmul.bf16.vlgmr.msrb.gmra.mxu2 %v9621_v29  ;;  %v1790_v47 = vmax.f32 %v1187_v42, 0.0  ;;  %v1716_v20 = vpop.f32.mrf.mxu3 }
 0x162   :  { %v1936_v58 = vmax.f32 %v1552_v50, 0.0  ;;  %v1717_v34 = vadd.f32 %v11256_v63, %v1716_v20  ;;  %3020 = vmatpush.bf16.msrb.mxu3 %v9666_v30  ;;  %v9509_v30 = vld [vmem:[%s12963_s0 + $0xc0] sm:$0xff] }
 0x163   :  { %10759 = vst [vmem:[#allocation2 + $0x390] sm:$0xff] %v10519_v32  }
 0x164   :  { %v1626_v38 = vpop.f32.mrf.mxu2  ;;  %v9640_v39 = vld [vmem:[#allocation2 + $0x98] sm:$0xff]  ;;  %v2002_v41 = vmax.f32 %v1717_v34, 0.0 }
 0x165   :  { %2718 = vmatmul.bf16.gmra.mxu1 %v9640_v39  ;;  %v1627_v48 = vadd.f32 %v10975_v40, %v1626_v38  ;;  %v9665_v39 = vld [vmem:[%s12964_s2 + $0xa0] sm:$0xff] }
 0x166   :  { %v1188_v44 = vpop.f32.mrf.mxu0  ;;  %3021 = vmatpush.bf16.msrb.mxu3 %v9665_v39 }
 0x167   :  { %v1189_v45 = vadd.f32 %v10975_v40, %v1188_v44  ;;  %v1553_v53 = vpop.f32.mrf.mxu1  ;;  %v1966_v55 = vmax.f32 %v1627_v48, 0.0 }
 0x168   :  { %v1554_v59 = vadd.f32 %v10975_v40, %v1553_v53 }
 0x169   :  { %v1791_v49 = vmax.f32 %v1189_v45, 0.0  ;;  %v1718_v38 = vpop.f32.mrf.mxu3 }
 0x16a   :  { %v1937_v1 = vmax.f32 %v1554_v59, 0.0  ;;  %v1719_v42 = vadd.f32 %v11256_v63, %v1718_v38 }
 0x16b   :  { %v10084_v52 = vpack.c.bf16 %v1791_v49, %v1790_v47  ;;  %v9664_v49 = vld [vmem:[%s12964_s2 + $0x98] sm:$0xff] }
 0x16c   :  { %v1628_v54 = vpop.f32.mrf.mxu2  ;;  %v10449_v3 = vpack.c.bf16 %v1937_v1, %v1936_v58  ;;  %v2003_v48 = vmax.f32 %v1719_v42, 0.0  ;;  %1760 = vmatmul.bf16.gmra.mxu3 %v9612_v46  ;;  %v9663_v58 = vld [vmem:[%s12964_s2 + $0x90] sm:$0xff]  ;;  %v9508_v1 = vld [vmem:[%s12963_s0 + $0xb8] sm:$0xff] }
 0x16d   :  { %10672 = vst [vmem:[#allocation2 + $0x320] sm:$0xff] %v10084_v52   ;;  %v1629_v56 = vadd.f32 %v10975_v40, %v1628_v54  ;;  %v1714_v40 = vadd.f32 %v11256_v63, %v1713_v4  ;;  %3022 = vmatpush.bf16.msrb.mxu3 %v9664_v49  ;;  %v9662_v4 = vld [vmem:[%s12964_s2 + $0x88] sm:$0xff] }
 0x16e   :  { %v1191_v60 = vpop.f32.mrf.mxu0  ;;  %10745 = vst [vmem:[#allocation2 + $0x210] sm:$0xff] %v10449_v3   ;;  %v10614_v52 = vpack.c.bf16 %v2003_v48, %v2002_v41 }
 0x16f   :  { %v1967_v61 = vmax.f32 %v1629_v56, 0.0  ;;  %v1556_v6 = vpop.f32.mrf.mxu1  ;;  %v1192_v10 = vadd.f32 %v11256_v63, %v1191_v60  ;;  %v2001_v11 = vmax.f32 %v1714_v40, 0.0 }
 0x170   :  { %v1557_v19 = vadd.f32 %v11256_v63, %v1556_v6  ;;  %10778 = vst [vmem:[#allocation2 + $0x228] sm:$0xff] %v10614_v52   ;;  %v9624_v6 = vld [vmem:[#allocation2 + $0x18] sm:$0xff] }
 0x171   :  { %v10524_v2 = vpack.c.bf16 %v1967_v61, %v1966_v55  ;;  %1230 = vmatmul.bf16.gmra.mxu0 %v9506_v57  ;;  %2853 = vmatmul.bf16.gmra.mxu2 %v9622_v62  ;;  %v10609_v15 = vpack.c.bf16 %v2001_v11, %v2000_v5  ;;  %v1792_v16 = vmax.f32 %v1192_v10, 0.0  ;;  %v1721_v57 = vpop.f32.mrf.mxu3 }
 0x172   :  { %v1938_v28 = vmax.f32 %v1557_v19, 0.0  ;;  %3023 = vmatpush.bf16.msrb.mxu3 %v9663_v58  ;;  %v9626_v58 = vld [vmem:[#allocation2 + $0x368] sm:$0xff] }
 0x173   :  { %10760 = vst [vmem:[#allocation2 + $0x1a0] sm:$0xff] %v10524_v2  }
 0x174   :  { %v1631_v7 = vpop.f32.mrf.mxu2  ;;  %v9641_v8 = vld [vmem:[#allocation2 + $0x320] sm:$0xff]  ;;  %10777 = vst [vmem:[#allocation2 + $0x360] sm:$0xff] %v10609_v15  }
 0x175   :  { %2723 = vmatmul.bf16.gmra.mxu1 %v9641_v8  ;;  %v1632_v17 = vadd.f32 %v11256_v63, %v1631_v7  ;;  %v1722_v7 = vadd.f32 %v11256_v63, %v1721_v57 }
 0x176   :  { %v1193_v13 = vpop.f32.mrf.mxu0  ;;  %3024 = vmatpush.bf16.msrb.mxu3 %v9662_v4 }
 0x177   :  { %v1194_v14 = vadd.f32 %v11256_v63, %v1193_v13  ;;  %v1558_v23 = vpop.f32.mrf.mxu1  ;;  %v1968_v25 = vmax.f32 %v1632_v17, 0.0  ;;  %v2004_v13 = vmax.f32 %v1722_v7, 0.0 }
 0x178   :  { %v1559_v29 = vadd.f32 %v11256_v63, %v1558_v23 }
 0x179   :  { %v1793_v18 = vmax.f32 %v1194_v14, 0.0  ;;  %v1723_v11 = vpop.f32.mrf.mxu3 }
 0x17a   :  { %v1939_v35 = vmax.f32 %v1559_v29, 0.0  ;;  %v1724_v14 = vadd.f32 %v11256_v63, %v1723_v11  ;;  %3025 = vmatpush.bf16.msrb.mxu3 %v9661_v12 }
 0x17b   :  { %v10089_v22 = vpack.c.bf16 %v1793_v18, %v1792_v16 }
 0x17c   :  { %v1633_v24 = vpop.f32.mrf.mxu2  ;;  %v10454_v37 = vpack.c.bf16 %v1939_v35, %v1938_v28  ;;  %v2005_v18 = vmax.f32 %v1724_v14, 0.0 }
 0x17d   :  { %10673 = vst [vmem:[#allocation2 + $0x150] sm:$0xff] %v10089_v22   ;;  %v1634_v26 = vadd.f32 %v11256_v63, %v1633_v24 }
 0x17e   :  { %v1196_v31 = vpop.f32.mrf.mxu0  ;;  %10746 = vst [vmem:[#allocation2 + $0x3d8] sm:$0xff] %v10454_v37   ;;  %v10619_v21 = vpack.c.bf16 %v2005_v18, %v2004_v13  ;;  %v9627_v18 = vld [vmem:[#allocation2 + $0x330] sm:$0xff] }
 0x17f   :  { %v1969_v32 = vmax.f32 %v1634_v26, 0.0  ;;  %v1561_v43 = vpop.f32.mrf.mxu1  ;;  %v1197_v47 = vadd.f32 %v11256_v63, %v1196_v31 }
 0x180   :  { %v1562_v56 = vadd.f32 %v11256_v63, %v1561_v43  ;;  %10779 = vst [vmem:[#allocation2 + $0x348] sm:$0xff] %v10619_v21  }
 0x181   :  { %v10529_v36 = vpack.c.bf16 %v1969_v32, %v1968_v25  ;;  %1235 = vmatmul.bf16.gmra.mxu0 %v9507_v27  ;;  %2858 = vmatmul.bf16.gmra.mxu2 %v9623_v33  ;;  %v1794_v53 = vmax.f32 %v1197_v47, 0.0  ;;  %v1726_v25 = vpop.f32.mrf.mxu3  ;;  %v9625_v33 = vld [vmem:[#allocation2 + $0x50] sm:$0xff] }
 0x182   :  { %v1940_v2 = vmax.f32 %v1562_v56, 0.0  ;;  %v1727_v34 = vadd.f32 %v11256_v63, %v1726_v25 }
 0x183   :  { %10761 = vst [vmem:[#allocation2 + $0xa8] sm:$0xff] %v10529_v36  }
 0x184   :  { %v1636_v44 = vpop.f32.mrf.mxu2  ;;  %v9642_v45 = vld [vmem:[#allocation2 + $0x150] sm:$0xff]  ;;  %v2006_v37 = vmax.f32 %v1727_v34, 0.0 }
 0x185   :  { %2728 = vmatmul.bf16.gmra.mxu1 %v9642_v45  ;;  %v1637_v54 = vadd.f32 %v11256_v63, %v1636_v44 }
 0x186   :  { %v1198_v50 = vpop.f32.mrf.mxu0 }
 0x187   :  { %v1199_v51 = vadd.f32 %v11256_v63, %v1198_v50  ;;  %v1563_v61 = vpop.f32.mrf.mxu1  ;;  %v1970_v62 = vmax.f32 %v1637_v54, 0.0 }
 0x188   :  { %v1564_v3 = vadd.f32 %v11256_v63, %v1563_v61 }
 0x189   :  { %v1795_v55 = vmax.f32 %v1199_v51, 0.0  ;;  %v1728_v36 = vpop.f32.mrf.mxu3 }
 0x18a   :  { %v1941_v8 = vmax.f32 %v1564_v3, 0.0  ;;  %v1729_v38 = vadd.f32 %v11256_v63, %v1728_v36 }
 0x18b   :  { %v10094_v59 = vpack.c.bf16 %v1795_v55, %v1794_v53  ;;  %v9510_v55 = vld [vmem:[%s12963_s0 + $0xc8] sm:$0xff] }
 0x18c   :  { %v1638_v60 = vpop.f32.mrf.mxu2  ;;  %v10459_v10 = vpack.c.bf16 %v1941_v8, %v1940_v2  ;;  %v2007_v43 = vmax.f32 %v1729_v38, 0.0 }
 0x18d   :  { %10674 = vst [vmem:[#allocation2 + $0x108] sm:$0xff] %v10094_v59   ;;  %v1639_v0 = vadd.f32 %v11256_v63, %v1638_v60 }
 0x18e   :  { %v1201_v5 = vpop.f32.mrf.mxu0  ;;  %10747 = vst [vmem:[#allocation2 + $0x1e8] sm:$0xff] %v10459_v10   ;;  %v10624_v46 = vpack.c.bf16 %v2007_v43, %v2006_v37 }
 0x18f   :  { %v1971_v40 = vmax.f32 %v1639_v0, 0.0  ;;  %v1202_v17 = vadd.f32 %v11256_v63, %v1201_v5 }
 0x190   :  { %10780 = vst [vmem:[#allocation2 + $0x148] sm:$0xff] %v10624_v46  }
 0x191   :  { %v10534_v9 = vpack.c.bf16 %v1971_v40, %v1970_v62  ;;  %1240 = vmatmul.bf16.gmra.mxu0 %v9508_v1  ;;  %2863 = vmatmul.bf16.gmra.mxu2 %v9624_v6  ;;  %v1796_v22 = vmax.f32 %v1202_v17, 0.0  ;;  %v1731_v50 = vpop.f32.mrf.mxu3 }
 0x192   :  { %v1732_v59 = vadd.f32 %v11256_v63, %v1731_v50 }
 0x193   :  { %10762 = vst [vmem:[#allocation2 + $0x258] sm:$0xff] %v10534_v9  }
 0x194   :  { %v1641_v15 = vpop.f32.mrf.mxu2  ;;  %v9643_v16 = vld [vmem:[#allocation2 + $0x108] sm:$0xff]  ;;  %v2008_v62 = vmax.f32 %v1732_v59, 0.0 }
 0x195   :  { %2733 = vmatmul.bf16.gmra.mxu1 %v9643_v16  ;;  %v1642_v23 = vadd.f32 %v11256_v63, %v1641_v15  ;;  %v9511_v15 = vld [vmem:[%s12963_s0 + $0xd0] sm:$0xff] }
 0x196   :  { %v1203_v19 = vpop.f32.mrf.mxu0 }
 0x197   :  { %v1204_v20 = vadd.f32 %v11256_v63, %v1203_v19  ;;  %v1972_v28 = vmax.f32 %v1642_v23, 0.0 }
 0x199   :  { %v1797_v24 = vmax.f32 %v1204_v20, 0.0  ;;  %v1733_v61 = vpop.f32.mrf.mxu3 }
 0x19a   :  { %v1734_v0 = vadd.f32 %v11256_v63, %v1733_v61 }
 0x19b   :  { %v10099_v26 = vpack.c.bf16 %v1797_v24, %v1796_v22 }
 0x19c   :  { %v1643_v27 = vpop.f32.mrf.mxu2  ;;  %v2009_v4 = vmax.f32 %v1734_v0, 0.0 }
 0x19d   :  { %10675 = vst [vmem:[#allocation2 + $0x60] sm:$0xff] %v10099_v26   ;;  %v1644_v29 = vadd.f32 %v11256_v63, %v1643_v27 }
 0x19e   :  { %v1206_v31 = vpop.f32.mrf.mxu0  ;;  %v10629_v6 = vpack.c.bf16 %v2009_v4, %v2008_v62  ;;  %v9513_v4 = vld [vmem:[%s12963_s0 + $0xe0] sm:$0xff] }
 0x19f   :  { %v1973_v32 = vmax.f32 %v1644_v29, 0.0  ;;  %v1207_v42 = vadd.f32 %v11256_v63, %v1206_v31 }
 0x1a0   :  { %10781 = vst [vmem:[#allocation2 + $0xf8] sm:$0xff] %v10629_v6  }
 0x1a1   :  { %v10539_v35 = vpack.c.bf16 %v1973_v32, %v1972_v28  ;;  %1245 = vmatmul.bf16.gmra.mxu0 %v9509_v30  ;;  %2868 = vmatmul.bf16.gmra.mxu2 %v9625_v33  ;;  %v1798_v47 = vmax.f32 %v1207_v42, 0.0  ;;  %v1736_v10 = vpop.f32.mrf.mxu3 }
 0x1a2   :  { %v1737_v19 = vadd.f32 %v11256_v63, %v1736_v10 }
 0x1a3   :  { %10763 = vst [vmem:[#allocation2 + $0x2d8] sm:$0xff] %v10539_v35  }
 0x1a4   :  { %v1646_v39 = vpop.f32.mrf.mxu2  ;;  %v9644_v41 = vld [vmem:[#allocation2 + $0x60] sm:$0xff]  ;;  %v2010_v22 = vmax.f32 %v1737_v19, 0.0 }
 0x1a5   :  { %2738 = vmatmul.bf16.gmra.mxu1 %v9644_v41  ;;  %v1647_v48 = vadd.f32 %v11256_v63, %v1646_v39  ;;  %v9512_v41 = vld [vmem:[%s12963_s0 + $0xd8] sm:$0xff] }
 0x1a6   :  { %v1208_v44 = vpop.f32.mrf.mxu0 }
 0x1a7   :  { %v1209_v45 = vadd.f32 %v11256_v63, %v1208_v44  ;;  %v1974_v53 = vmax.f32 %v1647_v48, 0.0  ;;  %v9628_v44 = vld [vmem:[#allocation2 + $0x48] sm:$0xff] }
 0x1a9   :  { %v1799_v49 = vmax.f32 %v1209_v45, 0.0  ;;  %v1738_v21 = vpop.f32.mrf.mxu3 }
 0x1aa   :  { %v1739_v23 = vadd.f32 %v11256_v63, %v1738_v21 }
 0x1ab   :  { %v10104_v51 = vpack.c.bf16 %v1799_v49, %v1798_v47 }
 0x1ac   :  { %v1648_v52 = vpop.f32.mrf.mxu2  ;;  %v2011_v27 = vmax.f32 %v1739_v23, 0.0 }
 0x1ad   :  { %10676 = vst [vmem:[#allocation2 + $0x2e0] sm:$0xff] %v10104_v51   ;;  %v1649_v54 = vadd.f32 %v11256_v63, %v1648_v52 }
 0x1ae   :  { %v1211_v56 = vpop.f32.mrf.mxu0  ;;  %v10634_v30 = vpack.c.bf16 %v2011_v27, %v2010_v22 }
 0x1af   :  { %v1975_v57 = vmax.f32 %v1649_v54, 0.0  ;;  %v1212_v3 = vadd.f32 %v11256_v63, %v1211_v56 }
 0x1b0   :  { %10782 = vst [vmem:[#allocation2 + $0x68] sm:$0xff] %v10634_v30  }
 0x1b1   :  { %v10544_v60 = vpack.c.bf16 %v1975_v57, %v1974_v53  ;;  %1250 = vmatmul.bf16.gmra.mxu0 %v9510_v55  ;;  %2873 = vmatmul.bf16.gmra.mxu2 %v9626_v58  ;;  %v1800_v7 = vmax.f32 %v1212_v3, 0.0  ;;  %v1741_v35 = vpop.f32.mrf.mxu3 }
 0x1b2   :  { %v2704_v31 = vpop.f32.mrf.mxu1  ;;  %v1742_v45 = vadd.f32 %v11256_v63, %v1741_v35 }
 0x1b3   :  { %10764 = vst [vmem:[#allocation2 + $0xf0] sm:$0xff] %v10544_v60  }
 0x1b4   :  { %v1651_v1 = vpop.f32.mrf.mxu2  ;;  %v9653_v2 = vld [vmem:[#allocation2 + $0x2e0] sm:$0xff]  ;;  %v2012_v49 = vmax.f32 %v1742_v45, 0.0 }
 0x1b5   :  { %3026 = vmatmul.bf16.vlgmr.msrb.gmra.mxu3 %v9653_v2  ;;  %v1652_v8 = vadd.f32 %v11256_v63, %v1651_v1 }
 0x1b6   :  { %v1213_v5 = vpop.f32.mrf.mxu0 }
 0x1b7   :  { %v1214_v40 = vadd.f32 %v11256_v63, %v1213_v5  ;;  %v1976_v13 = vmax.f32 %v1652_v8, 0.0 }
 0x1b9   :  { %v1801_v9 = vmax.f32 %v1214_v40, 0.0  ;;  %v1743_v48 = vpop.f32.mrf.mxu3 }
 0x1ba   :  { %v11347_v47 = vpop.f32.mrf.mxu1  ;;  %v1744_v50 = vadd.f32 %v11256_v63, %v1743_v48 }
 0x1bb   :  { %v10109_v11 = vpack.c.bf16 %v1801_v9, %v1800_v7 }
 0x1bc   :  { %v1653_v12 = vpop.f32.mrf.mxu2  ;;  %v2013_v54 = vmax.f32 %v1744_v50, 0.0  ;;  %v9515_v50 = vld [vmem:[%s12963_s0 + $0xf0] sm:$0xff] }
 0x1bd   :  { %10677 = vst [vmem:[#allocation2 + $0x388] sm:$0xff] %v10109_v11   ;;  %v1654_v14 = vadd.f32 %v11256_v63, %v1653_v12 }
 0x1be   :  { %v1216_v16 = vpop.f32.mrf.mxu0  ;;  %v10639_v57 = vpack.c.bf16 %v2013_v54, %v2012_v49  ;;  %v9681_v54 = vld [vmem:[%s12964_s2 + $0xe0] sm:$0xff] }
 0x1bf   :  { %v1977_v17 = vmax.f32 %v1654_v14, 0.0  ;;  %v1217_v26 = vadd.f32 %v11256_v63, %v1216_v16 }
 0x1c0   :  { %10783 = vst [vmem:[#allocation2] sm:$0xff] %v10639_v57  }
 0x1c1   :  { %v10549_v20 = vpack.c.bf16 %v1977_v17, %v1976_v13  ;;  %1255 = vmatmul.bf16.gmra.mxu0 %v9511_v15  ;;  %2878 = vmatmul.bf16.gmra.mxu2 %v9627_v18  ;;  %v1802_v32 = vmax.f32 %v1217_v26, 0.0  ;;  %v1746_v61 = vpop.f32.mrf.mxu3 }
 0x1c2   :  { %v2709_v0 = vpop.f32.mrf.mxu1  ;;  %v1747_v6 = vadd.f32 %v11256_v63, %v1746_v61 }
 0x1c3   :  { %10765 = vst [vmem:[#allocation2 + $0x180] sm:$0xff] %v10549_v20  }
 0x1c4   :  { %v1656_v24 = vpop.f32.mrf.mxu2  ;;  %v9654_v25 = vld [vmem:[#allocation2 + $0x388] sm:$0xff]  ;;  %v2014_v9 = vmax.f32 %v1747_v6, 0.0  ;;  %v9679_v6 = vld [vmem:[%s12964_s2 + $0xd0] sm:$0xff] }
 0x1c5   :  { %3031 = vmatmul.bf16.gmra.mxu3 %v9654_v25  ;;  %v1657_v33 = vadd.f32 %v11256_v63, %v1656_v24  ;;  %v9514_v25 = vld [vmem:[%s12963_s0 + $0xe8] sm:$0xff] }
 0x1c6   :  { %v1218_v28 = vpop.f32.mrf.mxu0 }
 0x1c7   :  { %v1219_v29 = vadd.f32 %v11256_v63, %v1218_v28  ;;  %v1978_v38 = vmax.f32 %v1657_v33, 0.0 }
 0x1c9   :  { %v1803_v34 = vmax.f32 %v1219_v29, 0.0  ;;  %v1748_v8 = vpop.f32.mrf.mxu3 }
 0x1ca   :  { %v1749_v10 = vadd.f32 %v11256_v63, %v1748_v8  ;;  %v11362_v16 = vpop.f32.mrf.mxu1 }
 0x1cb   :  { %v10114_v36 = vpack.c.bf16 %v1803_v34, %v1802_v32 }
 0x1cc   :  { %v1658_v37 = vpop.f32.mrf.mxu2  ;;  %v2015_v15 = vmax.f32 %v1749_v10, 0.0  ;;  %v9516_v10 = vld [vmem:[%s12963_s0 + $0xf8] sm:$0xff] }
 0x1cd   :  { %10678 = vst [vmem:[#allocation2 + $0x338] sm:$0xff] %v10114_v36   ;;  %v1659_v39 = vadd.f32 %v11256_v63, %v1658_v37  ;;  %v9684_v37 = vld [vmem:[%s12964_s2 + $0xf8] sm:$0xff] }
 0x1ce   :  { %v1221_v42 = vpop.f32.mrf.mxu0  ;;  %v10644_v19 = vpack.c.bf16 %v2015_v15, %v2014_v9  ;;  %3212 = vmatpush.bf16.msra.mxu1 %v9684_v37 }
 0x1cf   :  { %v1979_v43 = vmax.f32 %v1659_v39, 0.0  ;;  %v1222_v53 = vadd.f32 %v11256_v63, %v1221_v42 }
 0x1d0   :  { %10784 = vst [vmem:[#allocation2 + $0x298] sm:$0xff] %v10644_v19  }
 0x1d1   :  { %v10554_v46 = vpack.c.bf16 %v1979_v43, %v1978_v38  ;;  %1260 = vmatmul.bf16.gmra.mxu0 %v9512_v41  ;;  %2883 = vmatmul.bf16.gmra.mxu2 %v9628_v44  ;;  %v1804_v58 = vmax.f32 %v1222_v53, 0.0  ;;  %v1751_v22 = vpop.f32.mrf.mxu3  ;;  %v9683_v44 = vld [vmem:[%s12964_s2 + $0xf0] sm:$0xff] }
 0x1d2   :  { %v1752_v27 = vadd.f32 %v11256_v63, %v1751_v22  ;;  %v2714_v28 = vpop.f32.mrf.mxu1  ;;  %3213 = vmatpush.bf16.msra.mxu1 %v9683_v44 }
 0x1d3   :  { %10766 = vst [vmem:[#allocation2 + $0x170] sm:$0xff] %v10554_v46  }
 0x1d4   :  { %v1661_v51 = vpop.f32.mrf.mxu2  ;;  %v9655_v52 = vld [vmem:[#allocation2 + $0x338] sm:$0xff]  ;;  %v2016_v30 = vmax.f32 %v1752_v27, 0.0 }
 0x1d5   :  { %3036 = vmatmul.bf16.gmra.mxu3 %v9655_v52  ;;  %v1662_v59 = vadd.f32 %v11256_v63, %v1661_v51  ;;  %v9682_v51 = vld [vmem:[%s12964_s2 + $0xe8] sm:$0xff] }
 0x1d6   :  { %v1223_v55 = vpop.f32.mrf.mxu0  ;;  %3214 = vmatpush.bf16.msra.mxu1 %v9682_v51 }
 0x1d7   :  { %v1224_v56 = vadd.f32 %v11256_v63, %v1223_v55  ;;  %v1980_v2 = vmax.f32 %v1662_v59, 0.0 }
 0x1d9   :  { %v1805_v60 = vmax.f32 %v1224_v56, 0.0  ;;  %v1753_v29 = vpop.f32.mrf.mxu3 }
 0x1da   :  { %v11382_v45 = vpop.f32.mrf.mxu1  ;;  %3215 = vmatpush.bf16.msra.mxu1 %v9681_v54  ;;  %v9518_v54 = vld [vmem:[%s12963_s0 + $0x108] sm:$0xff] }
 0x1db   :  { %v10119_v62 = vpack.c.bf16 %v1805_v60, %v1804_v58 }
 0x1dc   :  { %v1663_v1 = vpop.f32.mrf.mxu2 }
 0x1dd   :  { %10679 = vst [vmem:[#allocation2 + $0x340] sm:$0xff] %v10119_v62   ;;  %v1664_v3 = vadd.f32 %v11256_v63, %v1663_v1  ;;  %v9680_v1 = vld [vmem:[%s12964_s2 + $0xd8] sm:$0xff] }
 0x1de   :  { %v1226_v5 = vpop.f32.mrf.mxu0  ;;  %3216 = vmatpush.bf16.msra.mxu1 %v9680_v1 }
 0x1df   :  { %v1981_v40 = vmax.f32 %v1664_v3, 0.0  ;;  %v1227_v13 = vadd.f32 %v11256_v63, %v1226_v5 }
 0x1e1   :  { %v10559_v7 = vpack.c.bf16 %v1981_v40, %v1980_v2  ;;  %1265 = vmatmul.bf16.gmra.mxu0 %v9513_v4  ;;  %v1806_v20 = vmax.f32 %v1227_v13, 0.0  ;;  %v1756_v46 = vpop.f32.mrf.mxu3 }
 0x1e2   :  { %v1757_v53 = vadd.f32 %v11256_v63, %v1756_v46  ;;  %v2719_v58 = vpop.f32.mrf.mxu1  ;;  %3217 = vmatpush.bf16.msra.mxu1 %v9679_v6  ;;  %v9519_v6 = vld [vmem:[%s12963_s0 + $0x110] sm:$0xff] }
 0x1e3   :  { %10767 = vst [vmem:[#allocation2 + $0x3d0] sm:$0xff] %v10559_v7  }
 0x1e4   :  { %v2849_v11 = vpop.f32.mrf.mxu2  ;;  %v9656_v12 = vld [vmem:[#allocation2 + $0x340] sm:$0xff]  ;;  %v2018_v56 = vmax.f32 %v1757_v53, 0.0 }
 0x1e5   :  { %v11360_v14 = vadd.f32 %v2849_v11, %v2704_v31  ;;  %3041 = vmatmul.bf16.gmra.mxu3 %v9656_v12  ;;  %v1754_v31 = vadd.f32 %v11256_v63, %v1753_v29  ;;  %v9678_v11 = vld [vmem:[%s12964_s2 + $0xc8] sm:$0xff] }
 0x1e6   :  { %v1228_v17 = vpop.f32.mrf.mxu0  ;;  %3218 = vmatpush.bf16.msra.mxu1 %v9678_v11 }
 0x1e7   :  { %v1229_v18 = vadd.f32 %v11256_v63, %v1228_v17  ;;  %v2017_v36 = vmax.f32 %v1754_v31, 0.0  ;;  %v9677_v17 = vld [vmem:[%s12964_s2 + $0xc0] sm:$0xff] }
 0x1e9   :  { %v1807_v21 = vmax.f32 %v1229_v18, 0.0  ;;  %v10649_v41 = vpack.c.bf16 %v2017_v36, %v2016_v30  ;;  %v1758_v55 = vpop.f32.mrf.mxu3  ;;  %v9517_v36 = vld [vmem:[%s12963_s0 + $0x100] sm:$0xff] }
 0x1ea   :  { %v1759_v57 = vadd.f32 %v11256_v63, %v1758_v55  ;;  %v11415_v12 = vpop.f32.mrf.mxu1  ;;  %3219 = vmatpush.bf16.msra.mxu1 %v9677_v17 }
 0x1eb   :  { %v10124_v23 = vpack.c.bf16 %v1807_v21, %v1806_v20  ;;  %10785 = vst [vmem:[#allocation2 + $0x270] sm:$0xff] %v10649_v41  }
 0x1ec   :  { %v11365_v24 = vpop.f32.mrf.mxu2 }
 0x1ed   :  { %10680 = vst [vmem:[#allocation2 + $0x80] sm:$0xff] %v10124_v23  }
 0x1ee   :  { %v1231_v26 = vpop.f32.mrf.mxu0 }
 0x1ef   :  { %v1232_v34 = vadd.f32 %v11256_v63, %v1231_v26 }
 0x1f1   :  { %1270 = vmatmul.bf16.gmra.mxu0 %v9514_v25  ;;  %v1808_v42 = vmax.f32 %v1232_v34, 0.0  ;;  %v1761_v7 = vpop.f32.mrf.mxu3 }
 0x1f2   :  { %v1762_v15 = vadd.f32 %v11256_v63, %v1761_v7  ;;  %v2724_v30 = vpop.f32.mrf.mxu1 }
 0x1f4   :  { %v2854_v32 = vpop.f32.mrf.mxu2  ;;  %v9657_v33 = vld [vmem:[#allocation2 + $0x80] sm:$0xff]  ;;  %v2020_v19 = vmax.f32 %v1762_v15, 0.0 }
 0x1f5   :  { %v11373_v35 = vadd.f32 %v2854_v32, %v2709_v0  ;;  %3046 = vmatmul.bf16.gmra.mxu3 %v9657_v33  ;;  %v2019_v0 = vmax.f32 %v1759_v57, 0.0 }
 0x1f6   :  { %v1233_v38 = vpop.f32.mrf.mxu0 }
 0x1f7   :  { %v1234_v39 = vadd.f32 %v11256_v63, %v1233_v38  ;;  %v10654_v4 = vpack.c.bf16 %v2019_v0, %v2018_v56 }
 0x1f9   :  { %v1809_v43 = vmax.f32 %v1234_v39, 0.0  ;;  %10786 = vst [vmem:[#allocation2 + $0x310] sm:$0xff] %v10654_v4   ;;  %v1763_v18 = vpop.f32.mrf.mxu3 }
 0x1fa   :  { %v1764_v20 = vadd.f32 %v11256_v63, %v1763_v18  ;;  %v11431_v38 = vpop.f32.mrf.mxu1 }
 0x1fb   :  { %v10129_v48 = vpack.c.bf16 %v1809_v43, %v1808_v42 }
 0x1fc   :  { %v11384_v49 = vpop.f32.mrf.mxu2  ;;  %v2021_v26 = vmax.f32 %v1764_v20, 0.0 }
 0x1fd   :  { %10681 = vst [vmem:[#allocation2 + $0x1a8] sm:$0xff] %v10129_v48  }
 0x1fe   :  { %v1236_v52 = vpop.f32.mrf.mxu0  ;;  %v10659_v29 = vpack.c.bf16 %v2021_v26, %v2020_v19 }
 0x1ff   :  { %v1237_v61 = vadd.f32 %v11256_v63, %v1236_v52 }
 0x200   :  { %10787 = vst [vmem:[#allocation2 + $0x190] sm:$0xff] %v10659_v29  }
 0x201   :  { %1275 = vmatmul.bf16.gmra.mxu0 %v9515_v50  ;;  %v1810_v5 = vmax.f32 %v1237_v61, 0.0 }
 0x202   :  { %v2729_v52 = vpop.f32.mrf.mxu1 }
 0x204   :  { %v2859_v59 = vpop.f32.mrf.mxu2  ;;  %v9658_v60 = vld [vmem:[#allocation2 + $0x1a8] sm:$0xff] }
 0x205   :  { %v11398_v62 = vadd.f32 %v2859_v59, %v2714_v28  ;;  %3051 = vmatmul.bf16.gmra.mxu3 %v9658_v60 }
 0x206   :  { %v1238_v2 = vpop.f32.mrf.mxu0 }
 0x207   :  { %v1239_v3 = vadd.f32 %v11256_v63, %v1238_v2 }
 0x209   :  { %v1811_v40 = vmax.f32 %v1239_v3, 0.0 }
 0x20a   :  { %v11445_v60 = vpop.f32.mrf.mxu1 }
 0x20b   :  { %v10134_v8 = vpack.c.bf16 %v1811_v40, %v1810_v5  ;;  %12968 = vst [vmem:[#allocation4_spill] sm:$0xff] %v11445_v60 }
 0x20c   :  { %v11407_v9 = vpop.f32.mrf.mxu2 }
 0x20d   :  { %10682 = vst [vmem:[#allocation2 + $0x1b8] sm:$0xff] %v10134_v8  }
 0x20e   :  { %v1241_v13 = vpop.f32.mrf.mxu0 }
 0x20f   :  { %v1242_v23 = vadd.f32 %v11256_v63, %v1241_v13 }
 0x211   :  { %1280 = vmatmul.bf16.gmra.mxu0 %v9516_v10  ;;  %v1812_v31 = vmax.f32 %v1242_v23, 0.0 }
 0x212   :  { %v2734_v8 = vpop.f32.mrf.mxu1 }
 0x214   :  { %v2864_v21 = vpop.f32.mrf.mxu2  ;;  %v9659_v22 = vld [vmem:[#allocation2 + $0x1b8] sm:$0xff] }
 0x215   :  { %v11423_v25 = vadd.f32 %v2864_v21, %v2719_v58  ;;  %3056 = vmatmul.bf16.gmra.mxu3 %v9659_v22 }
 0x216   :  { %v1243_v27 = vpop.f32.mrf.mxu0 }
 0x217   :  { %v1244_v28 = vadd.f32 %v11256_v63, %v1243_v27 }
 0x219   :  { %v1813_v32 = vmax.f32 %v1244_v28, 0.0  ;;  %v9520_v28 = vld [vmem:[%s12963_s0 + $0x118] sm:$0xff] }
 0x21a   :  { %v11462_v22 = vpop.f32.mrf.mxu1 }
 0x21b   :  { %v10139_v33 = vpack.c.bf16 %v1813_v32, %v1812_v31  ;;  %12970 = vst [vmem:[#allocation6_spill] sm:$0xff] %v11462_v22 }
 0x21c   :  { %v11426_v34 = vpop.f32.mrf.mxu2 }
 0x21d   :  { %10683 = vst [vmem:[#allocation2 + $0x168] sm:$0xff] %v10139_v33  }
 0x21e   :  { %v1246_v37 = vpop.f32.mrf.mxu0 }
 0x21f   :  { %v1247_v42 = vadd.f32 %v11256_v63, %v1246_v37 }
 0x221   :  { %1285 = vmatmul.bf16.gmra.mxu0 %v9517_v36  ;;  %v1814_v48 = vmax.f32 %v1247_v42, 0.0 }
 0x222   :  { %v2739_v31 = vpop.f32.mrf.mxu1 }
 0x224   :  { %v2869_v39 = vpop.f32.mrf.mxu2  ;;  %v9660_v41 = vld [vmem:[#allocation2 + $0x168] sm:$0xff] }
 0x225   :  { %v11434_v43 = vadd.f32 %v2869_v39, %v2724_v30  ;;  %3061 = vmatmul.bf16.gmra.mxu3 %v9660_v41 }
 0x226   :  { %v1248_v44 = vpop.f32.mrf.mxu0 }
 0x227   :  { %v1249_v46 = vadd.f32 %v11256_v63, %v1248_v44 }
 0x229   :  { %v1815_v50 = vmax.f32 %v1249_v46, 0.0 }
 0x22b   :  { %v10144_v51 = vpack.c.bf16 %v1815_v50, %v1814_v48  ;;  %v9521_v50 = vld [vmem:[%s12963_s0 + $0x120] sm:$0xff] }
 0x22c   :  { %v11437_v53 = vpop.f32.mrf.mxu2 }
 0x22d   :  { %10684 = vst [vmem:[#allocation2 + $0x3e8] sm:$0xff] %v10144_v51  }
 0x22e   :  { %v1251_v55 = vpop.f32.mrf.mxu0 }
 0x22f   :  { %v1252_v58 = vadd.f32 %v11256_v63, %v1251_v55 }
 0x231   :  { %1290 = vmatmul.bf16.gmra.mxu0 %v9518_v54  ;;  %v1816_v1 = vmax.f32 %v1252_v58, 0.0 }
 0x234   :  { %v2874_v56 = vpop.f32.mrf.mxu2  ;;  %v9669_v57 = vld [vmem:[#allocation2 + $0x3e8] sm:$0xff] }
 0x235   :  { %v11443_v59 = vadd.f32 %v2874_v56, %v2729_v52  ;;  %3220 = vmatmul.bf16.vlgmr.msra.gmra.mxu1 %v9669_v57 }
 0x236   :  { %v1253_v61 = vpop.f32.mrf.mxu0 }
 0x237   :  { %v1254_v0 = vadd.f32 %v11256_v63, %v1253_v61 }
 0x238   :  { %v3027_v3 = vpop.f32.mrf.mxu3 }
 0x239   :  { %v1817_v2 = vmax.f32 %v1254_v0, 0.0  ;;  %v11449_v4 = vadd.f32 %v3027_v3, %v11360_v14 }
 0x23b   :  { %v10149_v5 = vpack.c.bf16 %v1817_v2, %v1816_v1  ;;  %v9522_v2 = vld [vmem:[%s12963_s0 + $0x128] sm:$0xff] }
 0x23c   :  { %v11451_v40 = vpop.f32.mrf.mxu2 }
 0x23d   :  { %12969 = vst [vmem:[#allocation5_spill] sm:$0xff] %v11451_v40 }
 0x23e   :  { %10685 = vst [vmem:[#allocation2 + $0x2f8] sm:$0xff] %v10149_v5   ;;  %v1256_v7 = vpop.f32.mrf.mxu0 }
 0x23f   :  { %v1257_v15 = vadd.f32 %v11256_v63, %v1256_v7 }
 0x240   :  { %v11456_v10 = vpop.f32.mrf.mxu3 }
 0x241   :  { %1295 = vmatmul.bf16.gmra.mxu0 %v9519_v6  ;;  %v1818_v19 = vmax.f32 %v1257_v15, 0.0 }
 0x244   :  { %v2879_v11 = vpop.f32.mrf.mxu2 }
 0x245   :  { %v9670_v13 = vld [vmem:[#allocation2 + $0x2f8] sm:$0xff]  ;;  %v11459_v17 = vadd.f32 %v2879_v11, %v2734_v8 }
 0x246   :  { %v1258_v14 = vpop.f32.mrf.mxu0  ;;  %3225 = vmatmul.bf16.gmra.mxu1 %v9670_v13  ;;  %v9700_v8 = vld [vmem:[%s12964_s2 + $0x138] sm:$0xff] }
 0x247   :  { %v1259_v18 = vadd.f32 %v11256_v63, %v1258_v14  ;;  %3406 = vmatpush.bf16.msra.mxu2 %v9700_v8  ;;  %v9525_v8 = vld [vmem:[%s12963_s0 + $0x140] sm:$0xff] }
 0x248   :  { %v3032_v21 = vpop.f32.mrf.mxu3 }
 0x249   :  { %v1819_v20 = vmax.f32 %v1259_v18, 0.0  ;;  %v11465_v23 = vadd.f32 %v3032_v21, %v11373_v35  ;;  %v9699_v18 = vld [vmem:[%s12964_s2 + $0x130] sm:$0xff] }
 0x24a   :  { %v9523_v21 = vld [vmem:[%s12963_s0 + $0x130] sm:$0xff] }
 0x24b   :  { %v10154_v26 = vpack.c.bf16 %v1819_v20, %v1818_v19  ;;  %3407 = vmatpush.bf16.msra.mxu2 %v9699_v18 }
 0x24c   :  { %v11467_v27 = vpop.f32.mrf.mxu2 }
 0x24d   :  { %12971 = vst [vmem:[#allocation7_spill] sm:$0xff] %v11467_v27 }
 0x24e   :  { %10686 = vst [vmem:[#allocation2 + $0x290] sm:$0xff] %v10154_v26   ;;  %v1261_v29 = vpop.f32.mrf.mxu0  ;;  %v9698_v26 = vld [vmem:[%s12964_s2 + $0x128] sm:$0xff] }
 0x24f   :  { %v1262_v36 = vadd.f32 %v11256_v63, %v1261_v29  ;;  %3408 = vmatpush.bf16.msra.mxu2 %v9698_v26 }
 0x250   :  { %v11472_v30 = vpop.f32.mrf.mxu3 }
 0x251   :  { %1300 = vmatmul.bf16.gmra.mxu0 %v9520_v28  ;;  %v1820_v41 = vmax.f32 %v1262_v36, 0.0 }
 0x254   :  { %v2884_v32 = vpop.f32.mrf.mxu2 }
 0x255   :  { %v9671_v33 = vld [vmem:[#allocation2 + $0x290] sm:$0xff]  ;;  %v11475_v37 = vadd.f32 %v2884_v32, %v2739_v31 }
 0x256   :  { %v1263_v35 = vpop.f32.mrf.mxu0  ;;  %3230 = vmatmul.bf16.gmra.mxu1 %v9671_v33  ;;  %v9696_v33 = vld [vmem:[%s12964_s2 + $0x118] sm:$0xff] }
 0x257   :  { %v1264_v39 = vadd.f32 %v11256_v63, %v1263_v35 }
 0x258   :  { %v3037_v44 = vpop.f32.mrf.mxu3 }
 0x259   :  { %v1821_v42 = vmax.f32 %v1264_v39, 0.0  ;;  %v11479_v46 = vadd.f32 %v3037_v44, %v11398_v62  ;;  %v9695_v44 = vld [vmem:[%s12964_s2 + $0x110] sm:$0xff] }
 0x25b   :  { %v10159_v48 = vpack.c.bf16 %v1821_v42, %v1820_v41 }
 0x25d   :  { %10687 = vst [vmem:[#allocation2 + $0x28] sm:$0xff] %v10159_v48  }
 0x25e   :  { %v1266_v51 = vpop.f32.mrf.mxu0 }
 0x25f   :  { %v1267_v55 = vadd.f32 %v11256_v63, %v1266_v51  ;;  %v9524_v51 = vld [vmem:[%s12963_s0 + $0x138] sm:$0xff] }
 0x260   :  { %v11484_v52 = vpop.f32.mrf.mxu3 }
 0x261   :  { %1305 = vmatmul.bf16.gmra.mxu0 %v9521_v50  ;;  %v1822_v58 = vmax.f32 %v1267_v55, 0.0 }
 0x264   :  { %v9672_v54 = vld [vmem:[#allocation2 + $0x28] sm:$0xff] }
 0x266   :  { %v1268_v56 = vpop.f32.mrf.mxu0  ;;  %3235 = vmatmul.bf16.gmra.mxu1 %v9672_v54  ;;  %v9694_v54 = vld [vmem:[%s12964_s2 + $0x108] sm:$0xff] }
 0x267   :  { %v1269_v57 = vadd.f32 %v11256_v63, %v1268_v56 }
 0x268   :  { %v3042_v61 = vpop.f32.mrf.mxu3 }
 0x269   :  { %v1823_v62 = vmax.f32 %v1269_v57, 0.0  ;;  %v11489_v0 = vadd.f32 %v3042_v61, %v11423_v25 }
 0x26b   :  { %v10164_v1 = vpack.c.bf16 %v1823_v62, %v1822_v58 }
 0x26d   :  { %10688 = vst [vmem:[#allocation2 + $0x138] sm:$0xff] %v10164_v1  }
 0x26e   :  { %v1271_v3 = vpop.f32.mrf.mxu0 }
 0x26f   :  { %v1272_v7 = vadd.f32 %v11256_v63, %v1271_v3 }
 0x270   :  { %v11494_v5 = vpop.f32.mrf.mxu3 }
 0x271   :  { %1310 = vmatmul.bf16.gmra.mxu0 %v9522_v2  ;;  %v1824_v13 = vmax.f32 %v1272_v7, 0.0 }
 0x274   :  { %v9673_v6 = vld [vmem:[#allocation2 + $0x138] sm:$0xff] }
 0x276   :  { %v1273_v11 = vpop.f32.mrf.mxu0  ;;  %3240 = vmatmul.bf16.gmra.mxu1 %v9673_v6 }
 0x277   :  { %v1274_v25 = vadd.f32 %v11256_v63, %v1273_v11 }
 0x278   :  { %v3047_v14 = vpop.f32.mrf.mxu3 }
 0x279   :  { %v1825_v15 = vmax.f32 %v1274_v25, 0.0  ;;  %v11505_v19 = vadd.f32 %v3047_v14, %v11434_v43  ;;  %v9697_v43 = vld [vmem:[%s12964_s2 + $0x120] sm:$0xff] }
 0x27a   :  { %3409 = vmatpush.bf16.msra.mxu2 %v9697_v43 }
 0x27b   :  { %v10169_v20 = vpack.c.bf16 %v1825_v15, %v1824_v13 }
 0x27d   :  { %10689 = vst [vmem:[#allocation2 + $0xc0] sm:$0xff] %v10169_v20  }
 0x27e   :  { %v1276_v28 = vpop.f32.mrf.mxu0  ;;  %3410 = vmatpush.bf16.msra.mxu2 %v9696_v33 }
 0x27f   :  { %v1277_v32 = vadd.f32 %v11256_v63, %v1276_v28  ;;  %v11560_v28 = vpop.f32.mrf.mxu1 }
 0x280   :  { %v11513_v29 = vpop.f32.mrf.mxu3  ;;  %12974 = vst [vmem:[#allocation10_spill] sm:$0xff] %v11560_v28 }
 0x281   :  { %1315 = vmatmul.bf16.gmra.mxu0 %v9523_v21  ;;  %v1826_v39 = vmax.f32 %v1277_v32, 0.0 }
 0x282   :  { %3411 = vmatpush.bf16.msra.mxu2 %v9695_v44 }
 0x284   :  { %v9674_v31 = vld [vmem:[#allocation2 + $0xc0] sm:$0xff] }
 0x286   :  { %v1278_v36 = vpop.f32.mrf.mxu0  ;;  %3245 = vmatmul.bf16.gmra.mxu1 %v9674_v31  ;;  %3412 = vmatpush.bf16.msra.mxu2 %v9694_v54  ;;  %v9526_v31 = vld [vmem:[%s12963_s0 + $0x148] sm:$0xff]  ;;  %v9527_v54 = vld [vmem:[%s12963_s0 + $0x150] sm:$0xff] }
 0x287   :  { %v1279_v35 = vadd.f32 %v11256_v63, %v1278_v36 }
 0x288   :  { %v3052_v42 = vpop.f32.mrf.mxu3 }
 0x289   :  { %v1827_v41 = vmax.f32 %v1279_v35, 0.0  ;;  %v11527_v48 = vadd.f32 %v3052_v42, %v11443_v59  ;;  %v9693_v59 = vld [vmem:[%s12964_s2 + $0x100] sm:$0xff] }
 0x28a   :  { %3413 = vmatpush.bf16.msra.mxu2 %v9693_v59 }
 0x28b   :  { %v10174_v50 = vpack.c.bf16 %v1827_v41, %v1826_v39 }
 0x28d   :  { %10690 = vst [vmem:[#allocation2 + $0x1c0] sm:$0xff] %v10174_v50  }
 0x28e   :  { %v1281_v55 = vpop.f32.mrf.mxu0 }
 0x28f   :  { %v1282_v58 = vadd.f32 %v11256_v63, %v1281_v55 }
 0x290   :  { %v11535_v56 = vpop.f32.mrf.mxu3 }
 0x291   :  { %1320 = vmatmul.bf16.gmra.mxu0 %v9524_v51  ;;  %12972 = vst [vmem:[#allocation8_spill] sm:$0xff] %v11535_v56  ;;  %v1828_v1 = vmax.f32 %v1282_v58, 0.0 }
 0x294   :  { %v9675_v57 = vld [vmem:[#allocation2 + $0x1c0] sm:$0xff] }
 0x296   :  { %v1283_v62 = vpop.f32.mrf.mxu0  ;;  %3250 = vmatmul.bf16.gmra.mxu1 %v9675_v57 }
 0x297   :  { %v1284_v61 = vadd.f32 %v11256_v63, %v1283_v62  ;;  %v11553_v63 = vld [vmem:[%s12962_s5] ss:$0 sm:$0xff] }
 0x298   :  { %v3057_v3 = vpop.f32.mrf.mxu3 }
 0x299   :  { %v1829_v2 = vmax.f32 %v1284_v61, 0.0  ;;  %v11543_v6 = vadd.f32 %v3057_v3, %v11459_v17 }
 0x29b   :  { %v10179_v7 = vpack.c.bf16 %v1829_v2, %v1828_v1 }
 0x29d   :  { %10691 = vst [vmem:[#allocation2 + $0x280] sm:$0xff] %v10179_v7  }
 0x29e   :  { %v1286_v11 = vpop.f32.mrf.mxu0 }
 0x29f   :  { %v1287_v15 = vadd.f32 %v11553_v63, %v1286_v11 }
 0x2a0   :  { %v11548_v25 = vpop.f32.mrf.mxu3 }
 0x2a1   :  { %1325 = vmatmul.bf16.gmra.mxu0 %v9525_v8  ;;  %12973 = vst [vmem:[#allocation9_spill] sm:$0xff] %v11548_v25  ;;  %v1830_v18 = vmax.f32 %v1287_v15, 0.0  ;;  %v9528_v8 = vld [vmem:[%s12963_s0 + $0x158] sm:$0xff] }
 0x2a4   :  { %v9676_v13 = vld [vmem:[#allocation2 + $0x280] sm:$0xff] }
 0x2a6   :  { %v1288_v17 = vpop.f32.mrf.mxu0  ;;  %3255 = vmatmul.bf16.gmra.mxu1 %v9676_v13 }
 0x2a7   :  { %v1289_v14 = vadd.f32 %v11553_v63, %v1288_v17 }
 0x2a8   :  { %v3062_v21 = vpop.f32.mrf.mxu3 }
 0x2a9   :  { %v1831_v20 = vmax.f32 %v1289_v14, 0.0  ;;  %v11558_v26 = vadd.f32 %v3062_v21, %v11475_v37 }
 0x2ab   :  { %v10184_v43 = vpack.c.bf16 %v1831_v20, %v1830_v18 }
 0x2ad   :  { %10692 = vst [vmem:[#allocation2 + $0x100] sm:$0xff] %v10184_v43  }
 0x2ae   :  { %v1291_v32 = vpop.f32.mrf.mxu0 }
 0x2af   :  { %v1292_v39 = vadd.f32 %v11553_v63, %v1291_v32  ;;  %v9529_v32 = vld [vmem:[%s12963_s0 + $0x160] sm:$0xff] }
 0x2b1   :  { %1330 = vmatmul.bf16.gmra.mxu0 %v9526_v31  ;;  %v1832_v42 = vmax.f32 %v1292_v39, 0.0 }
 0x2b2   :  { %v3221_v33 = vpop.f32.mrf.mxu1 }
 0x2b3   :  { %v11566_v36 = vadd.f32 %v3221_v33, %v11449_v4 }
 0x2b4   :  { %v9685_v35 = vld [vmem:[#allocation2 + $0x100] sm:$0xff] }
 0x2b5   :  { %3414 = vmatmul.bf16.vlgmr.msra.gmra.mxu2 %v9685_v35 }
 0x2b6   :  { %v1293_v41 = vpop.f32.mrf.mxu0 }
 0x2b7   :  { %v1294_v37 = vadd.f32 %v11553_v63, %v1293_v41 }
 0x2b9   :  { %v1833_v44 = vmax.f32 %v1294_v37, 0.0 }
 0x2ba   :  { %v11570_v51 = vpop.f32.mrf.mxu1 }
 0x2bb   :  { %v10189_v50 = vpack.c.bf16 %v1833_v44, %v1832_v42 }
 0x2bd   :  { %10693 = vst [vmem:[#allocation2 + $0x3c0] sm:$0xff] %v10189_v50  }
 0x2be   :  { %v1296_v55 = vpop.f32.mrf.mxu0 }
 0x2bf   :  { %v1297_v58 = vadd.f32 %v11553_v63, %v1296_v55 }
 0x2c1   :  { %1335 = vmatmul.bf16.gmra.mxu0 %v9527_v54  ;;  %v1834_v1 = vmax.f32 %v1297_v58, 0.0 }
 0x2c3   :  { %v3226_v4 = vpop.f32.mrf.mxu1 }
 0x2c4   :  { %v11576_v59 = vadd.f32 %v3226_v4, %v11465_v23  ;;  %v9686_v57 = vld [vmem:[#allocation2 + $0x3c0] sm:$0xff]  ;;  %v9530_v4 = vld [vmem:[%s12963_s0 + $0x168] sm:$0xff] }
 0x2c5   :  { %3419 = vmatmul.bf16.gmra.mxu2 %v9686_v57 }
 0x2c6   :  { %v1298_v62 = vpop.f32.mrf.mxu0 }
 0x2c7   :  { %v1299_v61 = vadd.f32 %v11553_v63, %v1298_v62 }
 0x2c9   :  { %v1835_v2 = vmax.f32 %v1299_v61, 0.0 }
 0x2cb   :  { %v10194_v3 = vpack.c.bf16 %v1835_v2, %v1834_v1  ;;  %v11580_v7 = vpop.f32.mrf.mxu1  ;;  %v9716_v1 = vld [vmem:[%s12964_s2 + $0x178] sm:$0xff] }
 0x2cc   :  { %3600 = vmatpush.bf16.msra.mxu3 %v9716_v1 }
 0x2cd   :  { %10694 = vst [vmem:[#allocation2 + $0x158] sm:$0xff] %v10194_v3  }
 0x2ce   :  { %v1301_v11 = vpop.f32.mrf.mxu0 }
 0x2cf   :  { %v1302_v17 = vadd.f32 %v11553_v63, %v1301_v11 }
 0x2d1   :  { %1340 = vmatmul.bf16.gmra.mxu0 %v9528_v8  ;;  %v1836_v20 = vmax.f32 %v1302_v17, 0.0  ;;  %v9531_v17 = vld [vmem:[%s12963_s0 + $0x170] sm:$0xff] }
 0x2d3   :  { %v3231_v23 = vpop.f32.mrf.mxu1 }
 0x2d4   :  { %v11586_v13 = vadd.f32 %v3231_v23, %v11479_v46  ;;  %v9687_v15 = vld [vmem:[#allocation2 + $0x158] sm:$0xff]  ;;  %v9715_v23 = vld [vmem:[%s12964_s2 + $0x170] sm:$0xff] }
 0x2d5   :  { %3424 = vmatmul.bf16.gmra.mxu2 %v9687_v15  ;;  %3601 = vmatpush.bf16.msra.mxu3 %v9715_v23 }
 0x2d6   :  { %v1303_v14 = vpop.f32.mrf.mxu0 }
 0x2d7   :  { %v1304_v18 = vadd.f32 %v11553_v63, %v1303_v14  ;;  %v9714_v14 = vld [vmem:[%s12964_s2 + $0x168] sm:$0xff] }
 0x2d9   :  { %v1837_v21 = vmax.f32 %v1304_v18, 0.0  ;;  %3602 = vmatpush.bf16.msra.mxu3 %v9714_v14  ;;  %v9533_v14 = vld [vmem:[%s12963_s0 + $0x180] sm:$0xff] }
 0x2db   :  { %v10199_v43 = vpack.c.bf16 %v1837_v21, %v1836_v20  ;;  %v11590_v31 = vpop.f32.mrf.mxu1  ;;  %v9713_v20 = vld [vmem:[%s12964_s2 + $0x160] sm:$0xff] }
 0x2dd   :  { %10695 = vst [vmem:[#allocation2 + $0x3e0] sm:$0xff] %v10199_v43   ;;  %3603 = vmatpush.bf16.msra.mxu3 %v9713_v20 }
 0x2de   :  { %v1306_v33 = vpop.f32.mrf.mxu0 }
 0x2df   :  { %v1307_v41 = vadd.f32 %v11553_v63, %v1306_v33 }
 0x2e1   :  { %1345 = vmatmul.bf16.gmra.mxu0 %v9529_v32  ;;  %v1838_v44 = vmax.f32 %v1307_v41, 0.0 }
 0x2e3   :  { %v3236_v46 = vpop.f32.mrf.mxu1 }
 0x2e4   :  { %v11596_v35 = vadd.f32 %v3236_v46, %v11489_v0  ;;  %v9688_v39 = vld [vmem:[#allocation2 + $0x3e0] sm:$0xff]  ;;  %v9712_v46 = vld [vmem:[%s12964_s2 + $0x158] sm:$0xff] }
 0x2e5   :  { %3429 = vmatmul.bf16.gmra.mxu2 %v9688_v39  ;;  %3604 = vmatpush.bf16.msra.mxu3 %v9712_v46 }
 0x2e6   :  { %v1308_v37 = vpop.f32.mrf.mxu0 }
 0x2e7   :  { %v1309_v42 = vadd.f32 %v11553_v63, %v1308_v37 }
 0x2e9   :  { %v1839_v50 = vmax.f32 %v1309_v42, 0.0 }
 0x2eb   :  { %v10204_v54 = vpack.c.bf16 %v1839_v50, %v1838_v44  ;;  %v11600_v55 = vpop.f32.mrf.mxu1  ;;  %v9711_v44 = vld [vmem:[%s12964_s2 + $0x150] sm:$0xff] }
 0x2ec   :  { %3605 = vmatpush.bf16.msra.mxu3 %v9711_v44 }
 0x2ed   :  { %10696 = vst [vmem:[#allocation2 + $0x218] sm:$0xff] %v10204_v54   ;;  %v9532_v54 = vld [vmem:[%s12963_s0 + $0x178] sm:$0xff] }
 0x2ee   :  { %v1311_v57 = vpop.f32.mrf.mxu0 }
 0x2ef   :  { %v1312_v61 = vadd.f32 %v11553_v63, %v1311_v57 }
 0x2f1   :  { %1350 = vmatmul.bf16.gmra.mxu0 %v9530_v4  ;;  %v1840_v8 = vmax.f32 %v1312_v61, 0.0  ;;  %v9710_v4 = vld [vmem:[%s12964_s2 + $0x148] sm:$0xff] }
 0x2f2   :  { %3606 = vmatpush.bf16.msra.mxu3 %v9710_v4 }
 0x2f3   :  { %v3241_v0 = vpop.f32.mrf.mxu1 }
 0x2f4   :  { %v11606_v58 = vadd.f32 %v3241_v0, %v11505_v19  ;;  %v9689_v62 = vld [vmem:[#allocation2 + $0x218] sm:$0xff]  ;;  %v9709_v0 = vld [vmem:[%s12964_s2 + $0x140] sm:$0xff] }
 0x2f5   :  { %3434 = vmatmul.bf16.gmra.mxu2 %v9689_v62 }
 0x2f6   :  { %v1313_v2 = vpop.f32.mrf.mxu0  ;;  %3607 = vmatpush.bf16.msra.mxu3 %v9709_v0 }
 0x2f7   :  { %v1314_v3 = vadd.f32 %v11553_v63, %v1313_v2 }
 0x2f9   :  { %v1841_v11 = vmax.f32 %v1314_v3, 0.0 }
 0x2fb   :  { %v10209_v19 = vpack.c.bf16 %v1841_v11, %v1840_v8  ;;  %v11616_v15 = vpop.f32.mrf.mxu1 }
 0x2fd   :  { %10697 = vst [vmem:[#allocation2 + $0x3f8] sm:$0xff] %v10209_v19  }
 0x2fe   :  { %v1316_v18 = vpop.f32.mrf.mxu0 }
 0x2ff   :  { %v1317_v33 = vadd.f32 %v11553_v63, %v1316_v18 }
 0x301   :  { %1355 = vmatmul.bf16.gmra.mxu0 %v9531_v17  ;;  %v1842_v37 = vmax.f32 %v1317_v33, 0.0 }
 0x303   :  { %v3246_v21 = vpop.f32.mrf.mxu1 }
 0x304   :  { %v11628_v43 = vadd.f32 %v3246_v21, %v11527_v48  ;;  %v9690_v32 = vld [vmem:[#allocation2 + $0x3f8] sm:$0xff] }
 0x305   :  { %3439 = vmatmul.bf16.gmra.mxu2 %v9690_v32 }
 0x306   :  { %v1318_v39 = vpop.f32.mrf.mxu0 }
 0x307   :  { %v1319_v41 = vadd.f32 %v11553_v63, %v1318_v39 }
 0x309   :  { %v1843_v42 = vmax.f32 %v1319_v41, 0.0 }
 0x30b   :  { %v10214_v48 = vpack.c.bf16 %v1843_v42, %v1842_v37  ;;  %v11638_v50 = vpop.f32.mrf.mxu1  ;;  %v9534_v42 = vld [vmem:[%s12963_s0 + $0x188] sm:$0xff] }
 0x30c   :  { %12975 = vst [vmem:[#allocation11_spill] sm:$0xff] %v11638_v50 }
 0x30d   :  { %10698 = vst [vmem:[#allocation2 + $0x8] sm:$0xff] %v10214_v48   ;;  %v11667_v48 = vpop.f32.mrf.mxu2 }
 0x30e   :  { %v1321_v57 = vpop.f32.mrf.mxu0  ;;  %12977 = vst [vmem:[#allocation13_spill] sm:$0xff] %v11667_v48 }
 0x30f   :  { %v1322_v2 = vadd.f32 %v11553_v63, %v1321_v57 }
 0x311   :  { %1360 = vmatmul.bf16.gmra.mxu0 %v9532_v54  ;;  %v1844_v11 = vmax.f32 %v1322_v2, 0.0 }
 0x313   :  { %v3251_v62 = vpop.f32.mrf.mxu1 }
 0x314   :  { %v11650_v61 = vadd.f32 %v3251_v62, %v11543_v6  ;;  %v9691_v1 = vld [vmem:[#allocation2 + $0x8] sm:$0xff] }
 0x315   :  { %3444 = vmatmul.bf16.gmra.mxu2 %v9691_v1 }
 0x316   :  { %v1323_v3 = vpop.f32.mrf.mxu0 }
 0x317   :  { %v1324_v8 = vadd.f32 %v11553_v63, %v1323_v3 }
 0x319   :  { %v1845_v23 = vmax.f32 %v1324_v8, 0.0  ;;  %v9535_v8 = vld [vmem:[%s12963_s0 + $0x190] sm:$0xff] }
 0x31b   :  { %v10219_v19 = vpack.c.bf16 %v1845_v23, %v1844_v11  ;;  %v11654_v17 = vpop.f32.mrf.mxu1 }
 0x31c   :  { %12976 = vst [vmem:[#allocation12_spill] sm:$0xff] %v11654_v17 }
 0x31d   :  { %10699 = vst [vmem:[#allocation2 + $0x128] sm:$0xff] %v10219_v19  }
 0x31e   :  { %v1326_v18 = vpop.f32.mrf.mxu0 }
 0x31f   :  { %v1327_v32 = vadd.f32 %v11553_v63, %v1326_v18 }
 0x321   :  { %1365 = vmatmul.bf16.gmra.mxu0 %v9533_v14  ;;  %v1846_v39 = vmax.f32 %v1327_v32, 0.0 }
 0x323   :  { %v3256_v6 = vpop.f32.mrf.mxu1 }
 0x324   :  { %v11660_v20 = vadd.f32 %v3256_v6, %v11558_v26  ;;  %v9692_v21 = vld [vmem:[#allocation2 + $0x128] sm:$0xff] }
 0x325   :  { %3449 = vmatmul.bf16.gmra.mxu2 %v9692_v21 }
 0x326   :  { %v1328_v33 = vpop.f32.mrf.mxu0 }
 0x327   :  { %v1329_v46 = vadd.f32 %v11553_v63, %v1328_v33 }
 0x329   :  { %v1847_v41 = vmax.f32 %v1329_v46, 0.0 }
 0x32b   :  { %v10224_v37 = vpack.c.bf16 %v1847_v41, %v1846_v39  ;;  %v9536_v39 = vld [vmem:[%s12963_s0 + $0x198] sm:$0xff] }
 0x32d   :  { %10700 = vst [vmem:[#allocation2 + $0x2a0] sm:$0xff] %v10224_v37  }
 0x32e   :  { %v1331_v44 = vpop.f32.mrf.mxu0 }
 0x32f   :  { %v1332_v54 = vadd.f32 %v11553_v63, %v1331_v44 }
 0x331   :  { %1370 = vmatmul.bf16.gmra.mxu0 %v9534_v42  ;;  %v1848_v0 = vmax.f32 %v1332_v54, 0.0 }
 0x334   :  { %v9701_v26 = vld [vmem:[#allocation2 + $0x2a0] sm:$0xff] }
 0x335   :  { %3608 = vmatmul.bf16.vlgmr.msra.gmra.mxu3 %v9701_v26 }
 0x336   :  { %v1333_v4 = vpop.f32.mrf.mxu0 }
 0x337   :  { %v1334_v57 = vadd.f32 %v11553_v63, %v1333_v4 }
 0x338   :  { %v3415_v1 = vpop.f32.mrf.mxu2 }
 0x339   :  { %v1849_v62 = vmax.f32 %v1334_v57, 0.0  ;;  %v11672_v2 = vadd.f32 %v3415_v1, %v11566_v36  ;;  %v9537_v1 = vld [vmem:[%s12963_s0 + $0x1a0] sm:$0xff] }
 0x33b   :  { %v10229_v3 = vpack.c.bf16 %v1849_v62, %v1848_v0 }
 0x33d   :  { %10701 = vst [vmem:[#allocation2 + $0x3f0] sm:$0xff] %v10229_v3  }
 0x33e   :  { %v1336_v11 = vpop.f32.mrf.mxu0 }
 0x33f   :  { %v1337_v14 = vadd.f32 %v11553_v63, %v1336_v11 }
 0x340   :  { %v11677_v23 = vpop.f32.mrf.mxu2 }
 0x341   :  { %1375 = vmatmul.bf16.gmra.mxu0 %v9535_v8  ;;  %v1850_v21 = vmax.f32 %v1337_v14, 0.0 }
 0x344   :  { %v9702_v19 = vld [vmem:[#allocation2 + $0x3f0] sm:$0xff] }
 0x345   :  { %3613 = vmatmul.bf16.gmra.mxu3 %v9702_v19 }
 0x346   :  { %v1338_v18 = vpop.f32.mrf.mxu0 }
 0x347   :  { %v1339_v6 = vadd.f32 %v11553_v63, %v1338_v18 }
 0x348   :  { %v3420_v32 = vpop.f32.mrf.mxu2 }
 0x349   :  { %v1851_v36 = vmax.f32 %v1339_v6, 0.0  ;;  %v11682_v33 = vadd.f32 %v3420_v32, %v11576_v59 }
 0x34b   :  { %v10234_v46 = vpack.c.bf16 %v1851_v36, %v1850_v21 }
 0x34d   :  { %10702 = vst [vmem:[#allocation2 + $0xa0] sm:$0xff] %v10234_v46   ;;  %v9538_v46 = vld [vmem:[%s12963_s0 + $0x1a8] sm:$0xff] }
 0x34e   :  { %v1341_v41 = vpop.f32.mrf.mxu0 }
 0x34f   :  { %v1342_v44 = vadd.f32 %v11553_v63, %v1341_v41 }
 0x350   :  { %v11687_v37 = vpop.f32.mrf.mxu2 }
 0x351   :  { %1380 = vmatmul.bf16.gmra.mxu0 %v9536_v39  ;;  %v1852_v4 = vmax.f32 %v1342_v44, 0.0 }
 0x354   :  { %v9703_v42 = vld [vmem:[#allocation2 + $0xa0] sm:$0xff] }
 0x355   :  { %3618 = vmatmul.bf16.gmra.mxu3 %v9703_v42 }
 0x356   :  { %v1343_v26 = vpop.f32.mrf.mxu0 }
 0x357   :  { %v1344_v54 = vadd.f32 %v11553_v63, %v1343_v26  ;;  %v9732_v26 = vld [vmem:[%s12964_s2 + $0x1b8] sm:$0xff] }
 0x358   :  { %v3425_v57 = vpop.f32.mrf.mxu2  ;;  %3794 = vmatpush.bf16.msrb.mxu1 %v9732_v26  ;;  %v9727_v26 = vld [vmem:[%s12964_s2 + $0x190] sm:$0xff] }
 0x359   :  { %v1853_v59 = vmax.f32 %v1344_v54, 0.0  ;;  %v11692_v0 = vadd.f32 %v3425_v57, %v11586_v13 }
 0x35b   :  { %v10239_v62 = vpack.c.bf16 %v1853_v59, %v1852_v4 }
 0x35d   :  { %10703 = vst [vmem:[#allocation2 + $0x2c0] sm:$0xff] %v10239_v62   ;;  %v9731_v62 = vld [vmem:[%s12964_s2 + $0x1b0] sm:$0xff] }
 0x35e   :  { %v1346_v3 = vpop.f32.mrf.mxu0  ;;  %3795 = vmatpush.bf16.msrb.mxu1 %v9731_v62 }
 0x35f   :  { %v1347_v19 = vadd.f32 %v11553_v63, %v1346_v3 }
 0x360   :  { %v11697_v8 = vpop.f32.mrf.mxu2 }
 0x361   :  { %1385 = vmatmul.bf16.gmra.mxu0 %v9537_v1  ;;  %v1854_v6 = vmax.f32 %v1347_v19, 0.0  ;;  %v9730_v19 = vld [vmem:[%s12964_s2 + $0x1a8] sm:$0xff] }
 0x362   :  { %3796 = vmatpush.bf16.msrb.mxu1 %v9730_v19 }
 0x364   :  { %v9704_v11 = vld [vmem:[#allocation2 + $0x2c0] sm:$0xff] }
 0x365   :  { %3623 = vmatmul.bf16.gmra.mxu3 %v9704_v11  ;;  %v9539_v11 = vld [vmem:[%s12963_s0 + $0x1b0] sm:$0xff] }
 0x366   :  { %v1348_v14 = vpop.f32.mrf.mxu0 }
 0x367   :  { %v1349_v18 = vadd.f32 %v11553_v63, %v1348_v14 }
 0x368   :  { %v3430_v21 = vpop.f32.mrf.mxu2 }
 0x369   :  { %v1855_v13 = vmax.f32 %v1349_v18, 0.0  ;;  %v11702_v36 = vadd.f32 %v3430_v21, %v11596_v35  ;;  %v9728_v21 = vld [vmem:[%s12964_s2 + $0x198] sm:$0xff] }
 0x36b   :  { %v10244_v32 = vpack.c.bf16 %v1855_v13, %v1854_v6 }
 0x36d   :  { %10704 = vst [vmem:[#allocation2 + $0xb0] sm:$0xff] %v10244_v32  }
 0x36e   :  { %v1351_v39 = vpop.f32.mrf.mxu0 }
 0x36f   :  { %v1352_v44 = vadd.f32 %v11553_v63, %v1351_v39 }
 0x370   :  { %v11707_v41 = vpop.f32.mrf.mxu2 }
 0x371   :  { %1390 = vmatmul.bf16.gmra.mxu0 %v9538_v46  ;;  %v1856_v4 = vmax.f32 %v1352_v44, 0.0 }
 0x374   :  { %v9705_v42 = vld [vmem:[#allocation2 + $0xb0] sm:$0xff] }
 0x375   :  { %3628 = vmatmul.bf16.gmra.mxu3 %v9705_v42 }
 0x376   :  { %v1353_v54 = vpop.f32.mrf.mxu0 }
 0x377   :  { %v1354_v35 = vadd.f32 %v11553_v63, %v1353_v54 }
 0x378   :  { %v3435_v57 = vpop.f32.mrf.mxu2 }
 0x379   :  { %v1857_v59 = vmax.f32 %v1354_v35, 0.0  ;;  %v11718_v1 = vadd.f32 %v3435_v57, %v11606_v58  ;;  %v9729_v58 = vld [vmem:[%s12964_s2 + $0x1a0] sm:$0xff] }
 0x37a   :  { %3797 = vmatpush.bf16.msrb.mxu1 %v9729_v58 }
 0x37b   :  { %v10249_v3 = vpack.c.bf16 %v1857_v59, %v1856_v4  ;;  %v9540_v4 = vld [vmem:[%s12963_s0 + $0x1b8] sm:$0xff]  ;;  %v9726_v59 = vld [vmem:[%s12964_s2 + $0x188] sm:$0xff] }
 0x37d   :  { %10705 = vst [vmem:[#allocation2 + $0x1e0] sm:$0xff] %v10249_v3  }
 0x37e   :  { %v1356_v14 = vpop.f32.mrf.mxu0  ;;  %3798 = vmatpush.bf16.msrb.mxu1 %v9728_v21 }
 0x37f   :  { %v1357_v13 = vadd.f32 %v11553_v63, %v1356_v14 }
 0x380   :  { %v11726_v18 = vpop.f32.mrf.mxu2 }
 0x381   :  { %1395 = vmatmul.bf16.gmra.mxu0 %v9539_v11  ;;  %v1858_v39 = vmax.f32 %v1357_v13, 0.0 }
 0x382   :  { %3799 = vmatpush.bf16.msrb.mxu1 %v9727_v26 }
 0x384   :  { %v9706_v6 = vld [vmem:[#allocation2 + $0x1e0] sm:$0xff] }
 0x385   :  { %3633 = vmatmul.bf16.gmra.mxu3 %v9706_v6 }
 0x386   :  { %v1358_v32 = vpop.f32.mrf.mxu0  ;;  %3800 = vmatpush.bf16.msrb.mxu1 %v9726_v59 }
 0x387   :  { %v1359_v46 = vadd.f32 %v11553_v63, %v1358_v32 }
 0x388   :  { %v3440_v44 = vpop.f32.mrf.mxu2 }
 0x389   :  { %v1859_v42 = vmax.f32 %v1359_v46, 0.0  ;;  %v11740_v54 = vadd.f32 %v3440_v44, %v11628_v43  ;;  %v9725_v43 = vld [vmem:[%s12964_s2 + $0x180] sm:$0xff] }
 0x38a   :  { %3801 = vmatpush.bf16.msrb.mxu1 %v9725_v43  ;;  %v9541_v46 = vld [vmem:[%s12963_s0 + $0x1c0] sm:$0xff] }
 0x38b   :  { %v10254_v35 = vpack.c.bf16 %v1859_v42, %v1858_v39 }
 0x38d   :  { %10706 = vst [vmem:[#allocation2 + $0x1f0] sm:$0xff] %v10254_v35  }
 0x38e   :  { %v1361_v57 = vpop.f32.mrf.mxu0 }
 0x38f   :  { %v1362_v11 = vadd.f32 %v11553_v63, %v1361_v57 }
 0x390   :  { %v11748_v62 = vpop.f32.mrf.mxu2 }
 0x391   :  { %1400 = vmatmul.bf16.gmra.mxu0 %v9540_v4  ;;  %12978 = vst [vmem:[#allocation14_spill] sm:$0xff] %v11748_v62  ;;  %v1860_v58 = vmax.f32 %v1362_v11, 0.0  ;;  %v9542_v11 = vld [vmem:[%s12963_s0 + $0x1c8] sm:$0xff] }
 0x394   :  { %v9707_v3 = vld [vmem:[#allocation2 + $0x1f0] sm:$0xff] }
 0x395   :  { %3638 = vmatmul.bf16.gmra.mxu3 %v9707_v3 }
 0x396   :  { %v1363_v19 = vpop.f32.mrf.mxu0 }
 0x397   :  { %v1364_v14 = vadd.f32 %v11553_v63, %v1363_v19 }
 0x398   :  { %v3445_v13 = vpop.f32.mrf.mxu2 }
 0x399   :  { %v1861_v6 = vmax.f32 %v1364_v14, 0.0  ;;  %v11756_v21 = vadd.f32 %v3445_v13, %v11650_v61  ;;  %v11771_v14 = vpop.f32.mrf.mxu3 }
 0x39a   :  { %12980 = vst [vmem:[#allocation16_spill] sm:$0xff] %v11771_v14  ;;  %v9549_v14 = vld [vmem:[%s12963_s0 + $0x200] sm:$0xff] }
 0x39b   :  { %v10259_v32 = vpack.c.bf16 %v1861_v6, %v1860_v58 }
 0x39d   :  { %10707 = vst [vmem:[#allocation2 + $0x10] sm:$0xff] %v10259_v32  }
 0x39e   :  { %v1366_v39 = vpop.f32.mrf.mxu0 }
 0x39f   :  { %v1367_v26 = vadd.f32 %v11553_v63, %v1366_v39 }
 0x3a0   :  { %v11761_v42 = vpop.f32.mrf.mxu2 }
 0x3a1   :  { %1405 = vmatmul.bf16.gmra.mxu0 %v9541_v46  ;;  %12979 = vst [vmem:[#allocation15_spill] sm:$0xff] %v11761_v42  ;;  %v1862_v59 = vmax.f32 %v1367_v26, 0.0 }
 0x3a4   :  { %v9708_v44 = vld [vmem:[#allocation2 + $0x10] sm:$0xff] }
 0x3a5   :  { %3643 = vmatmul.bf16.gmra.mxu3 %v9708_v44 }
 0x3a6   :  { %v1368_v35 = vpop.f32.mrf.mxu0 }
 0x3a7   :  { %v1369_v4 = vadd.f32 %v11553_v63, %v1368_v35  ;;  %v9543_v35 = vld [vmem:[%s12963_s0 + $0x1d0] sm:$0xff] }
 0x3a8   :  { %v3450_v57 = vpop.f32.mrf.mxu2 }
 0x3a9   :  { %v1863_v61 = vmax.f32 %v1369_v4, 0.0  ;;  %v11766_v43 = vadd.f32 %v3450_v57, %v11660_v20 }
 0x3ab   :  { %v10264_v3 = vpack.c.bf16 %v1863_v61, %v1862_v59 }
 0x3ad   :  { %10708 = vst [vmem:[#allocation2 + $0x230] sm:$0xff] %v10264_v3  }
 0x3ae   :  { %v1371_v19 = vpop.f32.mrf.mxu0 }
 0x3af   :  { %v1372_v6 = vadd.f32 %v11553_v63, %v1371_v19 }
 0x3b1   :  { %1410 = vmatmul.bf16.gmra.mxu0 %v9542_v11  ;;  %v1864_v46 = vmax.f32 %v1372_v6, 0.0 }
 0x3b4   :  { %v9717_v58 = vld [vmem:[#allocation2 + $0x230] sm:$0xff] }
 0x3b5   :  { %3802 = vmatmul.bf16.vlgmr.msrb.gmra.mxu1 %v9717_v58 }
 0x3b6   :  { %v1373_v13 = vpop.f32.mrf.mxu0 }
 0x3b7   :  { %v1374_v32 = vadd.f32 %v11553_v63, %v1373_v13 }
 0x3b8   :  { %v3609_v39 = vpop.f32.mrf.mxu3 }
 0x3b9   :  { %v1865_v20 = vmax.f32 %v1374_v32, 0.0  ;;  %v11776_v44 = vadd.f32 %v3609_v39, %v11672_v2  ;;  %v9544_v32 = vld [vmem:[%s12963_s0 + $0x1d8] sm:$0xff] }
 0x3bb   :  { %v10269_v26 = vpack.c.bf16 %v1865_v20, %v1864_v46 }
 0x3bd   :  { %10709 = vst [vmem:[#allocation2 + $0x240] sm:$0xff] %v10269_v26  }
 0x3be   :  { %v1376_v4 = vpop.f32.mrf.mxu0 }
 0x3bf   :  { %v1377_v57 = vadd.f32 %v11553_v63, %v1376_v4 }
 0x3c0   :  { %v11781_v59 = vpop.f32.mrf.mxu3 }
 0x3c1   :  { %1415 = vmatmul.bf16.gmra.mxu0 %v9543_v35  ;;  %v1866_v19 = vmax.f32 %v1377_v57, 0.0 }
 0x3c4   :  { %v9718_v61 = vld [vmem:[#allocation2 + $0x240] sm:$0xff] }
 0x3c5   :  { %3807 = vmatmul.bf16.gmra.mxu1 %v9718_v61 }
 0x3c6   :  { %v1378_v3 = vpop.f32.mrf.mxu0 }
 0x3c7   :  { %v1379_v11 = vadd.f32 %v11553_v63, %v1378_v3 }
 0x3c8   :  { %v3614_v58 = vpop.f32.mrf.mxu3 }
 0x3c9   :  { %v1867_v2 = vmax.f32 %v1379_v11, 0.0  ;;  %v11786_v6 = vadd.f32 %v3614_v58, %v11682_v33 }
 0x3cb   :  { %v10274_v13 = vpack.c.bf16 %v1867_v2, %v1866_v19  ;;  %v9545_v19 = vld [vmem:[%s12963_s0 + $0x1e0] sm:$0xff] }
 0x3cd   :  { %10710 = vst [vmem:[#allocation2 + $0x90] sm:$0xff] %v10274_v13  }
 0x3ce   :  { %v1381_v46 = vpop.f32.mrf.mxu0 }
 0x3cf   :  { %v1382_v26 = vadd.f32 %v11553_v63, %v1381_v46 }
 0x3d0   :  { %v11791_v20 = vpop.f32.mrf.mxu3 }
 0x3d1   :  { %1420 = vmatmul.bf16.gmra.mxu0 %v9544_v32  ;;  %v1868_v61 = vmax.f32 %v1382_v26, 0.0 }
 0x3d4   :  { %v9719_v39 = vld [vmem:[#allocation2 + $0x90] sm:$0xff] }
 0x3d5   :  { %3812 = vmatmul.bf16.gmra.mxu1 %v9719_v39 }
 0x3d6   :  { %v1383_v35 = vpop.f32.mrf.mxu0 }
 0x3d7   :  { %v1384_v4 = vadd.f32 %v11553_v63, %v1383_v35 }
 0x3d8   :  { %v3619_v57 = vpop.f32.mrf.mxu3 }
 0x3d9   :  { %v1869_v33 = vmax.f32 %v1384_v4, 0.0  ;;  %v11796_v3 = vadd.f32 %v3619_v57, %v11692_v0 }
 0x3db   :  { %v10279_v11 = vpack.c.bf16 %v1869_v33, %v1868_v61  ;;  %v9546_v33 = vld [vmem:[%s12963_s0 + $0x1e8] sm:$0xff] }
 0x3dd   :  { %10711 = vst [vmem:[#allocation2 + $0x3a0] sm:$0xff] %v10279_v11  }
 0x3de   :  { %v1386_v2 = vpop.f32.mrf.mxu0 }
 0x3df   :  { %v1387_v32 = vadd.f32 %v11553_v63, %v1386_v2 }
 0x3e0   :  { %v11801_v58 = vpop.f32.mrf.mxu3 }
 0x3e1   :  { %1425 = vmatmul.bf16.gmra.mxu0 %v9545_v19  ;;  %v1870_v26 = vmax.f32 %v1387_v32, 0.0 }
 0x3e4   :  { %v9720_v13 = vld [vmem:[#allocation2 + $0x3a0] sm:$0xff] }
 0x3e5   :  { %3817 = vmatmul.bf16.gmra.mxu1 %v9720_v13  ;;  %v9748_v13 = vld [vmem:[%s12964_s2 + $0x1f8] sm:$0xff] }
 0x3e6   :  { %v1388_v46 = vpop.f32.mrf.mxu0  ;;  %3988 = vmatpush.bf16.msrb.mxu2 %v9748_v13 }
 0x3e7   :  { %v1389_v39 = vadd.f32 %v11553_v63, %v1388_v46 }
 0x3e8   :  { %v3624_v35 = vpop.f32.mrf.mxu3 }
 0x3e9   :  { %v1871_v0 = vmax.f32 %v1389_v39, 0.0  ;;  %v11806_v4 = vadd.f32 %v3624_v35, %v11702_v36 }
 0x3eb   :  { %v10284_v61 = vpack.c.bf16 %v1871_v0, %v1870_v26  ;;  %v9747_v0 = vld [vmem:[%s12964_s2 + $0x1f0] sm:$0xff] }
 0x3ec   :  { %3989 = vmatpush.bf16.msrb.mxu2 %v9747_v0 }
 0x3ed   :  { %10712 = vst [vmem:[#allocation2 + $0x208] sm:$0xff] %v10284_v61  }
 0x3ee   :  { %v1391_v57 = vpop.f32.mrf.mxu0 }
 0x3ef   :  { %v1392_v2 = vadd.f32 %v11553_v63, %v1391_v57  ;;  %v9746_v57 = vld [vmem:[%s12964_s2 + $0x1e8] sm:$0xff] }
 0x3f0   :  { %v11811_v11 = vpop.f32.mrf.mxu3  ;;  %3990 = vmatpush.bf16.msrb.mxu2 %v9746_v57 }
 0x3f1   :  { %1430 = vmatmul.bf16.gmra.mxu0 %v9546_v33  ;;  %v1872_v46 = vmax.f32 %v1392_v2, 0.0  ;;  %v9547_v33 = vld [vmem:[%s12963_s0 + $0x1f0] sm:$0xff] }
 0x3f4   :  { %v9721_v19 = vld [vmem:[#allocation2 + $0x208] sm:$0xff] }
 0x3f5   :  { %3822 = vmatmul.bf16.gmra.mxu1 %v9721_v19 }
 0x3f6   :  { %v1393_v32 = vpop.f32.mrf.mxu0 }
 0x3f7   :  { %v1394_v36 = vadd.f32 %v11553_v63, %v1393_v32 }
 0x3f8   :  { %v3629_v26 = vpop.f32.mrf.mxu3 }
 0x3f9   :  { %v1873_v39 = vmax.f32 %v1394_v36, 0.0  ;;  %v11822_v35 = vadd.f32 %v3629_v26, %v11718_v1  ;;  %v9745_v1 = vld [vmem:[%s12964_s2 + $0x1e0] sm:$0xff]  ;;  %v9744_v36 = vld [vmem:[%s12964_s2 + $0x1d8] sm:$0xff] }
 0x3fa   :  { %3991 = vmatpush.bf16.msrb.mxu2 %v9745_v1  ;;  %v9548_v1 = vld [vmem:[%s12963_s0 + $0x1f8] sm:$0xff] }
 0x3fb   :  { %v10289_v61 = vpack.c.bf16 %v1873_v39, %v1872_v46 }
 0x3fd   :  { %10713 = vst [vmem:[#allocation2 + $0xd0] sm:$0xff] %v10289_v61  }
 0x3fe   :  { %v1396_v19 = vpop.f32.mrf.mxu0  ;;  %3992 = vmatpush.bf16.msrb.mxu2 %v9744_v36 }
 0x3ff   :  { %v1397_v32 = vadd.f32 %v11553_v63, %v1396_v19 }
 0x400   :  { %v11830_v2 = vpop.f32.mrf.mxu3 }
 0x401   :  { %1435 = vmatmul.bf16.gmra.mxu0 %v9547_v33  ;;  %v1874_v26 = vmax.f32 %v1397_v32, 0.0  ;;  %v9743_v33 = vld [vmem:[%s12964_s2 + $0x1d0] sm:$0xff] }
 0x402   :  { %3993 = vmatpush.bf16.msrb.mxu2 %v9743_v33 }
 0x404   :  { %v9722_v13 = vld [vmem:[#allocation2 + $0xd0] sm:$0xff] }
 0x405   :  { %3827 = vmatmul.bf16.gmra.mxu1 %v9722_v13  ;;  %v9742_v13 = vld [vmem:[%s12964_s2 + $0x1c8] sm:$0xff] }
 0x406   :  { %v1398_v46 = vpop.f32.mrf.mxu0  ;;  %3994 = vmatpush.bf16.msrb.mxu2 %v9742_v13 }
 0x407   :  { %v1399_v39 = vadd.f32 %v11553_v63, %v1398_v46 }
 0x408   :  { %v3634_v61 = vpop.f32.mrf.mxu3 }
 0x409   :  { %v1875_v0 = vmax.f32 %v1399_v39, 0.0  ;;  %v11844_v57 = vadd.f32 %v3634_v61, %v11740_v54  ;;  %v9741_v54 = vld [vmem:[%s12964_s2 + $0x1c0] sm:$0xff] }
 0x40a   :  { %3995 = vmatpush.bf16.msrb.mxu2 %v9741_v54 }
 0x40b   :  { %v10294_v19 = vpack.c.bf16 %v1875_v0, %v1874_v26 }
 0x40d   :  { %10714 = vst [vmem:[#allocation2 + $0x88] sm:$0xff] %v10294_v19  }
 0x40e   :  { %v1401_v32 = vpop.f32.mrf.mxu0 }
 0x40f   :  { %v1402_v39 = vadd.f32 %v11553_v63, %v1401_v32 }
 0x410   :  { %v11852_v36 = vpop.f32.mrf.mxu3 }
 0x411   :  { %1440 = vmatmul.bf16.gmra.mxu0 %v9548_v1  ;;  %12981 = vst [vmem:[#allocation17_spill] sm:$0xff] %v11852_v36  ;;  %v1876_v61 = vmax.f32 %v1402_v39, 0.0 }
 0x414   :  { %v9723_v46 = vld [vmem:[#allocation2 + $0x88] sm:$0xff] }
 0x415   :  { %3832 = vmatmul.bf16.gmra.mxu1 %v9723_v46 }
 0x416   :  { %v1403_v26 = vpop.f32.mrf.mxu0 }
 0x417   :  { %v1404_v0 = vadd.f32 %v11553_v63, %v1403_v26 }
 0x418   :  { %v3639_v19 = vpop.f32.mrf.mxu3 }
 0x419   :  { %v1877_v33 = vmax.f32 %v1404_v0, 0.0  ;;  %v11860_v13 = vadd.f32 %v3639_v19, %v11756_v21 }
 0x41b   :  { %v10299_v1 = vpack.c.bf16 %v1877_v33, %v1876_v61  ;;  %v11872_v33 = vpop.f32.mrf.mxu1 }
 0x41c   :  { %12983 = vst [vmem:[#allocation19_spill] sm:$0xff] %v11872_v33 }
 0x41d   :  { %10715 = vst [vmem:[#allocation2 + $0x2f0] sm:$0xff] %v10299_v1  }
 0x41e   :  { %v1406_v54 = vpop.f32.mrf.mxu0 }
 0x41f   :  { %v1407_v46 = vadd.f32 %v11553_v63, %v1406_v54 }
 0x420   :  { %v11865_v48 = vpop.f32.mrf.mxu3 }
 0x421   :  { %1445 = vmatmul.bf16.gmra.mxu0 %v9549_v14  ;;  %12982 = vst [vmem:[#allocation18_spill] sm:$0xff] %v11865_v48  ;;  %v1878_v0 = vmax.f32 %v1407_v46, 0.0  ;;  %v9550_v14 = vld [vmem:[%s12963_s0 + $0x208] sm:$0xff] }
 0x424   :  { %v9724_v32 = vld [vmem:[#allocation2 + $0x2f0] sm:$0xff] }
 0x425   :  { %3837 = vmatmul.bf16.gmra.mxu1 %v9724_v32 }
 0x426   :  { %v1408_v26 = vpop.f32.mrf.mxu0 }
 0x427   :  { %v1409_v39 = vadd.f32 %v11553_v63, %v1408_v26 }
 0x428   :  { %v3644_v19 = vpop.f32.mrf.mxu3 }
 0x429   :  { %v1879_v21 = vmax.f32 %v1409_v39, 0.0  ;;  %v11870_v61 = vadd.f32 %v3644_v19, %v11766_v43 }
 0x42b   :  { %v10304_v1 = vpack.c.bf16 %v1879_v21, %v1878_v0 }
 0x42d   :  { %10716 = vst [vmem:[#allocation2 + $0x358] sm:$0xff] %v10304_v1  }
 0x42e   :  { %v1411_v28 = vpop.f32.mrf.mxu0 }
 0x42f   :  { %v1412_v26 = vadd.f32 %v11553_v63, %v1411_v28 }
 0x431   :  { %1450 = vmatmul.bf16.gmra.mxu0 %v9550_v14  ;;  %v1880_v19 = vmax.f32 %v1412_v26, 0.0  ;;  %v9551_v14 = vld [vmem:[%s12963_s0 + $0x210] sm:$0xff] }
 0x432   :  { %v3803_v54 = vpop.f32.mrf.mxu1 }
 0x433   :  { %v11878_v32 = vadd.f32 %v3803_v54, %v11776_v44 }
 0x434   :  { %v9733_v46 = vld [vmem:[#allocation2 + $0x358] sm:$0xff] }
 0x435   :  { %3996 = vmatmul.bf16.vlgmr.msrb.gmra.mxu2 %v9733_v46 }
 0x436   :  { %v1413_v39 = vpop.f32.mrf.mxu0 }
 0x437   :  { %v1414_v43 = vadd.f32 %v11553_v63, %v1413_v39 }
 0x439   :  { %v1881_v0 = vmax.f32 %v1414_v43, 0.0 }
 0x43a   :  { %v11882_v1 = vpop.f32.mrf.mxu1 }
 0x43b   :  { %v10309_v21 = vpack.c.bf16 %v1881_v0, %v1880_v19 }
 0x43d   :  { %10717 = vst [vmem:[#allocation2 + $0x268] sm:$0xff] %v10309_v21  }
 0x43e   :  { %v1416_v33 = vpop.f32.mrf.mxu0 }
 0x43f   :  { %v1417_v46 = vadd.f32 %v11553_v63, %v1416_v33 }
 0x441   :  { %1455 = vmatmul.bf16.gmra.mxu0 %v9551_v14  ;;  %v1882_v43 = vmax.f32 %v1417_v46, 0.0  ;;  %v9552_v14 = vld [vmem:[%s12963_s0 + $0x218] sm:$0xff] }
 0x442   :  { %v3808_v44 = vpop.f32.mrf.mxu1 }
 0x443   :  { %v11888_v54 = vadd.f32 %v3808_v44, %v11786_v6 }
 0x444   :  { %v9734_v28 = vld [vmem:[#allocation2 + $0x268] sm:$0xff] }
 0x445   :  { %4001 = vmatmul.bf16.gmra.mxu2 %v9734_v28 }
 0x446   :  { %v1418_v39 = vpop.f32.mrf.mxu0 }
 0x447   :  { %v1419_v26 = vadd.f32 %v11553_v63, %v1418_v39 }
 0x449   :  { %v1883_v19 = vmax.f32 %v1419_v26, 0.0 }
 0x44a   :  { %v11892_v21 = vpop.f32.mrf.mxu1 }
 0x44b   :  { %v10314_v0 = vpack.c.bf16 %v1883_v19, %v1882_v43 }
 0x44d   :  { %10718 = vst [vmem:[#allocation2 + $0x350] sm:$0xff] %v10314_v0  }
 0x44e   :  { %v1421_v48 = vpop.f32.mrf.mxu0 }
 0x44f   :  { %v1422_v28 = vadd.f32 %v11553_v63, %v1421_v48 }
 0x451   :  { %1460 = vmatmul.bf16.gmra.mxu0 %v9552_v14  ;;  %v1884_v26 = vmax.f32 %v1422_v28, 0.0  ;;  %v9553_v14 = vld [vmem:[%s12963_s0 + $0x220] sm:$0xff] }
 0x452   :  { %v3813_v6 = vpop.f32.mrf.mxu1 }
 0x453   :  { %v11898_v44 = vadd.f32 %v3813_v6, %v11796_v3 }
 0x454   :  { %v9735_v33 = vld [vmem:[#allocation2 + $0x350] sm:$0xff] }
 0x455   :  { %4006 = vmatmul.bf16.gmra.mxu2 %v9735_v33 }
 0x456   :  { %v1423_v39 = vpop.f32.mrf.mxu0 }
 0x457   :  { %v1424_v46 = vadd.f32 %v11553_v63, %v1423_v39 }
 0x459   :  { %v1885_v43 = vmax.f32 %v1424_v46, 0.0 }
 0x45a   :  { %v11902_v0 = vpop.f32.mrf.mxu1 }
 0x45b   :  { %v10319_v19 = vpack.c.bf16 %v1885_v43, %v1884_v26 }
 0x45d   :  { %10719 = vst [vmem:[#allocation2 + $0x188] sm:$0xff] %v10319_v19  }
 0x45e   :  { %v1426_v42 = vpop.f32.mrf.mxu0 }
 0x45f   :  { %v1427_v33 = vadd.f32 %v11553_v63, %v1426_v42 }
 0x461   :  { %1465 = vmatmul.bf16.gmra.mxu0 %v9553_v14  ;;  %v1886_v46 = vmax.f32 %v1427_v33, 0.0  ;;  %v9554_v14 = vld [vmem:[%s12963_s0 + $0x228] sm:$0xff]  ;;  %v9764_v33 = vld [vmem:[%s12964_s2 + $0x238] sm:$0xff] }
 0x462   :  { %v3818_v3 = vpop.f32.mrf.mxu1  ;;  %4182 = vmatpush.bf16.msrb.mxu3 %v9764_v33 }
 0x463   :  { %v11908_v6 = vadd.f32 %v3818_v3, %v11806_v4 }
 0x464   :  { %v9736_v48 = vld [vmem:[#allocation2 + $0x188] sm:$0xff] }
 0x465   :  { %4011 = vmatmul.bf16.gmra.mxu2 %v9736_v48 }
 0x466   :  { %v1428_v39 = vpop.f32.mrf.mxu0 }
 0x467   :  { %v1429_v28 = vadd.f32 %v11553_v63, %v1428_v39  ;;  %v9796_v39 = vld [vmem:[%s12964_s2 + $0x2b8] sm:$0xff] }
 0x468   :  { %4570 = vmatpush.bf16.msra.mxu2 %v9796_v39  ;;  %v9761_v39 = vld [vmem:[%s12964_s2 + $0x220] sm:$0xff] }
 0x469   :  { %v1887_v26 = vmax.f32 %v1429_v28, 0.0 }
 0x46a   :  { %v11912_v19 = vpop.f32.mrf.mxu1 }
 0x46b   :  { %v10324_v43 = vpack.c.bf16 %v1887_v26, %v1886_v46 }
 0x46d   :  { %10720 = vst [vmem:[#allocation2 + $0x1d8] sm:$0xff] %v10324_v43   ;;  %v9795_v43 = vld [vmem:[%s12964_s2 + $0x2b0] sm:$0xff] }
 0x46e   :  { %v1431_v17 = vpop.f32.mrf.mxu0  ;;  %4571 = vmatpush.bf16.msra.mxu2 %v9795_v43 }
 0x46f   :  { %v1432_v48 = vadd.f32 %v11553_v63, %v1431_v17  ;;  %v9763_v17 = vld [vmem:[%s12964_s2 + $0x230] sm:$0xff] }
 0x470   :  { %4183 = vmatpush.bf16.msrb.mxu3 %v9763_v17  ;;  %v11957_v17 = vld [vmem:[%s12962_s5] ss:$0 sm:$0xff] }
 0x471   :  { %1470 = vmatmul.bf16.gmra.mxu0 %v9554_v14  ;;  %v1888_v26 = vmax.f32 %v1432_v48, 0.0  ;;  %v9794_v48 = vld [vmem:[%s12964_s2 + $0x2a8] sm:$0xff] }
 0x472   :  { %v3823_v4 = vpop.f32.mrf.mxu1  ;;  %4572 = vmatpush.bf16.msra.mxu2 %v9794_v48 }
 0x473   :  { %v11918_v3 = vadd.f32 %v3823_v4, %v11822_v35 }
 0x474   :  { %v9737_v42 = vld [vmem:[#allocation2 + $0x1d8] sm:$0xff] }
 0x475   :  { %4016 = vmatmul.bf16.gmra.mxu2 %v9737_v42  ;;  %v9762_v42 = vld [vmem:[%s12964_s2 + $0x228] sm:$0xff] }
 0x476   :  { %v1433_v28 = vpop.f32.mrf.mxu0  ;;  %4184 = vmatpush.bf16.msrb.mxu3 %v9762_v42 }
 0x477   :  { %v1434_v46 = vadd.f32 %v11553_v63, %v1433_v28  ;;  %v9555_v63 = vld [vmem:[%s12963_s0 + $0x230] sm:$0xff]  ;;  %v9793_v28 = vld [vmem:[%s12964_s2 + $0x2a0] sm:$0xff] }
 0x478   :  { %4573 = vmatpush.bf16.msra.mxu2 %v9793_v28  ;;  %v9791_v28 = vld [vmem:[%s12964_s2 + $0x290] sm:$0xff] }
 0x479   :  { %v1889_v35 = vmax.f32 %v1434_v46, 0.0 }
 0x47a   :  { %v11934_v4 = vpop.f32.mrf.mxu1  ;;  %4185 = vmatpush.bf16.msrb.mxu3 %v9761_v39 }
 0x47b   :  { %v10329_v14 = vpack.c.bf16 %v1889_v35, %v1888_v26 }
 0x47d   :  { %10721 = vst [vmem:[#allocation2 + $0x30] sm:$0xff] %v10329_v14   ;;  %v9760_v14 = vld [vmem:[%s12964_s2 + $0x218] sm:$0xff] }
 0x47e   :  { %v1436_v33 = vpop.f32.mrf.mxu0  ;;  %4186 = vmatpush.bf16.msrb.mxu3 %v9760_v14  ;;  %v9790_v14 = vld [vmem:[%s12964_s2 + $0x288] sm:$0xff] }
 0x47f   :  { %v1437_v43 = vadd.f32 %v11957_v17, %v1436_v33  ;;  %v9759_v33 = vld [vmem:[%s12964_s2 + $0x210] sm:$0xff] }
 0x481   :  { %1475 = vmatmul.bf16.gmra.mxu0 %v9555_v63  ;;  %v9792_v63 = vld [vmem:[%s12964_s2 + $0x298] sm:$0xff]  ;;  %v1890_v48 = vmax.f32 %v1437_v43, 0.0  ;;  %v9758_v43 = vld [vmem:[%s12964_s2 + $0x208] sm:$0xff] }
 0x482   :  { %v3828_v46 = vpop.f32.mrf.mxu1  ;;  %4574 = vmatpush.bf16.msra.mxu2 %v9792_v63  ;;  %4187 = vmatpush.bf16.msrb.mxu3 %v9759_v33 }
 0x483   :  { %v11952_v26 = vadd.f32 %v3828_v46, %v11844_v57 }
 0x484   :  { %v9738_v35 = vld [vmem:[#allocation2 + $0x30] sm:$0xff] }
 0x485   :  { %4021 = vmatmul.bf16.gmra.mxu2 %v9738_v35  ;;  %v9556_v35 = vld [vmem:[%s12963_s0 + $0x238] sm:$0xff] }
 0x486   :  { %v1438_v42 = vpop.f32.mrf.mxu0  ;;  %4575 = vmatpush.bf16.msra.mxu2 %v9791_v28  ;;  %4188 = vmatpush.bf16.msrb.mxu3 %v9758_v43 }
 0x487   :  { %v1439_v57 = vadd.f32 %v11957_v17, %v1438_v42  ;;  %v9757_v42 = vld [vmem:[%s12964_s2 + $0x200] sm:$0xff] }
 0x489   :  { %v1891_v39 = vmax.f32 %v1439_v57, 0.0  ;;  %v9789_v57 = vld [vmem:[%s12964_s2 + $0x280] sm:$0xff] }
 0x48a   :  { %v11973_v25 = vpop.f32.mrf.mxu1  ;;  %4576 = vmatpush.bf16.msra.mxu2 %v9790_v14  ;;  %4189 = vmatpush.bf16.msrb.mxu3 %v9757_v42  ;;  %v9557_v42 = vld [vmem:[%s12963_s0 + $0x240] sm:$0xff] }
 0x48b   :  { %v10334_v46 = vpack.c.bf16 %v1891_v39, %v1890_v48  ;;  %12984 = vst [vmem:[#allocation20_spill] sm:$0xff] %v11973_v25 }
 0x48d   :  { %10722 = vst [vmem:[#allocation2 + $0x140] sm:$0xff] %v10334_v46  }
 0x48e   :  { %v1441_v63 = vpop.f32.mrf.mxu0  ;;  %4577 = vmatpush.bf16.msra.mxu2 %v9789_v57 }
 0x48f   :  { %v1442_v28 = vadd.f32 %v11957_v17, %v1441_v63 }
 0x491   :  { %1480 = vmatmul.bf16.gmra.mxu0 %v9556_v35  ;;  %v1892_v43 = vmax.f32 %v1442_v28, 0.0 }
 0x492   :  { %v3833_v48 = vpop.f32.mrf.mxu1 }
 0x493   :  { %v11991_v39 = vadd.f32 %v3833_v48, %v11860_v13 }
 0x494   :  { %v9739_v33 = vld [vmem:[#allocation2 + $0x140] sm:$0xff] }
 0x495   :  { %4026 = vmatmul.bf16.gmra.mxu2 %v9739_v33 }
 0x496   :  { %v1443_v46 = vpop.f32.mrf.mxu0 }
 0x497   :  { %v1444_v35 = vadd.f32 %v11957_v17, %v1443_v46 }
 0x499   :  { %v1893_v14 = vmax.f32 %v1444_v35, 0.0 }
 0x49a   :  { %v11995_v22 = vpop.f32.mrf.mxu1 }
 0x49b   :  { %v10339_v27 = vpack.c.bf16 %v1893_v14, %v1892_v43  ;;  %12985 = vst [vmem:[#allocation21_spill] sm:$0xff] %v11995_v22  ;;  %v12005_v22 = vpop.f32.mrf.mxu2 }
 0x49c   :  { %12986 = vst [vmem:[#allocation22_spill] sm:$0xff] %v12005_v22 }
 0x49d   :  { %10723 = vst [vmem:[#allocation2 + $0x2a8] sm:$0xff] %v10339_v27  }
 0x49e   :  { %v1446_v57 = vpop.f32.mrf.mxu0 }
 0x49f   :  { %v1447_v33 = vadd.f32 %v11957_v17, %v1446_v57 }
 0x4a1   :  { %1485 = vmatmul.bf16.gmra.mxu0 %v9557_v42  ;;  %v1894_v35 = vmax.f32 %v1447_v33, 0.0  ;;  %v9780_v42 = vld [vmem:[%s12964_s2 + $0x278] sm:$0xff] }
 0x4a2   :  { %v3838_v13 = vpop.f32.mrf.mxu1  ;;  %4376 = vmatpush.bf16.msra.mxu1 %v9780_v42 }
 0x4a3   :  { %v12001_v48 = vadd.f32 %v3838_v13, %v11870_v61  ;;  %v9781_v13 = vld [vmem:[#allocation2 + $0x288] sm:$0xff] }
 0x4a4   :  { %v9740_v63 = vld [vmem:[#allocation2 + $0x2a8] sm:$0xff] }
 0x4a5   :  { %4031 = vmatmul.bf16.gmra.mxu2 %v9740_v63 }
 0x4a6   :  { %v1448_v46 = vpop.f32.mrf.mxu0 }
 0x4a7   :  { %v1449_v28 = vadd.f32 %v11957_v17, %v1448_v46 }
 0x4a9   :  { %v1895_v43 = vmax.f32 %v1449_v28, 0.0 }
 0x4ab   :  { %v10344_v27 = vpack.c.bf16 %v1895_v43, %v1894_v35 }
 0x4ad   :  { %10724 = vst [vmem:[#allocation2 + $0x130] sm:$0xff] %v10344_v27  }
 0x4ae   :  { %v1451_v14 = vpop.f32.mrf.mxu0 }
 0x4af   :  { %v1452_v57 = vadd.f32 %v11957_v17, %v1451_v14  ;;  %v9779_v14 = vld [vmem:[%s12964_s2 + $0x270] sm:$0xff] }
 0x4b0   :  { %4377 = vmatpush.bf16.msra.mxu1 %v9779_v14 }
 0x4b1   :  { %v1896_v33 = vmax.f32 %v1452_v57, 0.0 }
 0x4b4   :  { %v9749_v61 = vld [vmem:[#allocation2 + $0x130] sm:$0xff] }
 0x4b5   :  { %4190 = vmatmul.bf16.vlgmr.msrb.gmra.mxu3 %v9749_v61  ;;  %4578 = vmatmul.bf16.vlgmr.msra.gmra.mxu2 %v9781_v13  ;;  %v9782_v61 = vld [vmem:[#allocation2 + $0x3a8] sm:$0xff] }
 0x4b6   :  { %v1453_v25 = vpop.f32.mrf.mxu0 }
 0x4b7   :  { %v1454_v63 = vadd.f32 %v11957_v17, %v1453_v25 }
 0x4b8   :  { %v3997_v28 = vpop.f32.mrf.mxu2 }
 0x4b9   :  { %v1897_v46 = vmax.f32 %v1454_v63, 0.0  ;;  %v12013_v35 = vadd.f32 %v3997_v28, %v11878_v32 }
 0x4bb   :  { %v10349_v43 = vpack.c.bf16 %v1897_v46, %v1896_v33 }
 0x4bd   :  { %10725 = vst [vmem:[#allocation2 + $0x200] sm:$0xff] %v10349_v43  }
 0x4be   :  { %v1456_v27 = vpop.f32.mrf.mxu0 }
 0x4bf   :  { %v1457_v25 = vadd.f32 %v11957_v17, %v1456_v27  ;;  %v9778_v27 = vld [vmem:[%s12964_s2 + $0x268] sm:$0xff] }
 0x4c0   :  { %v12015_v22 = vpop.f32.mrf.mxu2  ;;  %4378 = vmatpush.bf16.msra.mxu1 %v9778_v27 }
 0x4c1   :  { %v1898_v57 = vmax.f32 %v1457_v25, 0.0 }
 0x4c4   :  { %v9750_v42 = vld [vmem:[#allocation2 + $0x200] sm:$0xff] }
 0x4c5   :  { %4195 = vmatmul.bf16.gmra.mxu3 %v9750_v42  ;;  %4583 = vmatmul.bf16.gmra.mxu2 %v9782_v61  ;;  %v9783_v42 = vld [vmem:[#allocation2 + $0x3c8] sm:$0xff] }
 0x4c6   :  { %v1458_v13 = vpop.f32.mrf.mxu0 }
 0x4c7   :  { %v1459_v32 = vadd.f32 %v11957_v17, %v1458_v13 }
 0x4c8   :  { %v4002_v33 = vpop.f32.mrf.mxu2 }
 0x4c9   :  { %v1899_v63 = vmax.f32 %v1459_v32, 0.0  ;;  %v12023_v46 = vadd.f32 %v4002_v33, %v11888_v54 }
 0x4cb   :  { %v10354_v28 = vpack.c.bf16 %v1899_v63, %v1898_v57 }
 0x4cd   :  { %10726 = vst [vmem:[#allocation2 + $0x318] sm:$0xff] %v10354_v28  }
 0x4ce   :  { %v1461_v43 = vpop.f32.mrf.mxu0 }
 0x4cf   :  { %v1462_v61 = vadd.f32 %v11957_v17, %v1461_v43  ;;  %v9777_v43 = vld [vmem:[%s12964_s2 + $0x260] sm:$0xff] }
 0x4d0   :  { %v12025_v36 = vpop.f32.mrf.mxu2  ;;  %4379 = vmatpush.bf16.msra.mxu1 %v9777_v43 }
 0x4d1   :  { %v1900_v13 = vmax.f32 %v1462_v61, 0.0 }
 0x4d4   :  { %v9751_v14 = vld [vmem:[#allocation2 + $0x318] sm:$0xff] }
 0x4d5   :  { %4200 = vmatmul.bf16.gmra.mxu3 %v9751_v14  ;;  %4588 = vmatmul.bf16.gmra.mxu2 %v9783_v42  ;;  %v9784_v14 = vld [vmem:[#allocation2 + $0x160] sm:$0xff] }
 0x4d6   :  { %v1463_v25 = vpop.f32.mrf.mxu0 }
 0x4d7   :  { %v1464_v54 = vadd.f32 %v11957_v17, %v1463_v25 }
 0x4d8   :  { %v4007_v57 = vpop.f32.mrf.mxu2 }
 0x4d9   :  { %v1901_v32 = vmax.f32 %v1464_v54, 0.0  ;;  %v12033_v63 = vadd.f32 %v4007_v57, %v11898_v44 }
 0x4db   :  { %v10359_v33 = vpack.c.bf16 %v1901_v32, %v1900_v13 }
 0x4dd   :  { %10727 = vst [vmem:[#allocation2 + $0x220] sm:$0xff] %v10359_v33  }
 0x4de   :  { %v1466_v28 = vpop.f32.mrf.mxu0 }
 0x4df   :  { %v1467_v42 = vadd.f32 %v11957_v17, %v1466_v28  ;;  %v9776_v28 = vld [vmem:[%s12964_s2 + $0x258] sm:$0xff] }
 0x4e0   :  { %v12035_v62 = vpop.f32.mrf.mxu2  ;;  %4380 = vmatpush.bf16.msra.mxu1 %v9776_v28 }
 0x4e1   :  { %v1902_v25 = vmax.f32 %v1467_v42, 0.0  ;;  %v9812_v42 = vld [vmem:[%s12964_s2 + $0x2f8] sm:$0xff] }
 0x4e2   :  { %4764 = vmatpush.bf16.msra.mxu3 %v9812_v42 }
 0x4e4   :  { %v9752_v27 = vld [vmem:[#allocation2 + $0x220] sm:$0xff] }
 0x4e5   :  { %4205 = vmatmul.bf16.gmra.mxu3 %v9752_v27  ;;  %4593 = vmatmul.bf16.gmra.mxu2 %v9784_v14  ;;  %v9785_v27 = vld [vmem:[#allocation2 + $0x2c8] sm:$0xff] }
 0x4e6   :  { %v1468_v61 = vpop.f32.mrf.mxu0 }
 0x4e7   :  { %v1469_v44 = vadd.f32 %v11957_v17, %v1468_v61 }
 0x4e8   :  { %v4012_v13 = vpop.f32.mrf.mxu2 }
 0x4e9   :  { %v1903_v54 = vmax.f32 %v1469_v44, 0.0  ;;  %v12043_v32 = vadd.f32 %v4012_v13, %v11908_v6  ;;  %v9844_v6 = vld [vmem:[%s12964_s2 + $0x378] sm:$0xff] }
 0x4ea   :  { %5152 = vmatpush.bf16.msrb.mxu2 %v9844_v6 }
 0x4eb   :  { %v10364_v57 = vpack.c.bf16 %v1903_v54, %v1902_v25 }
 0x4ed   :  { %10728 = vst [vmem:[#allocation2 + $0x70] sm:$0xff] %v10364_v57   ;;  %v9811_v57 = vld [vmem:[%s12964_s2 + $0x2f0] sm:$0xff] }
 0x4ee   :  { %v1471_v33 = vpop.f32.mrf.mxu0  ;;  %4765 = vmatpush.bf16.msra.mxu3 %v9811_v57  ;;  %v9808_v57 = vld [vmem:[%s12964_s2 + $0x2d8] sm:$0xff] }
 0x4ef   :  { %v1472_v14 = vadd.f32 %v11957_v17, %v1471_v33  ;;  %v9843_v33 = vld [vmem:[%s12964_s2 + $0x370] sm:$0xff] }
 0x4f0   :  { %v12045_v50 = vpop.f32.mrf.mxu2  ;;  %5153 = vmatpush.bf16.msrb.mxu2 %v9843_v33  ;;  %v9840_v33 = vld [vmem:[%s12964_s2 + $0x358] sm:$0xff] }
 0x4f1   :  { %v1904_v25 = vmax.f32 %v1472_v14, 0.0  ;;  %v9842_v14 = vld [vmem:[%s12964_s2 + $0x368] sm:$0xff] }
 0x4f4   :  { %v9753_v43 = vld [vmem:[#allocation2 + $0x70] sm:$0xff]  ;;  %5154 = vmatpush.bf16.msrb.mxu2 %v9842_v14 }
 0x4f5   :  { %4210 = vmatmul.bf16.gmra.mxu3 %v9753_v43  ;;  %4598 = vmatmul.bf16.gmra.mxu2 %v9785_v27  ;;  %v9810_v27 = vld [vmem:[%s12964_s2 + $0x2e8] sm:$0xff] }
 0x4f6   :  { %v1473_v61 = vpop.f32.mrf.mxu0  ;;  %4766 = vmatpush.bf16.msra.mxu3 %v9810_v27 }
 0x4f7   :  { %v1474_v44 = vadd.f32 %v11957_v17, %v1473_v61  ;;  %v9841_v61 = vld [vmem:[%s12964_s2 + $0x360] sm:$0xff] }
 0x4f8   :  { %v4017_v13 = vpop.f32.mrf.mxu2  ;;  %5155 = vmatpush.bf16.msrb.mxu2 %v9841_v61 }
 0x4f9   :  { %v1905_v54 = vmax.f32 %v1474_v44, 0.0  ;;  %v12065_v28 = vadd.f32 %v4017_v13, %v11918_v3  ;;  %v9809_v3 = vld [vmem:[%s12964_s2 + $0x2e0] sm:$0xff]  ;;  %v9775_v44 = vld [vmem:[%s12964_s2 + $0x250] sm:$0xff] }
 0x4fa   :  { %4767 = vmatpush.bf16.msra.mxu3 %v9809_v3  ;;  %4381 = vmatpush.bf16.msra.mxu1 %v9775_v44  ;;  %v9839_v44 = vld [vmem:[%s12964_s2 + $0x350] sm:$0xff] }
 0x4fb   :  { %v10369_v43 = vpack.c.bf16 %v1905_v54, %v1904_v25  ;;  %v9786_v54 = vld [vmem:[#allocation2 + $0x210] sm:$0xff] }
 0x4fc   :  { %5156 = vmatpush.bf16.msrb.mxu2 %v9840_v33 }
 0x4fd   :  { %10729 = vst [vmem:[#allocation2 + $0x300] sm:$0xff] %v10369_v43  }
 0x4fe   :  { %v1476_v42 = vpop.f32.mrf.mxu0  ;;  %4768 = vmatpush.bf16.msra.mxu3 %v9808_v57  ;;  %v9838_v57 = vld [vmem:[%s12964_s2 + $0x348] sm:$0xff] }
 0x4ff   :  { %v1477_v13 = vadd.f32 %v11957_v17, %v1476_v42  ;;  %v9807_v42 = vld [vmem:[%s12964_s2 + $0x2d0] sm:$0xff] }
 0x500   :  { %v12073_v6 = vpop.f32.mrf.mxu2  ;;  %5157 = vmatpush.bf16.msrb.mxu2 %v9839_v44 }
 0x501   :  { %v1906_v14 = vmax.f32 %v1477_v13, 0.0  ;;  %v9806_v13 = vld [vmem:[%s12964_s2 + $0x2c8] sm:$0xff] }
 0x502   :  { %4769 = vmatpush.bf16.msra.mxu3 %v9807_v42 }
 0x504   :  { %v9754_v25 = vld [vmem:[#allocation2 + $0x300] sm:$0xff]  ;;  %5158 = vmatpush.bf16.msrb.mxu2 %v9838_v57 }
 0x505   :  { %4215 = vmatmul.bf16.gmra.mxu3 %v9754_v25  ;;  %4603 = vmatmul.bf16.gmra.mxu2 %v9786_v54  ;;  %v9774_v54 = vld [vmem:[%s12964_s2 + $0x248] sm:$0xff] }
 0x506   :  { %v1478_v43 = vpop.f32.mrf.mxu0  ;;  %4382 = vmatpush.bf16.msra.mxu1 %v9774_v54  ;;  %4770 = vmatpush.bf16.msra.mxu3 %v9806_v13 }
 0x507   :  { %v1479_v27 = vadd.f32 %v11957_v17, %v1478_v43  ;;  %v9773_v43 = vld [vmem:[%s12964_s2 + $0x240] sm:$0xff] }
 0x508   :  { %v4022_v61 = vpop.f32.mrf.mxu2 }
 0x509   :  { %v1907_v3 = vmax.f32 %v1479_v27, 0.0  ;;  %v12099_v56 = vadd.f32 %v4022_v61, %v11952_v26  ;;  %v9805_v27 = vld [vmem:[%s12964_s2 + $0x2c0] sm:$0xff]  ;;  %v9787_v61 = vld [vmem:[#allocation2 + $0x3d8] sm:$0xff] }
 0x50a   :  { %4383 = vmatpush.bf16.msra.mxu1 %v9773_v43  ;;  %4771 = vmatpush.bf16.msra.mxu3 %v9805_v27 }
 0x50b   :  { %12987 = vst [vmem:[#allocation23_spill] sm:$0xff] %v12099_v56  ;;  %v10374_v25 = vpack.c.bf16 %v1907_v3, %v1906_v14  ;;  %v9837_v14 = vld [vmem:[%s12964_s2 + $0x340] sm:$0xff] }
 0x50c   :  { %5159 = vmatpush.bf16.msrb.mxu2 %v9837_v14  ;;  %v9788_v14 = vld [vmem:[#allocation2 + $0x1e8] sm:$0xff] }
 0x50d   :  { %10730 = vst [vmem:[#allocation2 + $0xe0] sm:$0xff] %v10374_v25  }
 0x50e   :  { %v1481_v33 = vpop.f32.mrf.mxu0 }
 0x50f   :  { %v1482_v42 = vadd.f32 %v11957_v17, %v1481_v33 }
 0x510   :  { %v12110_v26 = vpop.f32.mrf.mxu2 }
 0x511   :  { %12988 = vst [vmem:[#allocation24_spill] sm:$0xff] %v12110_v26  ;;  %v1908_v54 = vmax.f32 %v1482_v42, 0.0 }
 0x514   :  { %v9755_v3 = vld [vmem:[#allocation2 + $0xe0] sm:$0xff] }
 0x515   :  { %4220 = vmatmul.bf16.gmra.mxu3 %v9755_v3  ;;  %4608 = vmatmul.bf16.gmra.mxu2 %v9787_v61 }
 0x516   :  { %v1483_v44 = vpop.f32.mrf.mxu0 }
 0x517   :  { %v1484_v25 = vadd.f32 %v11957_v17, %v1483_v44 }
 0x518   :  { %v4027_v57 = vpop.f32.mrf.mxu2 }
 0x519   :  { %v1909_v13 = vmax.f32 %v1484_v25, 0.0  ;;  %v12124_v26 = vadd.f32 %v4027_v57, %v11991_v39  ;;  %v9797_v57 = vld [vmem:[#allocation2 + $0x1b0] sm:$0xff] }
 0x51b   :  { %v10379_v56 = vpack.c.bf16 %v1909_v13, %v1908_v54  ;;  %v9828_v54 = vld [vmem:[%s12964_s2 + $0x338] sm:$0xff] }
 0x51c   :  { %4958 = vmatpush.bf16.msrb.mxu1 %v9828_v54 }
 0x51d   :  { %10731 = vst [vmem:[#allocation2 + $0x178] sm:$0xff] %v10379_v56   ;;  %v12133_v56 = vpop.f32.mrf.mxu3 }
 0x51e   :  { %v1486_v43 = vpop.f32.mrf.mxu0 }
 0x51f   :  { %v1487_v33 = vadd.f32 %v11957_v17, %v1486_v43 }
 0x520   :  { %v12126_v27 = vpop.f32.mrf.mxu2 }
 0x521   :  { %v1910_v61 = vmax.f32 %v1487_v33, 0.0 }
 0x524   :  { %v9756_v40 = vld [vmem:[#allocation2 + $0x178] sm:$0xff] }
 0x525   :  { %4225 = vmatmul.bf16.gmra.mxu3 %v9756_v40  ;;  %4613 = vmatmul.bf16.gmra.mxu2 %v9788_v14  ;;  %v2852_v40 = vadd.f32 %v11365_v24, %v11347_v47 }
 0x526   :  { %v1488_v60 = vpop.f32.mrf.mxu0 }
 0x527   :  { %v1489_v3 = vadd.f32 %v11957_v17, %v1488_v60  ;;  %v9829_v60 = vld [vmem:[#allocation2 + $0xf0] sm:$0xff]  ;;  %v3068_v17 = vadd.f32 %v11456_v10, %v2852_v40 }
 0x528   :  { %v4032_v44 = vpop.f32.mrf.mxu2  ;;  %v9827_v10 = vld [vmem:[%s12964_s2 + $0x330] sm:$0xff] }
 0x529   :  { %v1911_v42 = vmax.f32 %v1489_v3, 0.0  ;;  %v12131_v39 = vadd.f32 %v4032_v44, %v12001_v48  ;;  %v3262_v48 = vadd.f32 %v11570_v51, %v3068_v17  ;;  %v2857_v51 = vadd.f32 %v11384_v49, %v11362_v16  ;;  %v9798_v44 = vld [vmem:[#allocation2 + $0x1c8] sm:$0xff]  ;;  %4959 = vmatpush.bf16.msrb.mxu1 %v9827_v10 }
 0x52b   :  { %v10384_v25 = vpack.c.bf16 %v1911_v42, %v1910_v61  ;;  %v3456_v14 = vadd.f32 %v11677_v23, %v3262_v48  ;;  %v9766_v23 = vld [vmem:[#allocation2 + $0x260] sm:$0xff] }
 0x52d   :  { %10732 = vst [vmem:[#allocation2 + $0x328] sm:$0xff] %v10384_v25   ;;  %v3650_v3 = vadd.f32 %v11781_v59, %v3456_v14  ;;  %v3070_v59 = vadd.f32 %v11472_v30, %v2857_v51  ;;  %v9826_v30 = vld [vmem:[%s12964_s2 + $0x328] sm:$0xff] }
 0x52e   :  { %4960 = vmatpush.bf16.msrb.mxu1 %v9826_v30  ;;  %v9823_v30 = vld [vmem:[%s12964_s2 + $0x310] sm:$0xff] }
 0x52f   :  { %v3844_v47 = vadd.f32 %v11882_v1, %v3650_v3 }
 0x531   :  { %v4038_v24 = vadd.f32 %v12015_v22, %v3844_v47  ;;  %v3264_v22 = vadd.f32 %v11580_v7, %v3070_v59  ;;  %v2862_v7 = vadd.f32 %v11407_v9, %v11382_v45  ;;  %v9801_v59 = vld [vmem:[#allocation2 + $0x58] sm:$0xff] }
 0x533   :  { %v3458_v25 = vadd.f32 %v11687_v37, %v3264_v22  ;;  %v9767_v37 = vld [vmem:[#allocation2 + $0x3b8] sm:$0xff] }
 0x534   :  { %v9765_v13 = vld [vmem:[#allocation2 + $0x328] sm:$0xff] }
 0x535   :  { %4384 = vmatmul.bf16.vlgmr.msra.gmra.mxu1 %v9765_v13  ;;  %4772 = vmatmul.bf16.vlgmr.msra.gmra.mxu3 %v9797_v57  ;;  %v3652_v40 = vadd.f32 %v11791_v20, %v3458_v25  ;;  %v3072_v20 = vadd.f32 %v11484_v52, %v2862_v7  ;;  %v12989_v7 = vld [vmem:[#allocation4_spill] sm:$0xff] }
 0x536   :  { %5160 = vmatmul.bf16.vlgmr.msrb.gmra.mxu2 %v9829_v60  ;;  %v9799_v60 = vld [vmem:[#allocation2 + $0x2d0] sm:$0xff] }
 0x537   :  { %v3846_v16 = vadd.f32 %v11892_v21, %v3652_v40  ;;  %v12173_v21 = vpop.f32.mrf.mxu2 }
 0x538   :  { %v4191_v43 = vpop.f32.mrf.mxu3 }
 0x539   :  { %v12144_v33 = vadd.f32 %v4191_v43, %v12013_v35  ;;  %v9830_v35 = vld [vmem:[#allocation2 + $0x180] sm:$0xff]  ;;  %v4040_v49 = vadd.f32 %v12025_v36, %v3846_v16  ;;  %v3266_v36 = vadd.f32 %v11590_v31, %v3072_v20  ;;  %v9858_v16 = vld [vmem:[%s12964_s2 + $0x3a8] sm:$0xff] }
 0x53a   :  { %v9825_v31 = vld [vmem:[%s12964_s2 + $0x320] sm:$0xff] }
 0x53b   :  { %v3460_v48 = vadd.f32 %v11697_v8, %v3266_v36  ;;  %v2867_v8 = vadd.f32 %v11426_v34, %v11415_v12  ;;  %4961 = vmatpush.bf16.msrb.mxu1 %v9825_v31  ;;  %v12991_v20 = vld [vmem:[#allocation8_spill] sm:$0xff] }
 0x53d   :  { %v3654_v45 = vadd.f32 %v11801_v58, %v3460_v48  ;;  %v9832_v58 = vld [vmem:[#allocation2 + $0x3d0] sm:$0xff]  ;;  %v12992_v48 = vld [vmem:[#allocation11_spill] sm:$0xff] }
 0x53f   :  { %v3848_v9 = vadd.f32 %v11902_v0, %v3654_v45  ;;  %v12183_v52 = vpop.f32.mrf.mxu2  ;;  %v3074_v0 = vadd.f32 %v11494_v5, %v2867_v8  ;;  %v12994_v8 = vld [vmem:[#allocation23_spill] sm:$0xff] }
 0x540   :  { %v4193_v61 = vpop.f32.mrf.mxu3 }
 0x541   :  { %v12149_v42 = vadd.f32 %v4193_v61, %v4038_v24  ;;  %v4042_v14 = vadd.f32 %v12035_v62, %v3848_v9  ;;  %v9800_v24 = vld [vmem:[#allocation2 + $0x1d0] sm:$0xff]  ;;  %v3268_v62 = vadd.f32 %v11600_v55, %v3074_v0  ;;  %v9824_v55 = vld [vmem:[%s12964_s2 + $0x318] sm:$0xff]  ;;  %v12995_v0 = vld [vmem:[#allocation17_spill] sm:$0xff] }
 0x542   :  { %4962 = vmatpush.bf16.msrb.mxu1 %v9824_v55 }
 0x543   :  { %v3462_v10 = vadd.f32 %v11707_v41, %v3268_v62  ;;  %v2872_v41 = vadd.f32 %v11437_v53, %v11431_v38 }
 0x545   :  { %4389 = vmatmul.bf16.gmra.mxu1 %v9766_v23  ;;  %4777 = vmatmul.bf16.gmra.mxu3 %v9798_v44  ;;  %v3656_v12 = vadd.f32 %v11811_v11, %v3462_v10  ;;  %v9833_v11 = vld [vmem:[#allocation2 + $0x250] sm:$0xff]  ;;  %v12996_v10 = vld [vmem:[#allocation20_spill] sm:$0xff] }
 0x546   :  { %5165 = vmatmul.bf16.gmra.mxu2 %v9830_v35  ;;  %4963 = vmatpush.bf16.msrb.mxu1 %v9823_v30 }
 0x547   :  { %v12198_v23 = vpop.f32.mrf.mxu2  ;;  %v3850_v34 = vadd.f32 %v11912_v19, %v3656_v12  ;;  %v3076_v19 = vadd.f32 %v11513_v29, %v2872_v41  ;;  %v9859_v29 = vld [vmem:[%s12964_s2 + $0x3b0] sm:$0xff]  ;;  %v9821_v41 = vld [vmem:[%s12964_s2 + $0x300] sm:$0xff] }
 0x548   :  { %v4196_v1 = vpop.f32.mrf.mxu3 }
 0x549   :  { %v12160_v54 = vadd.f32 %v4196_v1, %v12023_v46  ;;  %v9831_v46 = vld [vmem:[#allocation2 + $0x170] sm:$0xff]  ;;  %v4044_v44 = vadd.f32 %v12045_v50, %v3850_v34  ;;  %v9860_v50 = vld [vmem:[%s12964_s2 + $0x3b8] sm:$0xff]  ;;  %v3270_v1 = vadd.f32 %v11616_v15, %v3076_v19  ;;  %v12997_v34 = vld [vmem:[#allocation24_spill] sm:$0xff] }
 0x54a   :  { %5346 = vmatpush.bf16.msrb.mxu3 %v9860_v50  ;;  %v12999_v19 = vld [vmem:[#allocation7_spill] sm:$0xff] }
 0x54b   :  { %v3464_v38 = vadd.f32 %v11726_v18, %v3270_v1  ;;  %v9771_v1 = vld [vmem:[#allocation2 + $0x20] sm:$0xff] }
 0x54d   :  { %v3658_v40 = vadd.f32 %v11830_v2, %v3464_v38  ;;  %v9857_v2 = vld [vmem:[%s12964_s2 + $0x3a0] sm:$0xff]  ;;  %v9835_v38 = vld [vmem:[#allocation2 + $0xb8] sm:$0xff] }
 0x54e   :  { %5347 = vmatpush.bf16.msrb.mxu3 %v9859_v29  ;;  %v13000_v29 = vld [vmem:[#allocation9_spill] sm:$0xff] }
 0x54f   :  { %v12210_v22 = vpop.f32.mrf.mxu2  ;;  %v3852_v15 = vadd.f32 %v11934_v4, %v3658_v40  ;;  %v9770_v4 = vld [vmem:[#allocation2 + $0x40] sm:$0xff] }
 0x550   :  { %v4198_v13 = vpop.f32.mrf.mxu3 }
 0x551   :  { %v12165_v57 = vadd.f32 %v4198_v13, %v4040_v49  ;;  %v4046_v18 = vadd.f32 %v12073_v6, %v3852_v15  ;;  %v9834_v6 = vld [vmem:[#allocation2 + $0x378] sm:$0xff] }
 0x552   :  { %5348 = vmatpush.bf16.msrb.mxu3 %v9858_v16  ;;  %v13001_v16 = vld [vmem:[#allocation12_spill] sm:$0xff] }
 0x555   :  { %4394 = vmatmul.bf16.gmra.mxu1 %v9767_v37  ;;  %4782 = vmatmul.bf16.gmra.mxu3 %v9799_v60  ;;  %v12990_v37 = vld [vmem:[#allocation5_spill] sm:$0xff] }
 0x556   :  { %5170 = vmatmul.bf16.gmra.mxu2 %v9831_v46  ;;  %v2877_v60 = vadd.f32 %v12990_v37, %v12989_v7  ;;  %v9802_v46 = vld [vmem:[#allocation2 + $0x120] sm:$0xff]  ;;  %5349 = vmatpush.bf16.msrb.mxu3 %v9857_v2  ;;  %v13003_v7 = vld [vmem:[#allocation18_spill] sm:$0xff] }
 0x557   :  { %v12229_v49 = vpop.f32.mrf.mxu2 }
 0x558   :  { %v4201_v17 = vpop.f32.mrf.mxu3  ;;  %v3078_v36 = vadd.f32 %v12991_v20, %v2877_v60 }
 0x559   :  { %v12178_v43 = vadd.f32 %v4201_v17, %v12033_v63  ;;  %v9768_v63 = vld [vmem:[#allocation2 + $0x2b8] sm:$0xff] }
 0x55a   :  { %v9856_v17 = vld [vmem:[%s12964_s2 + $0x398] sm:$0xff]  ;;  %v3272_v45 = vadd.f32 %v12992_v48, %v3078_v36  ;;  %v13006_v48 = vld [vmem:[#allocation13_spill] sm:$0xff] }
 0x55b   :  { %5350 = vmatpush.bf16.msrb.mxu3 %v9856_v17  ;;  %v13005_v17 = vld [vmem:[#allocation10_spill] sm:$0xff] }
 0x55f   :  { %v12247_v9 = vpop.f32.mrf.mxu2 }
 0x560   :  { %v4203_v3 = vpop.f32.mrf.mxu3 }
 0x561   :  { %v12185_v47 = vadd.f32 %v4203_v3, %v4042_v14  ;;  %v12993_v3 = vld [vmem:[#allocation14_spill] sm:$0xff] }
 0x562   :  { %v3466_v31 = vadd.f32 %v12993_v3, %v3272_v45  ;;  %v2887_v45 = vadd.f32 %v13006_v48, %v13005_v17  ;;  %v9804_v3 = vld [vmem:[#allocation2 + $0x2e8] sm:$0xff] }
 0x564   :  { %v3660_v62 = vadd.f32 %v12995_v0, %v3466_v31  ;;  %v9836_v31 = vld [vmem:[#allocation2 + $0x38] sm:$0xff] }
 0x565   :  { %4399 = vmatmul.bf16.gmra.mxu1 %v9768_v63  ;;  %4787 = vmatmul.bf16.gmra.mxu3 %v9800_v24  ;;  %v9855_v24 = vld [vmem:[%s12964_s2 + $0x390] sm:$0xff] }
 0x566   :  { %5175 = vmatmul.bf16.gmra.mxu2 %v9832_v58  ;;  %v9822_v58 = vld [vmem:[%s12964_s2 + $0x308] sm:$0xff]  ;;  %5351 = vmatpush.bf16.msrb.mxu3 %v9855_v24  ;;  %v3854_v12 = vadd.f32 %v12996_v10, %v3660_v62 }
 0x567   :  { %4964 = vmatpush.bf16.msrb.mxu1 %v9822_v58  ;;  %v13008_v58 = vld [vmem:[#allocation19_spill] sm:$0xff] }
 0x568   :  { %v4206_v61 = vpop.f32.mrf.mxu3 }
 0x569   :  { %v12196_v51 = vadd.f32 %v4206_v61, %v12043_v32  ;;  %v9769_v32 = vld [vmem:[#allocation2 + $0x248] sm:$0xff] }
 0x56a   :  { %v9854_v61 = vld [vmem:[%s12964_s2 + $0x388] sm:$0xff] }
 0x56b   :  { %5352 = vmatpush.bf16.msrb.mxu3 %v9854_v61  ;;  %4965 = vmatpush.bf16.msrb.mxu1 %v9821_v41 }
 0x570   :  { %v4208_v5 = vpop.f32.mrf.mxu3 }
 0x571   :  { %v12203_v35 = vadd.f32 %v4208_v5, %v4044_v44  ;;  %v4048_v44 = vadd.f32 %v12997_v34, %v3854_v12  ;;  %v3840_v12 = vpop.f32.mrf.mxu1 }
 0x575   :  { %4404 = vmatmul.bf16.gmra.mxu1 %v9769_v32  ;;  %4792 = vmatmul.bf16.gmra.mxu3 %v9801_v59  ;;  %v9853_v32 = vld [vmem:[%s12964_s2 + $0x380] sm:$0xff]  ;;  %v12273_v59 = vpop.f32.mrf.mxu2 }
 0x576   :  { %5180 = vmatmul.bf16.gmra.mxu2 %v9833_v11  ;;  %v12998_v11 = vld [vmem:[#allocation6_spill] sm:$0xff]  ;;  %5353 = vmatpush.bf16.msrb.mxu3 %v9853_v32 }
 0x577   :  { %v2882_v50 = vadd.f32 %v12999_v19, %v12998_v11  ;;  %v9876_v11 = vld [vmem:[%s12964_s2 + $0x3f8] sm:$0xff] }
 0x578   :  { %v4211_v25 = vpop.f32.mrf.mxu3  ;;  %5540 = vmatpush.bf16.msra.mxu1 %v9876_v11 }
 0x579   :  { %v12219_v53 = vadd.f32 %v4211_v25, %v12065_v28  ;;  %v9803_v25 = vld [vmem:[#allocation2 + $0x198] sm:$0xff]  ;;  %v3080_v40 = vadd.f32 %v13000_v29, %v2882_v50 }
 0x57b   :  { %v3274_v15 = vadd.f32 %v13001_v16, %v3080_v40 }
 0x57d   :  { %v12284_v60 = vpop.f32.mrf.mxu2 }
 0x580   :  { %v4213_v28 = vpop.f32.mrf.mxu3 }
 0x581   :  { %v12232_v13 = vadd.f32 %v4213_v28, %v4046_v18  ;;  %v13002_v28 = vld [vmem:[#allocation15_spill] sm:$0xff] }
 0x582   :  { %v3468_v30 = vadd.f32 %v13002_v28, %v3274_v15 }
 0x584   :  { %v3662_v37 = vadd.f32 %v13003_v7, %v3468_v30  ;;  %v9814_v30 = vld [vmem:[#allocation2 + $0x238] sm:$0xff] }
 0x585   :  { %4409 = vmatmul.bf16.gmra.mxu1 %v9770_v4  ;;  %4797 = vmatmul.bf16.gmra.mxu3 %v9802_v46  ;;  %v13004_v4 = vld [vmem:[#allocation21_spill] sm:$0xff]  ;;  %v12293_v24 = vpop.f32.mrf.mxu2 }
 0x586   :  { %5185 = vmatmul.bf16.gmra.mxu2 %v9834_v6  ;;  %v3856_v46 = vadd.f32 %v13004_v4, %v3662_v37 }
 0x588   :  { %v4216_v14 = vpop.f32.mrf.mxu3  ;;  %v4050_v6 = vadd.f32 %v12126_v27, %v3856_v46  ;;  %v13009_v27 = vld [vmem:[#allocation22_spill] sm:$0xff] }
 0x589   :  { %v12251_v63 = vadd.f32 %v4216_v14, %v12994_v8  ;;  %v9772_v14 = vld [vmem:[#allocation2 + $0xe8] sm:$0xff]  ;;  %v13007_v8 = vld [vmem:[#allocation16_spill] sm:$0xff] }
 0x590   :  { %v4218_v5 = vpop.f32.mrf.mxu3 }
 0x591   :  { %v12265_v55 = vadd.f32 %v4218_v5, %v4048_v44 }
 0x595   :  { %4414 = vmatmul.bf16.gmra.mxu1 %v9771_v1  ;;  %4802 = vmatmul.bf16.gmra.mxu3 %v9803_v25  ;;  %v9813_v1 = vld [vmem:[#allocation2 + $0x1f8] sm:$0xff] }
 0x596   :  { %5190 = vmatmul.bf16.gmra.mxu2 %v9835_v38  ;;  %v9845_v25 = vld [vmem:[#allocation2 + $0x78] sm:$0xff] }
 0x598   :  { %v4221_v18 = vpop.f32.mrf.mxu3 }
 0x599   :  { %v12281_v2 = vadd.f32 %v4221_v18, %v12124_v26  ;;  %v3082_v26 = vadd.f32 %v13007_v8, %v2887_v45  ;;  %v9815_v45 = vld [vmem:[#allocation2 + $0x398] sm:$0xff] }
 0x59b   :  { %v3276_v0 = vadd.f32 %v13008_v58, %v3082_v26 }
 0x59d   :  { %v3470_v61 = vadd.f32 %v13009_v27, %v3276_v0  ;;  %v9816_v27 = vld [vmem:[#allocation2 + $0x390] sm:$0xff] }
 0x59f   :  { %v3664_v34 = vadd.f32 %v12133_v56, %v3470_v61 }
 0x5a0   :  { %v4223_v20 = vpop.f32.mrf.mxu3 }
 0x5a1   :  { %v12288_v36 = vadd.f32 %v4223_v20, %v4050_v6  ;;  %v3858_v44 = vadd.f32 %v3840_v12, %v3664_v34 }
 0x5a3   :  { %v4052_v5 = vadd.f32 %v12173_v21, %v3858_v44 }
 0x5a5   :  { %4419 = vmatmul.bf16.gmra.mxu1 %v9772_v14  ;;  %4807 = vmatmul.bf16.gmra.mxu3 %v9804_v3 }
 0x5a6   :  { %5195 = vmatmul.bf16.gmra.mxu2 %v9836_v31 }
 0x5a8   :  { %v4226_v62 = vpop.f32.mrf.mxu3 }
 0x5a9   :  { %v12298_v10 = vadd.f32 %v4226_v62, %v12131_v39 }
 0x5b0   :  { %v4228_v41 = vpop.f32.mrf.mxu3 }
 0x5b1   :  { %v12302_v32 = vadd.f32 %v4228_v41, %v4052_v5 }
 0x5b2   :  { %v4385_v19 = vpop.f32.mrf.mxu1 }
 0x5b3   :  { %v4425_v50 = vadd.f32 %v4385_v19, %v12144_v33  ;;  %v9875_v33 = vld [vmem:[%s12964_s2 + $0x3f0] sm:$0xff] }
 0x5b4   :  { %5541 = vmatpush.bf16.msra.mxu1 %v9875_v33 }
 0x5b5   :  { %4966 = vmatmul.bf16.vlgmr.msrb.gmra.mxu1 %v9813_v1  ;;  %5354 = vmatmul.bf16.vlgmr.msrb.gmra.mxu3 %v9845_v25  ;;  %v4619_v39 = vadd.f32 %v12183_v52, %v4425_v50  ;;  %v9846_v52 = vld [vmem:[#allocation2 + $0x308] sm:$0xff]  ;;  %v9849_v1 = vld [vmem:[#allocation2 + $0x278] sm:$0xff] }
 0x5b8   :  { %v4773_v56 = vpop.f32.mrf.mxu3 }
 0x5b9   :  { %v12309_v38 = vadd.f32 %v4773_v56, %v4619_v39 }
 0x5ba   :  { %v4387_v21 = vpop.f32.mrf.mxu1 }
 0x5bb   :  { %v4426_v29 = vadd.f32 %v4387_v21, %v12149_v42 }
 0x5bd   :  { %v4620_v40 = vadd.f32 %v12198_v23, %v4426_v29 }
 0x5c0   :  { %v4775_v16 = vpop.f32.mrf.mxu3 }
 0x5c1   :  { %v12313_v15 = vadd.f32 %v4775_v16, %v4620_v40 }
 0x5c2   :  { %v4390_v18 = vpop.f32.mrf.mxu1 }
 0x5c3   :  { %v4427_v28 = vadd.f32 %v4390_v18, %v12160_v54  ;;  %v9874_v54 = vld [vmem:[%s12964_s2 + $0x3e8] sm:$0xff] }
 0x5c4   :  { %5542 = vmatpush.bf16.msra.mxu1 %v9874_v54  ;;  %v9818_v18 = vld [vmem:[#allocation2 + $0xa8] sm:$0xff] }
 0x5c5   :  { %4971 = vmatmul.bf16.gmra.mxu1 %v9814_v30  ;;  %5359 = vmatmul.bf16.gmra.mxu3 %v9846_v52  ;;  %v4621_v7 = vadd.f32 %v12210_v22, %v4427_v28  ;;  %v9847_v22 = vld [vmem:[#allocation2 + $0x370] sm:$0xff]  ;;  %v9850_v28 = vld [vmem:[#allocation2 + $0x360] sm:$0xff] }
 0x5c8   :  { %v4778_v42 = vpop.f32.mrf.mxu3 }
 0x5c9   :  { %v12320_v37 = vadd.f32 %v4778_v42, %v4621_v7 }
 0x5ca   :  { %v4392_v23 = vpop.f32.mrf.mxu1 }
 0x5cb   :  { %v4428_v4 = vadd.f32 %v4392_v23, %v12165_v57 }
 0x5cd   :  { %v4622_v46 = vadd.f32 %v12229_v49, %v4428_v4  ;;  %v9870_v4 = vld [vmem:[%s12964_s2 + $0x3c8] sm:$0xff] }
 0x5d0   :  { %v4780_v6 = vpop.f32.mrf.mxu3 }
 0x5d1   :  { %v12324_v20 = vadd.f32 %v4780_v6, %v4622_v46  ;;  %v9869_v46 = vld [vmem:[%s12964_s2 + $0x3c0] sm:$0xff] }
 0x5d2   :  { %v4395_v17 = vpop.f32.mrf.mxu1 }
 0x5d3   :  { %v4429_v48 = vadd.f32 %v4395_v17, %v12178_v43  ;;  %v9873_v43 = vld [vmem:[%s12964_s2 + $0x3e0] sm:$0xff] }
 0x5d4   :  { %5543 = vmatpush.bf16.msra.mxu1 %v9873_v43  ;;  %v9820_v43 = vld [vmem:[#allocation2 + $0x2d8] sm:$0xff] }
 0x5d5   :  { %4976 = vmatmul.bf16.gmra.mxu1 %v9815_v45  ;;  %5364 = vmatmul.bf16.gmra.mxu3 %v9847_v22  ;;  %v4623_v14 = vadd.f32 %v12247_v9, %v4429_v48  ;;  %v9848_v9 = vld [vmem:[#allocation2 + $0xc8] sm:$0xff]  ;;  %v9819_v48 = vld [vmem:[#allocation2 + $0x258] sm:$0xff] }
 0x5d6   :  { %v9851_v45 = vld [vmem:[#allocation2 + $0x228] sm:$0xff] }
 0x5d8   :  { %v4783_v57 = vpop.f32.mrf.mxu3 }
 0x5d9   :  { %v12331_v3 = vadd.f32 %v4783_v57, %v4623_v14 }
 0x5da   :  { %v4397_v49 = vpop.f32.mrf.mxu1 }
 0x5db   :  { %v4430_v31 = vadd.f32 %v4397_v49, %v12185_v47 }
 0x5dd   :  { %v4624_v8 = vadd.f32 %v12273_v59, %v4430_v31  ;;  %v4599_v59 = vpop.f32.mrf.mxu2 }
 0x5e0   :  { %v4785_v26 = vpop.f32.mrf.mxu3 }
 0x5e1   :  { %v12335_v58 = vadd.f32 %v4785_v26, %v4624_v8 }
 0x5e2   :  { %v4400_v0 = vpop.f32.mrf.mxu1 }
 0x5e3   :  { %v4431_v62 = vadd.f32 %v4400_v0, %v12196_v51  ;;  %v9872_v51 = vld [vmem:[%s12964_s2 + $0x3d8] sm:$0xff]  ;;  %v9852_v0 = vld [vmem:[#allocation2 + $0x348] sm:$0xff] }
 0x5e4   :  { %5544 = vmatpush.bf16.msra.mxu1 %v9872_v51 }
 0x5e5   :  { %4981 = vmatmul.bf16.gmra.mxu1 %v9816_v27  ;;  %5369 = vmatmul.bf16.gmra.mxu3 %v9848_v9  ;;  %v4625_v61 = vadd.f32 %v12284_v60, %v4431_v62  ;;  %v9817_v60 = vld [vmem:[#allocation2 + $0x1a0] sm:$0xff]  ;;  %v12352_v25 = vpop.f32.mrf.mxu2 }
 0x5e8   :  { %v4788_v47 = vpop.f32.mrf.mxu3 }
 0x5e9   :  { %v12342_v12 = vadd.f32 %v4788_v47, %v4625_v61 }
 0x5ea   :  { %v4402_v34 = vpop.f32.mrf.mxu1 }
 0x5eb   :  { %v4432_v44 = vadd.f32 %v4402_v34, %v12203_v35 }
 0x5ed   :  { %v4626_v5 = vadd.f32 %v12293_v24, %v4432_v44  ;;  %v4604_v29 = vpop.f32.mrf.mxu2  ;;  %v9861_v44 = vld [vmem:[#allocation2 + $0x148] sm:$0xff] }
 0x5f0   :  { %v4790_v41 = vpop.f32.mrf.mxu3 }
 0x5f1   :  { %v12346_v11 = vadd.f32 %v4790_v41, %v4626_v5 }
 0x5f2   :  { %v4405_v19 = vpop.f32.mrf.mxu1 }
 0x5f3   :  { %v4433_v50 = vadd.f32 %v4405_v19, %v12219_v53  ;;  %v9871_v53 = vld [vmem:[%s12964_s2 + $0x3d0] sm:$0xff]  ;;  %v9862_v19 = vld [vmem:[#allocation2 + $0xf8] sm:$0xff] }
 0x5f4   :  { %5545 = vmatpush.bf16.msra.mxu1 %v9871_v53 }
 0x5f5   :  { %4986 = vmatmul.bf16.gmra.mxu1 %v9817_v60  ;;  %5374 = vmatmul.bf16.gmra.mxu3 %v9849_v1  ;;  %v4627_v35 = vadd.f32 %v4599_v59, %v4433_v50  ;;  %v12365_v52 = vpop.f32.mrf.mxu2 }
 0x5f8   :  { %v4793_v39 = vpop.f32.mrf.mxu3  ;;  %5546 = vmatpush.bf16.msra.mxu1 %v9870_v4  ;;  %v9889_v4 = vld [vmem:[%s12965_s3 + $0x60] sm:$0xff] }
 0x5f9   :  { %v12354_v24 = vadd.f32 %v4793_v39, %v4627_v35  ;;  %v9883_v39 = vld [vmem:[%s12965_s3 + $0x30] sm:$0xff] }
 0x5fa   :  { %v4407_v56 = vpop.f32.mrf.mxu1 }
 0x5fb   :  { %v12357_v21 = vadd.f32 %v4407_v56, %v12232_v13 }
 0x5fc   :  { %5547 = vmatpush.bf16.msra.mxu1 %v9869_v46  ;;  %v9878_v46 = vld [vmem:[%s12965_s3 + $0x8] sm:$0xff] }
 0x5fd   :  { %v4609_v6 = vpop.f32.mrf.mxu2 }
 0x600   :  { %v12359_v40 = vpop.f32.mrf.mxu3 }
 0x602   :  { %v4410_v16 = vpop.f32.mrf.mxu1 }
 0x603   :  { %v4435_v33 = vadd.f32 %v4410_v16, %v12251_v63 }
 0x605   :  { %4991 = vmatmul.bf16.gmra.mxu1 %v9818_v18  ;;  %5379 = vmatmul.bf16.gmra.mxu3 %v9850_v28  ;;  %v4629_v30 = vadd.f32 %v4604_v29, %v4435_v33  ;;  %v12386_v31 = vpop.f32.mrf.mxu2  ;;  %v9864_v29 = vld [vmem:[#allocation2] sm:$0xff]  ;;  %v9891_v33 = vld [vmem:[%s12965_s3 + $0x70] sm:$0xff]  ;;  %v9880_v18 = vld [vmem:[%s12965_s3 + $0x18] sm:$0xff] }
 0x606   :  { %v9890_v28 = vld [vmem:[%s12965_s3 + $0x68] sm:$0xff] }
 0x608   :  { %v4798_v13 = vpop.f32.mrf.mxu3 }
 0x609   :  { %v12367_v7 = vadd.f32 %v4798_v13, %v4629_v30  ;;  %v9865_v13 = vld [vmem:[#allocation2 + $0x298] sm:$0xff] }
 0x60a   :  { %v4412_v42 = vpop.f32.mrf.mxu1 }
 0x60b   :  { %v12370_v23 = vadd.f32 %v4412_v42, %v12265_v55  ;;  %v9879_v42 = vld [vmem:[%s12965_s3 + $0x10] sm:$0xff] }
 0x60d   :  { %v4614_v62 = vpop.f32.mrf.mxu2 }
 0x610   :  { %v12375_v63 = vpop.f32.mrf.mxu3 }
 0x612   :  { %v4415_v54 = vpop.f32.mrf.mxu1 }
 0x613   :  { %v4437_v17 = vadd.f32 %v4415_v54, %v12281_v2  ;;  %v9877_v54 = vld [vmem:[%s12965_s3] sm:$0xff] }
 0x615   :  { %4996 = vmatmul.bf16.gmra.mxu1 %v9819_v48  ;;  %5384 = vmatmul.bf16.gmra.mxu3 %v9851_v45  ;;  %v4631_v55 = vadd.f32 %v4609_v6, %v4437_v17  ;;  %v9887_v17 = vld [vmem:[%s12965_s3 + $0x50] sm:$0xff]  ;;  %v9900_v48 = vld [vmem:[%s12965_s3 + $0xb8] sm:$0xff]  ;;  %v9886_v45 = vld [vmem:[%s12965_s3 + $0x48] sm:$0xff] }
 0x618   :  { %v4803_v22 = vpop.f32.mrf.mxu3 }
 0x619   :  { %v12381_v14 = vadd.f32 %v4803_v22, %v4631_v55  ;;  %v9899_v55 = vld [vmem:[%s12965_s3 + $0xb0] sm:$0xff] }
 0x61a   :  { %v4417_v57 = vpop.f32.mrf.mxu1 }
 0x61b   :  { %v12384_v49 = vadd.f32 %v4417_v57, %v12288_v36 }
 0x620   :  { %v12388_v8 = vpop.f32.mrf.mxu3 }
 0x622   :  { %v4420_v26 = vpop.f32.mrf.mxu1 }
 0x623   :  { %v4439_v2 = vadd.f32 %v4420_v26, %v12298_v10  ;;  %v9866_v26 = vld [vmem:[#allocation2 + $0x270] sm:$0xff] }
 0x625   :  { %5001 = vmatmul.bf16.gmra.mxu1 %v9820_v43  ;;  %5389 = vmatmul.bf16.gmra.mxu3 %v9852_v0  ;;  %v4633_v27 = vadd.f32 %v4614_v62, %v4439_v2  ;;  %v9885_v2 = vld [vmem:[%s12965_s3 + $0x40] sm:$0xff]  ;;  %v9898_v43 = vld [vmem:[%s12965_s3 + $0xa8] sm:$0xff]  ;;  %v9908_v0 = vld [vmem:[%s12965_s3 + $0xf8] sm:$0xff]  ;;  %v12488_v62 = vpop.f32.mrf.mxu2 }
 0x628   :  { %v4808_v9 = vpop.f32.mrf.mxu3 }
 0x629   :  { %v12391_v61 = vadd.f32 %v4808_v9, %v4633_v27  ;;  %v9897_v27 = vld [vmem:[%s12965_s3 + $0xa0] sm:$0xff]  ;;  %v9907_v9 = vld [vmem:[%s12965_s3 + $0xf0] sm:$0xff] }
 0x62a   :  { %v4422_v47 = vpop.f32.mrf.mxu1 }
 0x62b   :  { %v12394_v36 = vadd.f32 %v4422_v47, %v12302_v32 }
 0x632   :  { %v4967_v59 = vpop.f32.mrf.mxu1 }
 0x633   :  { %v12397_v34 = vadd.f32 %v4967_v59, %v12309_v38  ;;  %v9884_v38 = vld [vmem:[%s12965_s3 + $0x38] sm:$0xff] }
 0x634   :  { %6711 = vmatpush.bf16.msra.mxu2 %v9884_v38  ;;  %v9896_v59 = vld [vmem:[%s12965_s3 + $0x98] sm:$0xff] }
 0x635   :  { %5548 = vmatmul.bf16.vlgmr.msra.gmra.mxu1 %v9861_v44  ;;  %v9906_v44 = vld [vmem:[%s12965_s3 + $0xe8] sm:$0xff] }
 0x638   :  { %6712 = vmatpush.bf16.msra.mxu2 %v9883_v39  ;;  %v9948_v39 = vld [vmem:[%s12965_s3 + $0x238] sm:$0xff] }
 0x639   :  { %6815 = vmatpush.bf16.msrb.mxu1 %v9948_v39 }
 0x63a   :  { %v4969_v10 = vpop.f32.mrf.mxu1 }
 0x63b   :  { %v12400_v5 = vadd.f32 %v4969_v10, %v12313_v15  ;;  %v9863_v15 = vld [vmem:[#allocation2 + $0x68] sm:$0xff]  ;;  %v5161_v10 = vpop.f32.mrf.mxu2 }
 0x642   :  { %v4972_v41 = vpop.f32.mrf.mxu1 }
 0x643   :  { %v12403_v51 = vadd.f32 %v4972_v41, %v12320_v37  ;;  %v9895_v41 = vld [vmem:[%s12965_s3 + $0x90] sm:$0xff] }
 0x645   :  { %5553 = vmatmul.bf16.gmra.mxu1 %v9862_v19  ;;  %v9905_v19 = vld [vmem:[%s12965_s3 + $0xe0] sm:$0xff] }
 0x64a   :  { %v4974_v50 = vpop.f32.mrf.mxu1 }
 0x64b   :  { %v12406_v32 = vadd.f32 %v4974_v50, %v12324_v20  ;;  %v9892_v20 = vld [vmem:[%s12965_s3 + $0x78] sm:$0xff] }
 0x64c   :  { %6724 = vmatpush.bf16.msra.mxu3 %v9892_v20  ;;  %v9904_v20 = vld [vmem:[%s12965_s3 + $0xd8] sm:$0xff] }
 0x650   :  { %6725 = vmatpush.bf16.msra.mxu3 %v9891_v33  ;;  %v9902_v33 = vld [vmem:[%s12965_s3 + $0xc8] sm:$0xff] }
 0x652   :  { %v4977_v60 = vpop.f32.mrf.mxu1 }
 0x653   :  { %v12412_v1 = vadd.f32 %v4977_v60, %v12331_v3 }
 0x654   :  { %6726 = vmatpush.bf16.msra.mxu3 %v9890_v28 }
 0x655   :  { %5558 = vmatmul.bf16.gmra.mxu1 %v9863_v15  ;;  %v9867_v15 = vld [vmem:[#allocation2 + $0x310] sm:$0xff] }
 0x658   :  { %6727 = vmatpush.bf16.msra.mxu3 %v9889_v4  ;;  %v9947_v4 = vld [vmem:[%s12965_s3 + $0x230] sm:$0xff] }
 0x659   :  { %6816 = vmatpush.bf16.msrb.mxu1 %v9947_v4  ;;  %v9912_v4 = vld [vmem:[%s12965_s3 + $0x118] sm:$0xff] }
 0x65a   :  { %v4979_v35 = vpop.f32.mrf.mxu1 }
 0x65b   :  { %v12415_v37 = vadd.f32 %v4979_v35, %v12335_v58  ;;  %v9882_v58 = vld [vmem:[%s12965_s3 + $0x28] sm:$0xff] }
 0x65c   :  { %6713 = vmatpush.bf16.msra.mxu2 %v9882_v58  ;;  %v9894_v35 = vld [vmem:[%s12965_s3 + $0x88] sm:$0xff]  ;;  %v5163_v58 = vpop.f32.mrf.mxu2 }
 0x662   :  { %v4982_v56 = vpop.f32.mrf.mxu1 }
 0x663   :  { %v12424_v3 = vadd.f32 %v4982_v56, %v12342_v12  ;;  %v9881_v12 = vld [vmem:[%s12965_s3 + $0x20] sm:$0xff]  ;;  %v9903_v56 = vld [vmem:[%s12965_s3 + $0xd0] sm:$0xff] }
 0x664   :  { %6714 = vmatpush.bf16.msra.mxu2 %v9881_v12  ;;  %v9901_v12 = vld [vmem:[%s12965_s3 + $0xc0] sm:$0xff] }
 0x665   :  { %5563 = vmatmul.bf16.gmra.mxu1 %v9864_v29 }
 0x668   :  { %6715 = vmatpush.bf16.msra.mxu2 %v9880_v18 }
 0x66a   :  { %v4984_v53 = vpop.f32.mrf.mxu1 }
 0x66b   :  { %v12430_v16 = vadd.f32 %v4984_v53, %v12346_v11 }
 0x66c   :  { %6716 = vmatpush.bf16.msra.mxu2 %v9879_v42 }
 0x670   :  { %6717 = vmatpush.bf16.msra.mxu2 %v9878_v46 }
 0x672   :  { %v4987_v11 = vpop.f32.mrf.mxu1 }
 0x673   :  { %v12445_v30 = vadd.f32 %v4987_v11, %v12354_v24  ;;  %v9888_v24 = vld [vmem:[%s12965_s3 + $0x58] sm:$0xff]  ;;  %v9868_v11 = vld [vmem:[#allocation2 + $0x190] sm:$0xff] }
 0x674   :  { %6728 = vmatpush.bf16.msra.mxu3 %v9888_v24  ;;  %6718 = vmatpush.bf16.msra.mxu2 %v9877_v54  ;;  %v5201_v54 = vadd.f32 %v5161_v10, %v12397_v34 }
 0x675   :  { %5568 = vmatmul.bf16.gmra.mxu1 %v9865_v13  ;;  %v5166_v13 = vpop.f32.mrf.mxu2 }
 0x678   :  { %6729 = vmatpush.bf16.msra.mxu3 %v9887_v17  ;;  %6737 = vmatpush.bf16.msrb.mxu2 %v9900_v48 }
 0x67a   :  { %v12459_v6 = vpop.f32.mrf.mxu1 }
 0x67c   :  { %6730 = vmatpush.bf16.msra.mxu3 %v9886_v45  ;;  %6738 = vmatpush.bf16.msrb.mxu2 %v9899_v55 }
 0x67d   :  { %v5168_v24 = vpop.f32.mrf.mxu2 }
 0x680   :  { %6731 = vmatpush.bf16.msra.mxu3 %v9885_v2  ;;  %6739 = vmatpush.bf16.msrb.mxu2 %v9898_v43  ;;  %v9916_v43 = vld [vmem:[%s12965_s3 + $0x138] sm:$0xff] }
 0x682   :  { %v4992_v22 = vpop.f32.mrf.mxu1 }
 0x683   :  { %v12477_v57 = vadd.f32 %v4992_v22, %v12367_v7  ;;  %v12490_v7 = vpop.f32.mrf.mxu3 }
 0x684   :  { %6750 = vmatpush.bf16.msrb.mxu3 %v9908_v0  ;;  %6740 = vmatpush.bf16.msrb.mxu2 %v9897_v27 }
 0x685   :  { %5573 = vmatmul.bf16.gmra.mxu1 %v9866_v26  ;;  %v5202_v26 = vadd.f32 %v5163_v58, %v12400_v5  ;;  %v5171_v0 = vpop.f32.mrf.mxu2  ;;  %v9915_v5 = vld [vmem:[%s12965_s3 + $0x130] sm:$0xff] }
 0x688   :  { %6751 = vmatpush.bf16.msrb.mxu3 %v9907_v9  ;;  %6741 = vmatpush.bf16.msrb.mxu2 %v9896_v59  ;;  %v9946_v9 = vld [vmem:[%s12965_s3 + $0x228] sm:$0xff] }
 0x689   :  { %6817 = vmatpush.bf16.msrb.mxu1 %v9946_v9  ;;  %v5205_v9 = vadd.f32 %v5171_v0, %v12412_v1  ;;  %v9971_v1 = vld [vmem:[%s12965_s3 + $0x2f0] sm:$0xff] }
 0x68a   :  { %v12498_v47 = vpop.f32.mrf.mxu1 }
 0x68b   :  { %v5355_v50 = vpop.f32.mrf.mxu3 }
 0x68c   :  { %6752 = vmatpush.bf16.msrb.mxu3 %v9906_v44  ;;  %6742 = vmatpush.bf16.msrb.mxu2 %v9895_v41  ;;  %v5395_v48 = vadd.f32 %v5355_v50, %v5201_v54  ;;  %v5203_v50 = vadd.f32 %v5166_v13, %v12403_v51  ;;  %v5204_v13 = vadd.f32 %v5168_v24, %v12406_v32  ;;  %v9922_v54 = vld [vmem:[%s12965_s3 + $0x168] sm:$0xff]  ;;  %v9911_v24 = vld [vmem:[%s12965_s3 + $0x110] sm:$0xff] }
 0x68d   :  { %v5173_v58 = vpop.f32.mrf.mxu2 }
 0x690   :  { %6753 = vmatpush.bf16.msrb.mxu3 %v9905_v19  ;;  %6743 = vmatpush.bf16.msrb.mxu2 %v9894_v35  ;;  %v9945_v19 = vld [vmem:[%s12965_s3 + $0x220] sm:$0xff]  ;;  %v9924_v35 = vld [vmem:[%s12965_s3 + $0x178] sm:$0xff] }
 0x691   :  { %6818 = vmatpush.bf16.msrb.mxu1 %v9945_v19 }
 0x692   :  { %v4997_v38 = vpop.f32.mrf.mxu1 }
 0x693   :  { %v12513_v60 = vadd.f32 %v4997_v38, %v12381_v14  ;;  %v9893_v14 = vld [vmem:[%s12965_s3 + $0x80] sm:$0xff]  ;;  %v5357_v53 = vpop.f32.mrf.mxu3 }
 0x694   :  { %6754 = vmatpush.bf16.msrb.mxu3 %v9904_v20  ;;  %6744 = vmatpush.bf16.msrb.mxu2 %v9893_v14  ;;  %v5396_v34 = vadd.f32 %v5357_v53, %v5202_v26  ;;  %v9944_v14 = vld [vmem:[%s12965_s3 + $0x218] sm:$0xff]  ;;  %v9921_v26 = vld [vmem:[%s12965_s3 + $0x160] sm:$0xff] }
 0x695   :  { %5578 = vmatmul.bf16.gmra.mxu1 %v9867_v15  ;;  %v9914_v15 = vld [vmem:[%s12965_s3 + $0x128] sm:$0xff] }
 0x696   :  { %6819 = vmatpush.bf16.msrb.mxu1 %v9944_v14  ;;  %v5206_v14 = vadd.f32 %v5173_v58, %v12415_v37  ;;  %v9969_v37 = vld [vmem:[%s12965_s3 + $0x2e0] sm:$0xff] }
 0x698   :  { %6755 = vmatpush.bf16.msrb.mxu3 %v9903_v56 }
 0x69a   :  { %v12530_v29 = vpop.f32.mrf.mxu1 }
 0x69b   :  { %v5360_v42 = vpop.f32.mrf.mxu3 }
 0x69c   :  { %6756 = vmatpush.bf16.msrb.mxu3 %v9902_v33  ;;  %v5397_v20 = vadd.f32 %v5360_v42, %v5203_v50  ;;  %v9913_v33 = vld [vmem:[%s12965_s3 + $0x120] sm:$0xff] }
 0x6a0   :  { %6757 = vmatpush.bf16.msrb.mxu3 %v9901_v12  ;;  %v9923_v12 = vld [vmem:[%s12965_s3 + $0x170] sm:$0xff] }
 0x6a2   :  { %v5002_v18 = vpop.f32.mrf.mxu1 }
 0x6a3   :  { %v12539_v28 = vadd.f32 %v5002_v18, %v12391_v61  ;;  %v5362_v17 = vpop.f32.mrf.mxu3  ;;  %v12550_v61 = vld [vmem:[%s12962_s5 + $0x1] ss:$0 sm:$0xff] }
 0x6a5   :  { %5583 = vmatmul.bf16.gmra.mxu1 %v9868_v11  ;;  %v9943_v11 = vld [vmem:[%s12965_s3 + $0x210] sm:$0xff] }
 0x6a6   :  { %6820 = vmatpush.bf16.msrb.mxu1 %v9943_v11  ;;  %v9931_v11 = vld [vmem:[%s12965_s3 + $0x1b0] sm:$0xff] }
 0x6aa   :  { %v12544_v46 = vpop.f32.mrf.mxu1 }
 0x6ab   :  { %v5365_v59 = vpop.f32.mrf.mxu3 }
 0x6b2   :  { %v5549_v45 = vpop.f32.mrf.mxu1 }
 0x6b3   :  { %v5589_v55 = vadd.f32 %v5549_v45, %v5395_v48  ;;  %v5367_v53 = vpop.f32.mrf.mxu3  ;;  %v5398_v48 = vadd.f32 %v5362_v17, %v5204_v13  ;;  %v12603_v17 = vpop.f32.mrf.mxu2 }
 0x6b5   :  { %v5606_v22 = vadd.f32 %v12550_v61, %v5589_v55  ;;  %v9942_v55 = vld [vmem:[%s12965_s3 + $0x208] sm:$0xff] }
 0x6b6   :  { %6821 = vmatpush.bf16.msrb.mxu1 %v9942_v55 }
 0x6b7   :  { %v5607_v2 = vmax.f32 %v5606_v22, 0.0 }
 0x6b9   :  { %v5670_v27 = vpack.c.bf16 %v5607_v2, %v5607_v2 }
 0x6ba   :  { %v5551_v44 = vpop.f32.mrf.mxu1 }
 0x6bb   :  { %v5590_v10 = vadd.f32 %v5551_v44, %v5396_v34  ;;  %6719 = vmatmul.bf16.vlgmr.msra.gmra.mxu2 %v5670_v27  ;;  %v12609_v34 = vpop.f32.mrf.mxu3  ;;  %v9972_v27 = vld [vmem:[%s12965_s3 + $0x2f8] sm:$0xff] }
 0x6bc   :  { %6763 = vmatpush.bf16.msra.mxu2 %v9916_v43  ;;  %v9941_v43 = vld [vmem:[%s12965_s3 + $0x200] sm:$0xff] }
 0x6bd   :  { %v5609_v41 = vadd.f32 %v12550_v61, %v5590_v10  ;;  %6822 = vmatpush.bf16.msrb.mxu1 %v9941_v43  ;;  %v9910_v10 = vld [vmem:[%s12965_s3 + $0x108] sm:$0xff]  ;;  %v9967_v43 = vld [vmem:[%s12965_s3 + $0x2d0] sm:$0xff] }
 0x6bf   :  { %v5610_v38 = vmax.f32 %v5609_v41, 0.0  ;;  %v5399_v41 = vadd.f32 %v5365_v59, %v5205_v9  ;;  %v9938_v9 = vld [vmem:[%s12965_s3 + $0x1e8] sm:$0xff] }
 0x6c0   :  { %6764 = vmatpush.bf16.msra.mxu2 %v9915_v5  ;;  %v9920_v5 = vld [vmem:[%s12965_s3 + $0x158] sm:$0xff] }
 0x6c1   :  { %v5671_v39 = vpack.c.bf16 %v5610_v38, %v5610_v38  ;;  %6854 = vmatpush.bf16.msra.mxu1 %v9972_v27  ;;  %v9909_v38 = vld [vmem:[%s12965_s3 + $0x100] sm:$0xff]  ;;  %v9928_v27 = vld [vmem:[%s12965_s3 + $0x198] sm:$0xff] }
 0x6c2   :  { %v5554_v56 = vpop.f32.mrf.mxu1 }
 0x6c3   :  { %v5591_v51 = vadd.f32 %v5554_v56, %v5397_v20  ;;  %6732 = vmatmul.bf16.vlgmr.msra.gmra.mxu3 %v5671_v39  ;;  %v9970_v20 = vld [vmem:[%s12965_s3 + $0x2e8] sm:$0xff]  ;;  %v5178_v39 = vpop.f32.mrf.mxu2 }
 0x6c4   :  { %6765 = vmatpush.bf16.msra.mxu2 %v9914_v15  ;;  %6776 = vmatpush.bf16.msra.mxu3 %v9924_v35  ;;  %v9919_v15 = vld [vmem:[%s12965_s3 + $0x150] sm:$0xff]  ;;  %v9932_v35 = vld [vmem:[%s12965_s3 + $0x1b8] sm:$0xff] }
 0x6c5   :  { %v5612_v18 = vadd.f32 %v12550_v61, %v5591_v51  ;;  %6855 = vmatpush.bf16.msra.mxu1 %v9971_v1  ;;  %v5372_v51 = vpop.f32.mrf.mxu3 }
 0x6c7   :  { %v5613_v42 = vmax.f32 %v5612_v18, 0.0 }
 0x6c8   :  { %6766 = vmatpush.bf16.msra.mxu2 %v9913_v33  ;;  %6777 = vmatpush.bf16.msra.mxu3 %v9923_v12  ;;  %v9918_v33 = vld [vmem:[%s12965_s3 + $0x148] sm:$0xff]  ;;  %v5400_v12 = vadd.f32 %v5367_v53, %v5206_v14 }
 0x6c9   :  { %v5672_v45 = vpack.c.bf16 %v5613_v42, %v5613_v42  ;;  %6856 = vmatpush.bf16.msra.mxu1 %v9970_v20  ;;  %v9917_v42 = vld [vmem:[%s12965_s3 + $0x140] sm:$0xff] }
 0x6ca   :  { %v5556_v22 = vpop.f32.mrf.mxu1 }
 0x6cb   :  { %v5592_v32 = vadd.f32 %v5556_v22, %v5398_v48  ;;  %6745 = vmatmul.bf16.vlgmr.msrb.gmra.mxu2 %v5672_v45  ;;  %v9968_v48 = vld [vmem:[%s12965_s3 + $0x2d8] sm:$0xff]  ;;  %v5181_v55 = vpop.f32.mrf.mxu2 }
 0x6cc   :  { %6767 = vmatpush.bf16.msra.mxu2 %v9912_v4  ;;  %6778 = vmatpush.bf16.msra.mxu3 %v9922_v54  ;;  %v9930_v4 = vld [vmem:[%s12965_s3 + $0x1a8] sm:$0xff]  ;;  %v9940_v54 = vld [vmem:[%s12965_s3 + $0x1f8] sm:$0xff] }
 0x6cd   :  { %v5615_v2 = vadd.f32 %v12550_v61, %v5592_v32  ;;  %6857 = vmatpush.bf16.msra.mxu1 %v9969_v37  ;;  %v9929_v32 = vld [vmem:[%s12965_s3 + $0x1a0] sm:$0xff] }
 0x6cf   :  { %v5616_v44 = vmax.f32 %v5615_v2, 0.0 }
 0x6d0   :  { %6768 = vmatpush.bf16.msra.mxu2 %v9911_v24  ;;  %6779 = vmatpush.bf16.msra.mxu3 %v9921_v26  ;;  %v9939_v24 = vld [vmem:[%s12965_s3 + $0x1f0] sm:$0xff]  ;;  %v5375_v26 = vpop.f32.mrf.mxu3 }
 0x6d1   :  { %v5673_v19 = vpack.c.bf16 %v5616_v44, %v5616_v44  ;;  %6858 = vmatpush.bf16.msra.mxu1 %v9968_v48  ;;  %v5207_v44 = vadd.f32 %v12603_v17, %v12424_v3  ;;  %v9965_v3 = vld [vmem:[%s12965_s3 + $0x2c0] sm:$0xff] }
 0x6d2   :  { %v5559_v50 = vpop.f32.mrf.mxu1 }
 0x6d3   :  { %v5593_v0 = vadd.f32 %v5559_v50, %v5399_v41  ;;  %6758 = vmatmul.bf16.vlgmr.msrb.gmra.mxu3 %v5673_v19  ;;  %v9927_v41 = vld [vmem:[%s12965_s3 + $0x190] sm:$0xff]  ;;  %v9937_v19 = vld [vmem:[%s12965_s3 + $0x1e0] sm:$0xff]  ;;  %v12690_v17 = vpop.f32.mrf.mxu2 }
 0x6d4   :  { %6769 = vmatpush.bf16.msra.mxu2 %v9910_v10  ;;  %6780 = vmatpush.bf16.msra.mxu3 %v9920_v5  ;;  %v9966_v10 = vld [vmem:[%s12965_s3 + $0x2c8] sm:$0xff]  ;;  %v5401_v5 = vadd.f32 %v12609_v34, %v5207_v44 }
 0x6d5   :  { %v5618_v59 = vadd.f32 %v12550_v61, %v5593_v0  ;;  %6859 = vmatpush.bf16.msra.mxu1 %v9967_v43  ;;  %v9926_v0 = vld [vmem:[%s12965_s3 + $0x188] sm:$0xff] }
 0x6d7   :  { %v5619_v56 = vmax.f32 %v5618_v59, 0.0 }
 0x6d8   :  { %6770 = vmatpush.bf16.msra.mxu2 %v9909_v38  ;;  %6781 = vmatpush.bf16.msra.mxu3 %v9919_v15  ;;  %v12692_v34 = vpop.f32.mrf.mxu3  ;;  %v9936_v38 = vld [vmem:[%s12965_s3 + $0x1d8] sm:$0xff]  ;;  %v5208_v15 = vadd.f32 %v5178_v39, %v12430_v16 }
 0x6d9   :  { %v5674_v18 = vpack.c.bf16 %v5619_v56, %v5619_v56  ;;  %6860 = vmatpush.bf16.msra.mxu1 %v9966_v10  ;;  %v9925_v56 = vld [vmem:[%s12965_s3 + $0x180] sm:$0xff]  ;;  %v9956_v39 = vld [vmem:[%s12965_s3 + $0x278] sm:$0xff] }
 0x6da   :  { %v5561_v13 = vpop.f32.mrf.mxu1  ;;  %v5402_v20 = vadd.f32 %v5372_v51, %v5208_v15 }
 0x6db   :  { %v5594_v58 = vadd.f32 %v5561_v13, %v5400_v12  ;;  %6771 = vmatmul.bf16.vlgmr.msra.gmra.mxu2 %v5674_v18  ;;  %v12712_v51 = vpop.f32.mrf.mxu2  ;;  %v9934_v13 = vld [vmem:[%s12965_s3 + $0x1c8] sm:$0xff] }
 0x6dc   :  { %6789 = vmatpush.bf16.msrb.mxu2 %v9932_v35  ;;  %6782 = vmatpush.bf16.msra.mxu3 %v9918_v33  ;;  %v5209_v35 = vadd.f32 %v5181_v55, %v12445_v30  ;;  %v9935_v33 = vld [vmem:[%s12965_s3 + $0x1d0] sm:$0xff] }
 0x6dd   :  { %v5621_v53 = vadd.f32 %v12550_v61, %v5594_v58  ;;  %6861 = vmatpush.bf16.msra.mxu1 %v9965_v3  ;;  %v9951_v3 = vld [vmem:[%s12965_s3 + $0x250] sm:$0xff] }
 0x6de   :  { %v5403_v14 = vadd.f32 %v5375_v26, %v5209_v35  ;;  %v4628_v26 = vadd.f32 %v12352_v25, %v12357_v21  ;;  %v9963_v25 = vld [vmem:[%s12965_s3 + $0x2b0] sm:$0xff]  ;;  %v4630_v21 = vadd.f32 %v12365_v52, %v12370_v23  ;;  %v9962_v52 = vld [vmem:[%s12965_s3 + $0x2a8] sm:$0xff] }
 0x6df   :  { %v5622_v45 = vmax.f32 %v5621_v53, 0.0  ;;  %v9955_v53 = vld [vmem:[%s12965_s3 + $0x270] sm:$0xff] }
 0x6e0   :  { %6790 = vmatpush.bf16.msrb.mxu2 %v9931_v11  ;;  %6783 = vmatpush.bf16.msra.mxu3 %v9917_v42  ;;  %v12718_v37 = vpop.f32.mrf.mxu3  ;;  %v4822_v43 = vadd.f32 %v12359_v40, %v4628_v26  ;;  %v9994_v40 = vld [vmem:[%s12965_s3 + $0x3a8] sm:$0xff] }
 0x6e1   :  { %v5675_v22 = vpack.c.bf16 %v5622_v45, %v5622_v45  ;;  %v9933_v45 = vld [vmem:[%s12965_s3 + $0x1c0] sm:$0xff] }
 0x6e2   :  { %v5564_v2 = vpop.f32.mrf.mxu1  ;;  %v5016_v10 = vadd.f32 %v12459_v6, %v4822_v43  ;;  %v9988_v43 = vld [vmem:[%s12965_s3 + $0x378] sm:$0xff] }
 0x6e3   :  { %6784 = vmatmul.bf16.vlgmr.msra.gmra.mxu3 %v5675_v22  ;;  %v5595_v50 = vadd.f32 %v5564_v2, %v5401_v5  ;;  %v9995_v2 = vld [vmem:[%s12965_s3 + $0x3b0] sm:$0xff]  ;;  %v5188_v44 = vpop.f32.mrf.mxu2 }
 0x6e4   :  { %6791 = vmatpush.bf16.msrb.mxu2 %v9930_v4  ;;  %6802 = vmatpush.bf16.msrb.mxu3 %v9940_v54  ;;  %v9996_v54 = vld [vmem:[%s12965_s3 + $0x3b8] sm:$0xff]  ;;  %v5210_v23 = vadd.f32 %v12690_v17, %v5016_v10 }
 0x6e5   :  { %v5624_v59 = vadd.f32 %v12550_v61, %v5595_v50  ;;  %v9952_v50 = vld [vmem:[%s12965_s3 + $0x258] sm:$0xff] }
 0x6e7   :  { %v5625_v12 = vmax.f32 %v5624_v59, 0.0 }
 0x6e8   :  { %6792 = vmatpush.bf16.msrb.mxu2 %v9929_v32  ;;  %6803 = vmatpush.bf16.msrb.mxu3 %v9939_v24  ;;  %v9954_v32 = vld [vmem:[%s12965_s3 + $0x268] sm:$0xff]  ;;  %v9964_v24 = vld [vmem:[%s12965_s3 + $0x2b8] sm:$0xff]  ;;  %v5382_v5 = vpop.f32.mrf.mxu3 }
 0x6e9   :  { %v5676_v58 = vpack.c.bf16 %v5625_v12, %v5625_v12 }
 0x6ea   :  { %v5566_v1 = vpop.f32.mrf.mxu1 }
 0x6eb   :  { %v5596_v18 = vadd.f32 %v5566_v1, %v5402_v20  ;;  %v5404_v1 = vadd.f32 %v12692_v34, %v5210_v23  ;;  %v12776_v15 = vpop.f32.mrf.mxu2  ;;  %v9950_v20 = vld [vmem:[%s12965_s3 + $0x248] sm:$0xff] }
 0x6ec   :  { %6793 = vmatpush.bf16.msrb.mxu2 %v9928_v27  ;;  %6804 = vmatpush.bf16.msrb.mxu3 %v9938_v9  ;;  %v9953_v9 = vld [vmem:[%s12965_s3 + $0x260] sm:$0xff] }
 0x6ed   :  { %v5627_v42 = vadd.f32 %v12550_v61, %v5596_v18  ;;  %v9991_v18 = vld [vmem:[%s12965_s3 + $0x390] sm:$0xff] }
 0x6ef   :  { %v5628_v55 = vmax.f32 %v5627_v42, 0.0 }
 0x6f0   :  { %6794 = vmatpush.bf16.msrb.mxu2 %v9927_v41  ;;  %6805 = vmatpush.bf16.msrb.mxu3 %v9937_v19  ;;  %v4824_v41 = vadd.f32 %v12375_v63, %v4630_v21  ;;  %v9993_v63 = vld [vmem:[%s12965_s3 + $0x3a0] sm:$0xff]  ;;  %v12778_v59 = vpop.f32.mrf.mxu3  ;;  %v9987_v21 = vld [vmem:[%s12965_s3 + $0x370] sm:$0xff] }
 0x6f1   :  { %v5677_v27 = vpack.c.bf16 %v5628_v55, %v5628_v55 }
 0x6f2   :  { %v5569_v16 = vpop.f32.mrf.mxu1  ;;  %v5018_v6 = vadd.f32 %v12498_v47, %v4824_v41  ;;  %v9992_v47 = vld [vmem:[%s12965_s3 + $0x398] sm:$0xff]  ;;  %v9986_v41 = vld [vmem:[%s12965_s3 + $0x368] sm:$0xff] }
 0x6f3   :  { %v5597_v30 = vadd.f32 %v5569_v16, %v5403_v14  ;;  %v9960_v14 = vld [vmem:[%s12965_s3 + $0x298] sm:$0xff]  ;;  %v5193_v55 = vpop.f32.mrf.mxu2 }
 0x6f4   :  { %6795 = vmatpush.bf16.msrb.mxu2 %v9926_v0  ;;  %6806 = vmatpush.bf16.msrb.mxu3 %v9936_v38  ;;  %v9961_v0 = vld [vmem:[%s12965_s3 + $0x2a0] sm:$0xff]  ;;  %v5212_v17 = vadd.f32 %v5188_v44, %v5018_v6 }
 0x6f5   :  { %v5630_v11 = vadd.f32 %v12550_v61, %v5597_v30  ;;  %v9949_v30 = vld [vmem:[%s12965_s3 + $0x240] sm:$0xff] }
 0x6f6   :  { %v5406_v34 = vadd.f32 %v5382_v5, %v5212_v17  ;;  %v9984_v17 = vld [vmem:[%s12965_s3 + $0x358] sm:$0xff] }
 0x6f7   :  { %v5631_v4 = vmax.f32 %v5630_v11, 0.0 }
 0x6f8   :  { %6796 = vmatpush.bf16.msrb.mxu2 %v9925_v56  ;;  %6807 = vmatpush.bf16.msrb.mxu3 %v9935_v33  ;;  %v5211_v56 = vadd.f32 %v12712_v51, %v12477_v57  ;;  %v9959_v57 = vld [vmem:[%s12965_s3 + $0x290] sm:$0xff] }
 0x6f9   :  { %v5678_v48 = vpack.c.bf16 %v5631_v4, %v5631_v4  ;;  %v9958_v4 = vld [vmem:[%s12965_s3 + $0x288] sm:$0xff] }
 0x6fa   :  { %v5571_v22 = vpop.f32.mrf.mxu1  ;;  %v5405_v16 = vadd.f32 %v12718_v37, %v5211_v56  ;;  %v9990_v37 = vld [vmem:[%s12965_s3 + $0x388] sm:$0xff] }
 0x6fb   :  { %6797 = vmatmul.bf16.vlgmr.msrb.gmra.mxu2 %v5676_v58  ;;  %6823 = vmatmul.bf16.vlgmr.msrb.gmra.mxu1 %v5678_v48  ;;  %v5598_v38 = vadd.f32 %v5571_v22, %v5404_v1  ;;  %v9980_v58 = vld [vmem:[%s12965_s3 + $0x338] sm:$0xff]  ;;  %v5387_v22 = vpop.f32.mrf.mxu3  ;;  %v5196_v44 = vpop.f32.mrf.mxu2  ;;  %v9975_v1 = vld [vmem:[%s12965_s3 + $0x310] sm:$0xff]  ;;  %v9982_v56 = vld [vmem:[%s12965_s3 + $0x348] sm:$0xff] }
 0x6fc   :  { %6828 = vmatpush.bf16.msra.mxu2 %v9956_v39  ;;  %6808 = vmatpush.bf16.msrb.mxu3 %v9934_v13  ;;  %v5215_v5 = vadd.f32 %v5196_v44, %v12539_v28 }
 0x6fd   :  { %6893 = vmatpush.bf16.msrb.mxu1 %v9996_v54  ;;  %v5633_v33 = vadd.f32 %v12550_v61, %v5598_v38 }
 0x6ff   :  { %v5634_v51 = vmax.f32 %v5633_v33, 0.0 }
 0x700   :  { %6829 = vmatpush.bf16.msra.mxu2 %v9955_v53  ;;  %6809 = vmatpush.bf16.msrb.mxu3 %v9933_v45  ;;  %v9979_v45 = vld [vmem:[%s12965_s3 + $0x330] sm:$0xff] }
 0x701   :  { %6894 = vmatpush.bf16.msrb.mxu1 %v9995_v2  ;;  %v5679_v54 = vpack.c.bf16 %v5634_v51, %v5634_v51  ;;  %v9978_v2 = vld [vmem:[%s12965_s3 + $0x328] sm:$0xff] }
 0x702   :  { %v5574_v19 = vpop.f32.mrf.mxu1 }
 0x703   :  { %6810 = vmatmul.bf16.vlgmr.msrb.gmra.mxu3 %v5677_v27  ;;  %v5599_v11 = vadd.f32 %v5574_v19, %v5405_v16  ;;  %v5390_v10 = vpop.f32.mrf.mxu3  ;;  %v4632_v19 = vadd.f32 %v12386_v31, %v12384_v49  ;;  %v9985_v49 = vld [vmem:[%s12965_s3 + $0x360] sm:$0xff]  ;;  %v5198_v51 = vpop.f32.mrf.mxu2 }
 0x704   :  { %6830 = vmatpush.bf16.msra.mxu2 %v9954_v32  ;;  %6841 = vmatpush.bf16.msra.mxu3 %v9964_v24  ;;  %v9989_v32 = vld [vmem:[%s12965_s3 + $0x380] sm:$0xff] }
 0x705   :  { %6895 = vmatpush.bf16.msrb.mxu1 %v9994_v40  ;;  %v5636_v48 = vadd.f32 %v12550_v61, %v5599_v11  ;;  %v9957_v24 = vld [vmem:[%s12965_s3 + $0x280] sm:$0xff]  ;;  %v9976_v40 = vld [vmem:[%s12965_s3 + $0x318] sm:$0xff]  ;;  %v4826_v23 = vadd.f32 %v12388_v8, %v4632_v19 }
 0x706   :  { %v9981_v16 = vld [vmem:[%s12965_s3 + $0x340] sm:$0xff] }
 0x707   :  { %v5637_v26 = vmax.f32 %v5636_v48, 0.0  ;;  %v5020_v31 = vadd.f32 %v12530_v29, %v4826_v23  ;;  %v9973_v29 = vld [vmem:[%s12965_s3 + $0x300] sm:$0xff] }
 0x708   :  { %6831 = vmatpush.bf16.msra.mxu2 %v9953_v9  ;;  %6842 = vmatpush.bf16.msra.mxu3 %v9963_v25  ;;  %v9977_v25 = vld [vmem:[%s12965_s3 + $0x320] sm:$0xff] }
 0x709   :  { %6896 = vmatpush.bf16.msrb.mxu1 %v9993_v63  ;;  %v5680_v9 = vpack.c.bf16 %v5637_v26, %v5637_v26  ;;  %v5214_v38 = vadd.f32 %v5193_v55, %v5020_v31 }
 0x70a   :  { %v5576_v35 = vpop.f32.mrf.mxu1 }
 0x70b   :  { %v5600_v12 = vadd.f32 %v5576_v35, %v5406_v34  ;;  %v5408_v34 = vadd.f32 %v5387_v22, %v5214_v38 }
 0x70c   :  { %6832 = vmatpush.bf16.msra.mxu2 %v9952_v50  ;;  %6843 = vmatpush.bf16.msra.mxu3 %v9962_v52  ;;  %v5213_v50 = vadd.f32 %v12776_v15, %v12513_v60  ;;  %v5409_v52 = vadd.f32 %v5390_v10, %v5215_v5 }
 0x70d   :  { %6897 = vmatpush.bf16.msrb.mxu1 %v9992_v47  ;;  %v5639_v39 = vadd.f32 %v12550_v61, %v5600_v12 }
 0x70e   :  { %v5407_v28 = vadd.f32 %v12778_v59, %v5213_v50  ;;  %v9983_v59 = vld [vmem:[%s12965_s3 + $0x350] sm:$0xff] }
 0x70f   :  { %v5640_v13 = vmax.f32 %v5639_v39, 0.0 }
 0x710   :  { %6833 = vmatpush.bf16.msra.mxu2 %v9951_v3  ;;  %6844 = vmatpush.bf16.msra.mxu3 %v9961_v0  ;;  %v9974_v0 = vld [vmem:[%s12965_s3 + $0x308] sm:$0xff] }
 0x711   :  { %6898 = vmatpush.bf16.msrb.mxu1 %v9991_v18  ;;  %v5681_v42 = vpack.c.bf16 %v5640_v13, %v5640_v13  ;;  %v10003_v18 = vld [vmem:[%s12965_s3 + $0x3f0] sm:$0xff] }
 0x712   :  { %v5579_v53 = vpop.f32.mrf.mxu1 }
 0x713   :  { %6862 = vmatmul.bf16.vlgmr.msra.gmra.mxu1 %v5681_v42  ;;  %v5601_v60 = vadd.f32 %v5579_v53, %v5407_v28  ;;  %v5392_v42 = vpop.f32.mrf.mxu3  ;;  %v10000_v53 = vld [vmem:[%s12965_s3 + $0x3d8] sm:$0xff] }
 0x714   :  { %6834 = vmatpush.bf16.msra.mxu2 %v9950_v20  ;;  %6845 = vmatpush.bf16.msra.mxu3 %v9960_v14  ;;  %v10004_v14 = vld [vmem:[%s12965_s3 + $0x3f8] sm:$0xff] }
 0x715   :  { %6899 = vmatpush.bf16.msrb.mxu1 %v9990_v37  ;;  %v5642_v47 = vadd.f32 %v12550_v61, %v5601_v60 }
 0x717   :  { %v5643_v35 = vmax.f32 %v5642_v47, 0.0 }
 0x718   :  { %6835 = vmatpush.bf16.msra.mxu2 %v9949_v30  ;;  %6846 = vmatpush.bf16.msra.mxu3 %v9959_v57  ;;  %v10002_v30 = vld [vmem:[%s12965_s3 + $0x3e8] sm:$0xff]  ;;  %v4634_v57 = vadd.f32 %v12488_v62, %v12394_v36 }
 0x719   :  { %6900 = vmatpush.bf16.msrb.mxu1 %v9989_v32  ;;  %v5682_v33 = vpack.c.bf16 %v5643_v35, %v5643_v35  ;;  %v10009_v35 = vld [vmem:[%s12966_s4 + $0x20] sm:$0xff] }
 0x71a   :  { %v5581_v27 = vpop.f32.mrf.mxu1  ;;  %v4828_v11 = vadd.f32 %v12490_v7, %v4634_v57  ;;  %v10019_v57 = vld [vmem:[%s12966_s4 + $0x70] sm:$0xff] }
 0x71b   :  { %6836 = vmatmul.bf16.vlgmr.msra.gmra.mxu2 %v5679_v54  ;;  %v5602_v20 = vadd.f32 %v5581_v27, %v5408_v34  ;;  %v9999_v54 = vld [vmem:[%s12965_s3 + $0x3d0] sm:$0xff]  ;;  %v10010_v34 = vld [vmem:[%s12966_s4 + $0x28] sm:$0xff] }
 0x71c   :  { %6867 = vmatpush.bf16.msrb.mxu2 %v9980_v58  ;;  %6847 = vmatpush.bf16.msra.mxu3 %v9958_v4  ;;  %v10001_v58 = vld [vmem:[%s12965_s3 + $0x3e0] sm:$0xff]  ;;  %v5022_v37 = vadd.f32 %v12544_v46, %v4828_v11 }
 0x71d   :  { %v5645_v12 = vadd.f32 %v12550_v61, %v5602_v20  ;;  %v10814_v46 = vld [vmem:[%s12962_s5 + $0x2] ss:$0 sm:$0xff]  ;;  %v10008_v20 = vld [vmem:[%s12966_s4 + $0x18] sm:$0xff] }
 0x71e   :  { %v5216_v36 = vadd.f32 %v5198_v51, %v5022_v37  ;;  %v10017_v37 = vld [vmem:[%s12966_s4 + $0x60] sm:$0xff] }
 0x71f   :  { %v5646_v39 = vmax.f32 %v5645_v12, 0.0  ;;  %v10006_v12 = vld [vmem:[%s12966_s4 + $0x8] sm:$0xff] }
 0x720   :  { %6868 = vmatpush.bf16.msrb.mxu2 %v9979_v45  ;;  %6848 = vmatpush.bf16.msra.mxu3 %v9957_v24  ;;  %v5410_v7 = vadd.f32 %v5392_v42, %v5216_v36  ;;  %v9998_v45 = vld [vmem:[%s12965_s3 + $0x3c8] sm:$0xff]  ;;  %v10016_v36 = vld [vmem:[%s12966_s4 + $0x58] sm:$0xff] }
 0x721   :  { %v5683_v13 = vpack.c.bf16 %v5646_v39, %v5646_v39 }
 0x722   :  { %v5584_v6 = vpop.f32.mrf.mxu1 }
 0x723   :  { %6849 = vmatmul.bf16.vlgmr.msra.gmra.mxu3 %v5680_v9  ;;  %v5603_v63 = vadd.f32 %v5584_v6, %v5409_v52 }
 0x724   :  { %6869 = vmatpush.bf16.msrb.mxu2 %v9978_v2  ;;  %6880 = vmatpush.bf16.msrb.mxu3 %v9988_v43  ;;  %v9997_v2 = vld [vmem:[%s12965_s3 + $0x3c0] sm:$0xff] }
 0x725   :  { %v5648_v3 = vadd.f32 %v12550_v61, %v5603_v63 }
 0x727   :  { %v5649_v8 = vmax.f32 %v5648_v3, 0.0 }
 0x728   :  { %6870 = vmatpush.bf16.msrb.mxu2 %v9977_v25  ;;  %6881 = vmatpush.bf16.msrb.mxu3 %v9987_v21 }
 0x729   :  { %v5684_v15 = vpack.c.bf16 %v5649_v8, %v5649_v8 }
 0x72a   :  { %v5586_v62 = vpop.f32.mrf.mxu1 }
 0x72b   :  { %6901 = vmatmul.bf16.vlgmr.msrb.gmra.mxu1 %v5684_v15  ;;  %v5604_v48 = vadd.f32 %v5586_v62, %v5410_v7  ;;  %v10011_v15 = vld [vmem:[%s12966_s4 + $0x30] sm:$0xff] }
 0x72c   :  { %6871 = vmatpush.bf16.msrb.mxu2 %v9976_v40  ;;  %6882 = vmatpush.bf16.msrb.mxu3 %v9986_v41  ;;  %v10015_v7 = vld [vmem:[%s12966_s4 + $0x50] sm:$0xff] }
 0x72d   :  { %v5651_v55 = vadd.f32 %v12550_v61, %v5604_v48 }
 0x72f   :  { %v5652_v43 = vmax.f32 %v5651_v55, 0.0 }
 0x730   :  { %6872 = vmatpush.bf16.msrb.mxu2 %v9975_v1  ;;  %6883 = vmatpush.bf16.msrb.mxu3 %v9985_v49 }
 0x731   :  { %v5685_v27 = vpack.c.bf16 %v5652_v43, %v5652_v43 }
 0x734   :  { %6873 = vmatpush.bf16.msrb.mxu2 %v9974_v0  ;;  %6884 = vmatpush.bf16.msrb.mxu3 %v9984_v17  ;;  %v10012_v17 = vld [vmem:[%s12966_s4 + $0x38] sm:$0xff] }
 0x738   :  { %6874 = vmatpush.bf16.msrb.mxu2 %v9973_v29  ;;  %6885 = vmatpush.bf16.msrb.mxu3 %v9983_v59 }
 0x73b   :  { %6875 = vmatmul.bf16.vlgmr.msrb.gmra.mxu2 %v5682_v33  ;;  %v10007_v33 = vld [vmem:[%s12966_s4 + $0x10] sm:$0xff] }
 0x73c   :  { %6906 = vmatpush.bf16.msra.mxu2 %v10004_v14  ;;  %6886 = vmatpush.bf16.msrb.mxu3 %v9982_v56 }
 0x73e   :  { %v6720_v4 = vpop.f32.mrf.mxu2 }
 0x73f   :  { %v6721_v22 = vadd.f32 %v10814_v46, %v6720_v4 }
 0x740   :  { %6907 = vmatpush.bf16.msra.mxu2 %v10003_v18  ;;  %6887 = vmatpush.bf16.msrb.mxu3 %v9981_v16  ;;  %v10005_v16 = vld [vmem:[%s12966_s4] sm:$0xff] }
 0x743   :  { %6888 = vmatmul.bf16.vlgmr.msrb.gmra.mxu3 %v5683_v13  ;;  %v10018_v13 = vld [vmem:[%s12966_s4 + $0x68] sm:$0xff] }
 0x744   :  { %6908 = vmatpush.bf16.msra.mxu2 %v10002_v30  ;;  %6986 = vmatpush.bf16.msra.mxu3 %v10012_v17  ;;  %v10020_v30 = vld [vmem:[%s12966_s4 + $0x78] sm:$0xff] }
 0x745   :  { %7067 = vmatpush.bf16.msra.mxu1 %v10020_v30 }
 0x746   :  { %v6722_v32 = vpop.f32.mrf.mxu2  ;;  %v6733_v24 = vpop.f32.mrf.mxu3 }
 0x747   :  { %v6734_v26 = vadd.f32 %v6733_v24, %v6721_v22  ;;  %v10014_v24 = vld [vmem:[%s12966_s4 + $0x48] sm:$0xff] }
 0x748   :  { %6909 = vmatpush.bf16.msra.mxu2 %v10001_v58  ;;  %6987 = vmatpush.bf16.msra.mxu3 %v10011_v15 }
 0x749   :  { %7068 = vmatpush.bf16.msra.mxu1 %v10019_v57 }
 0x74c   :  { %6910 = vmatpush.bf16.msra.mxu2 %v10000_v53  ;;  %6988 = vmatpush.bf16.msra.mxu3 %v10010_v34 }
 0x74d   :  { %7069 = vmatpush.bf16.msra.mxu1 %v10018_v13 }
 0x74e   :  { %v6735_v9 = vpop.f32.mrf.mxu3  ;;  %v6746_v25 = vpop.f32.mrf.mxu2 }
 0x74f   :  { %v6747_v21 = vadd.f32 %v6746_v25, %v6734_v26  ;;  %v10013_v26 = vld [vmem:[%s12966_s4 + $0x40] sm:$0xff] }
 0x750   :  { %6911 = vmatpush.bf16.msra.mxu2 %v9999_v54  ;;  %6989 = vmatpush.bf16.msra.mxu3 %v10009_v35 }
 0x751   :  { %7070 = vmatpush.bf16.msra.mxu1 %v10017_v37 }
 0x754   :  { %6912 = vmatpush.bf16.msra.mxu2 %v9998_v45  ;;  %6990 = vmatpush.bf16.msra.mxu3 %v10008_v20 }
 0x755   :  { %7071 = vmatpush.bf16.msra.mxu1 %v10016_v36 }
 0x756   :  { %v6748_v44 = vpop.f32.mrf.mxu2  ;;  %v6759_v10 = vpop.f32.mrf.mxu3 }
 0x757   :  { %v6760_v5 = vadd.f32 %v6759_v10, %v6747_v21  ;;  %v10816_v44 = vld [vmem:[%s12962_s5 + $0x4] ss:$0 sm:$0xff] }
 0x758   :  { %6913 = vmatpush.bf16.msra.mxu2 %v9997_v2  ;;  %6991 = vmatpush.bf16.msra.mxu3 %v10007_v33  ;;  %v10815_v2 = vld [vmem:[%s12962_s5 + $0x3] ss:$0 sm:$0xff] }
 0x759   :  { %7072 = vmatpush.bf16.msra.mxu1 %v10015_v7 }
 0x75b   :  { %6914 = vmatmul.bf16.vlgmr.msra.gmra.mxu2 %v5685_v27 }
 0x75c   :  { %6992 = vmatpush.bf16.msra.mxu3 %v10006_v12 }
 0x75d   :  { %7073 = vmatpush.bf16.msra.mxu1 %v10014_v24 }
 0x75e   :  { %v6761_v61 = vpop.f32.mrf.mxu3  ;;  %v6772_v40 = vpop.f32.mrf.mxu2 }
 0x75f   :  { %v6773_v41 = vadd.f32 %v6772_v40, %v6760_v5 }
 0x760   :  { %6993 = vmatpush.bf16.msra.mxu3 %v10005_v16 }
 0x761   :  { %7074 = vmatpush.bf16.msra.mxu1 %v10013_v26 }
 0x766   :  { %v6774_v19 = vpop.f32.mrf.mxu2  ;;  %v6785_v50 = vpop.f32.mrf.mxu3 }
 0x767   :  { %v6786_v52 = vadd.f32 %v6785_v50, %v6773_v41 }
 0x76e   :  { %v6787_v23 = vpop.f32.mrf.mxu3 }
 0x778   :  { %v6824_v28 = vpop.f32.mrf.mxu1 }
 0x77e   :  { %v6798_v6 = vpop.f32.mrf.mxu2 }
 0x77f   :  { %v6799_v63 = vadd.f32 %v6798_v6, %v6786_v52 }
 0x780   :  { %v6826_v1 = vpop.f32.mrf.mxu1 }
 0x786   :  { %v6800_v49 = vpop.f32.mrf.mxu2  ;;  %v6811_v31 = vpop.f32.mrf.mxu3 }
 0x787   :  { %v6812_v60 = vadd.f32 %v6811_v31, %v6799_v63 }
 0x789   :  { %v6825_v3 = vadd.f32 %v6824_v28, %v6812_v60 }
 0x78e   :  { %v6813_v8 = vpop.f32.mrf.mxu3 }
 0x790   :  { %v6863_v0 = vpop.f32.mrf.mxu1 }
 0x798   :  { %v6865_v47 = vpop.f32.mrf.mxu1 }
 0x79e   :  { %v6837_v38 = vpop.f32.mrf.mxu2 }
 0x79f   :  { %v6838_v58 = vadd.f32 %v6837_v38, %v6825_v3 }
 0x7a6   :  { %v6839_v29 = vpop.f32.mrf.mxu2  ;;  %v6850_v59 = vpop.f32.mrf.mxu3 }
 0x7a7   :  { %v6851_v42 = vadd.f32 %v6850_v59, %v6838_v58 }
 0x7a8   :  { %v6902_v56 = vpop.f32.mrf.mxu1 }
 0x7a9   :  { %v6864_v62 = vadd.f32 %v6863_v0, %v6851_v42 }
 0x7ae   :  { %v6852_v14 = vpop.f32.mrf.mxu3 }
 0x7b0   :  { %v6904_v18 = vpop.f32.mrf.mxu1 }
 0x7be   :  { %v6876_v39 = vpop.f32.mrf.mxu2 }
 0x7bf   :  { %v6877_v4 = vadd.f32 %v6876_v39, %v6864_v62 }
 0x7c6   :  { %v6878_v51 = vpop.f32.mrf.mxu2  ;;  %v6889_v11 = vpop.f32.mrf.mxu3 }
 0x7c7   :  { %v6890_v54 = vadd.f32 %v6889_v11, %v6877_v4 }
 0x7c9   :  { %v6903_v48 = vadd.f32 %v6902_v56, %v6890_v54 }
 0x7ce   :  { %v6891_v53 = vpop.f32.mrf.mxu3 }
 0x7de   :  { %v6915_v46 = vpop.f32.mrf.mxu2 }
 0x7df   :  { %v6916_v45 = vadd.f32 %v6915_v46, %v6903_v48 }
 0x7e1   :  { %v6919_v55 = vmax.f32 %v6916_v45, 0.0 }
 0x7e3   :  { %v6920_v22 = vpack.c.bf16 %v6919_v55, %v6919_v55 }
 0x7e5   :  { %6994 = vmatmul.bf16.vlgmr.msra.gmra.mxu3 %v6920_v22 }
 0x7e6   :  { %v6917_v32 = vpop.f32.mrf.mxu2 }
 0x868   :  { %v6995_v43 = vpop.f32.mrf.mxu3 }
 0x869   :  { %v6996_v27 = vadd.f32 %v10815_v2, %v6995_v43 }
 0x86b   :  { %v6999_v9 = vmax.f32 %v6996_v27, 0.0 }
 0x86d   :  { %v7000_v25 = vpack.c.bf16 %v6999_v9, %v6999_v9 }
 0x86f   :  { %7075 = vmatmul.bf16.vlgmr.msra.gmra.mxu1 %v7000_v25 }
 0x870   :  { %v6997_v21 = vpop.f32.mrf.mxu3 }
 0x8ec   :  { %v7076_v10 = vpop.f32.mrf.mxu1 }
 0x8ed   :  { %v7077_v5 = vadd.f32 %v10816_v44, %v7076_v10 }
 0x8ef   :  { %7080 = vst [vmem:[%s12967_s6] sm:$0xff] %v7077_v5 }
 0x8f4   :  { %v7078_v61 = vpop.f32.mrf.mxu1 }

</bundles_post_ra>
